<compile_context>
chip_gen: v7x
topology: tpu7x:2x2x1
jax: 0.10.0
libtpu: 0.0.40
codegen_flags: <defaults>
</compile_context>

<pallas_src>
import jax
import jax.numpy as jnp
from jax.experimental import pallas as pl
from jax.experimental.pallas import tpu as pltpu

# ----- small synthetic config (original: 32/512/8/2048/10) -----
NUM_LAYERS = 2
D_MODEL = 32
NUM_HEADS = 4
D_FF = 64
SEQ_LEN = 8
BATCH = 2
DEPTH = D_MODEL // NUM_HEADS


# --------------------------- Pallas kernel ---------------------------

def decoder_kernel(x_ref, enc_ref, tgt_m_ref, src_m_ref,
                   wp_ref, bp_ref, wo_ref, wf_ref, bm_ref, out_ref):
    B, S, D = x_ref.shape
    H, E, L = NUM_HEADS, DEPTH, NUM_LAYERS

    x = x_ref[...]            # (B, S, D)
    enc = enc_ref[...]        # (B, S, D)
    tgt_m = tgt_m_ref[...]    # (B*H, 1, S) additive mask (broadcast over queries)
    src_m = src_m_ref[...]    # (B*H, 1, S)

    def proj(src, w_h, b_h):
        """src (B,S,D) projected with per-head weights (N,D,E) -> (B,N,S,E)."""
        N = w_h.shape[0]
        src_b = jnp.broadcast_to(src[:, None], (B, N, S, D)).reshape(B * N, S, D)
        w_b = jnp.broadcast_to(w_h[None], (B, N, D, E)).reshape(B * N, D, E)
        y = jnp.einsum('gsd,gde->gse', src_b, w_b,
                       preferred_element_type=jnp.float32)      # (B*N, S, E)
        return y.reshape(B, N, S, E) + b_h[None]

    def attention(q, k, v, mask_g, wo_h, bo):
        """q/k/v (B,H,S,E); mask (B*H,1,S); wo_h (H,E,D); bo (1,D) -> (B,S,D)."""
        qg = q.reshape(B * H, S, E)
        kg = k.reshape(B * H, S, E)
        vg = v.reshape(B * H, S, E)
        # 1/sqrt(depth) already folded into Wq/bq at pack time.
        s = jnp.einsum('gqe,gke->gqk', qg, kg,
                       preferred_element_type=jnp.float32)      # (B*H, Sq, Sk)
        s = s + mask_g
        m = jnp.max(s, axis=-1, keepdims=True)
        p = jnp.exp(s - m)
        p = p * pl.reciprocal(jnp.sum(p, axis=-1, keepdims=True), approx=True)
        o = jnp.einsum('gqk,gke->gqe', p, vg,
                       preferred_element_type=jnp.float32)      # (B*H, S, E)
        # Output projection with the head-concat folded in: per-head (E,D)
        # matmuls, then sum over heads (leading-dim adds only).
        wo_b = jnp.broadcast_to(wo_h[None], (B, H, E, D)).reshape(B * H, E, D)
        oh = jnp.einsum('gse,gef->gsf', o, wo_b,
                        preferred_element_type=jnp.float32)     # (B*H, S, D)
        oh4 = oh.reshape(B, H, S, D)
        acc = oh4[:, 0]
        for hh in range(1, H):
            acc = acc + oh4[:, hh]
        return acc + bo

    for layer in range(L):                  # static unroll: layers fused
        wp = wp_ref[layer]                  # (6H, D, E): q1 k1 v1 q2 k2 v2
        bp = bp_ref[layer]                  # (6H, 1, E)
        wo = wo_ref[layer]                  # (2H, E, D): wo1 | wo2
        wf = wf_ref[layer]                  # (2, D, FF): w1 | w2^T
        bm = bm_ref[layer]                  # (4, 1, FF): bo1 | bo2 | b2 | b1

        # --- masked self-attention + residual (fused QKV projection) ---
        qkv = proj(x, wp[0:3 * H], bp[0:3 * H])                  # (B, 3H, S, E)
        a = attention(qkv[:, 0:H], qkv[:, H:2 * H], qkv[:, 2 * H:3 * H],
                      tgt_m, wo[0:H], bm[0, :, :D])
        x = x + a

        # --- cross-attention over encoder output + residual (fused KV) ---
        q2 = proj(x, wp[3 * H:4 * H], bp[3 * H:4 * H])           # (B,  H, S, E)
        kv = proj(enc, wp[4 * H:6 * H], bp[4 * H:6 * H])         # (B, 2H, S, E)
        a = attention(q2, kv[:, 0:H], kv[:, H:2 * H],
                      src_m, wo[H:2 * H], bm[1, :, :D])
        x = x + a

        # --- position-wise FFN (NO residual, matching the PyTorch module) ---
        h = jnp.einsum('bsd,df->bsf', x, wf[0],
                       preferred_element_type=jnp.float32) + bm[3]
        h = jnp.maximum(h, 0.0)
        x = jnp.einsum('bsf,df->bsd', h, wf[1],
                       preferred_element_type=jnp.float32) + bm[2, :, :D]

    out_ref[...] = x


# --------------------------- parameter packing (wrapper side) ---------------------------

def _heads_in(w):      # (D, D) -> (H, D, DEPTH): per-head input-projection weights
    return w.reshape(D_MODEL, NUM_HEADS, DEPTH).transpose(1, 0, 2)


def _heads_in_b(b):    # (1, D) -> (H, 1, DEPTH)
    return b.reshape(NUM_HEADS, DEPTH)[:, None, :]


def _heads_out(w):     # (D, D) -> (H, DEPTH, D): per-head output-projection weights
    return w.reshape(NUM_HEADS, DEPTH, D_MODEL)


def pack_params(layer_params):
    """Pack the 20 per-layer arrays into 5 stacked slabs (done once, outside the kernel)."""
    scale = 1.0 / jnp.sqrt(jnp.float32(DEPTH))
    wp_l, bp_l, wo_l, wf_l, bm_l = [], [], [], [], []
    for p in layer_params:
        (wq1, bq1, wk1, bk1, wv1, bv1, wo1, bo1,
         wq2, bq2, wk2, bk2, wv2, bv2, wo2, bo2,
         w1, b1, w2, b2) = p
        wp_l.append(jnp.concatenate(
            [_heads_in(wq1) * scale, _heads_in(wk1), _heads_in(wv1),
             _heads_in(wq2) * scale, _heads_in(wk2), _heads_in(wv2)], axis=0))
        bp_l.append(jnp.concatenate(
            [_heads_in_b(bq1) * scale, _heads_in_b(bk1), _heads_in_b(bv1),
             _heads_in_b(bq2) * scale, _heads_in_b(bk2), _heads_in_b(bv2)], axis=0))
        wo_l.append(jnp.concatenate([_heads_out(wo1), _heads_out(wo2)], axis=0))
        wf_l.append(jnp.stack([w1, w2.T], axis=0))
        pad = lambda b: jnp.pad(b, ((0, 0), (0, D_FF - b.shape[1])))
        bm_l.append(jnp.stack([pad(bo1), pad(bo2), pad(b2), b1], axis=0))
    return (jnp.stack(wp_l), jnp.stack(bp_l), jnp.stack(wo_l),
            jnp.stack(wf_l), jnp.stack(bm_l))


def _expand_mask(mask):
    """(B, S) additive mask -> (B*H, 1, S), broadcast over heads & query positions."""
    B, S = mask.shape
    return jnp.broadcast_to(mask[:, None, None, :],
                            (B, NUM_HEADS, 1, S)).reshape(B * NUM_HEADS, 1, S)


@jax.jit
def transformer_decoder(x, enc, src_mask, tgt_mask, packed):
    wp, bp, wo, wf, bm = packed
    return pl.pallas_call(
        decoder_kernel,
        out_shape=jax.ShapeDtypeStruct(x.shape, jnp.float32),
        compiler_params=pltpu.CompilerParams(vmem_limit_bytes=32 * 1024 * 1024),
    )(x, enc, _expand_mask(tgt_mask), _expand_mask(src_mask), wp, bp, wo, wf, bm)


# --------------------------- parameters ---------------------------

def init_params(key):
    layer_params = []
    per_layer_shapes = (
        [(D_MODEL, D_MODEL), (1, D_MODEL)] * 4      # self-attn Wq,Wk,Wv,Wo (+biases)
        + [(D_MODEL, D_MODEL), (1, D_MODEL)] * 4    # cross-attn Wq,Wk,Wv,Wo (+biases)
        + [(D_MODEL, D_FF), (1, D_FF),
           (D_FF, D_MODEL), (1, D_MODEL)]           # FFN linear1, linear2
    )
    for _ in range(NUM_LAYERS):
        p = []
        for shape in per_layer_shapes:
            key, sub = jax.random.split(key)
            p.append(0.05 * jax.random.normal(sub, shape, dtype=jnp.float32))
        layer_params.append(p)
    return layer_params


# --------------------------- pure-JAX reference ---------------------------

def _ref_mha(q, k, v, wq, bq, wk, bk, wv, bv, wo, bo, mask):
    B, S, D = q.shape
    Q = q @ wq + bq
    K = k @ wk + bk
    V = v @ wv + bv
    split = lambda t: t.reshape(B, -1, NUM_HEADS, DEPTH).transpose(0, 2, 1, 3)
    Qh, Kh, Vh = split(Q), split(K), split(V)
    scores = jnp.einsum("bhqd,bhkd->bhqk", Qh, Kh) / jnp.sqrt(jnp.float32(DEPTH))
    scores = scores + mask[:, None, None, :]
    p = jax.nn.softmax(scores, axis=-1)
    o = jnp.einsum("bhqk,bhkd->bhqd", p, Vh).transpose(0, 2, 1, 3).reshape(B, -1, D)
    return o @ wo + bo


def reference(x, enc, src_mask, tgt_mask, layer_params):
    for p in layer_params:
        (wq1, bq1, wk1, bk1, wv1, bv1, wo1, bo1,
         wq2, bq2, wk2, bk2, wv2, bv2, wo2, bo2,
         w1, b1, w2, b2) = p
        a1 = _ref_mha(x, x, x, wq1, bq1, wk1, bk1, wv1, bv1, wo1, bo1, tgt_mask)
        x = x + a1
        a2 = _ref_mha(x, enc, enc, wq2, bq2, wk2, bk2, wv2, bv2, wo2, bo2, src_mask)
        x = x + a2
        h = jnp.maximum(x @ w1 + b1, 0.0)
        x = h @ w2 + b2
    return x


# --------------------------- main ---------------------------

if __name__ == "__main__":
    key = jax.random.PRNGKey(0)
    kx, kenc, kp = jax.random.split(key, 3)
    x = jax.random.normal(kx, (BATCH, SEQ_LEN, D_MODEL), dtype=jnp.float32)
    enc = jax.random.normal(kenc, (BATCH, SEQ_LEN, D_MODEL), dtype=jnp.float32)
    src_mask = jnp.ones((BATCH, SEQ_LEN), dtype=jnp.float32)
    tgt_mask = jnp.ones((BATCH, SEQ_LEN), dtype=jnp.float32)
    layer_params = init_params(kp)
    packed = pack_params(layer_params)

    out = transformer_decoder(x, enc, src_mask, tgt_mask, packed)
    out = jax.block_until_ready(out)

    ref = reference(x, enc, src_mask, tgt_mask, layer_params)
    max_err = float(jnp.max(jnp.abs(out - ref)))
    assert jnp.allclose(out, ref, atol=3e-3, rtol=3e-3), f"max err {max_err}"

    print("KERNEL_OK")
</pallas_src>

<mosaic_0001>
module attributes {stable_mosaic.version = 11 : i64} {
  func.func @decoder_kernel(%arg0: memref<2x8x32xf32, #tpu.memory_space<vmem>>, %arg1: memref<2x8x32xf32, #tpu.memory_space<vmem>>, %arg2: memref<8x1x8xf32, #tpu.memory_space<vmem>>, %arg3: memref<8x1x8xf32, #tpu.memory_space<vmem>>, %arg4: memref<2x24x32x8xf32, #tpu.memory_space<vmem>>, %arg5: memref<2x24x1x8xf32, #tpu.memory_space<vmem>>, %arg6: memref<2x8x8x32xf32, #tpu.memory_space<vmem>>, %arg7: memref<2x2x32x64xf32, #tpu.memory_space<vmem>>, %arg8: memref<2x4x1x64xf32, #tpu.memory_space<vmem>>, %arg9: memref<2x8x32xf32, #tpu.memory_space<vmem>>) attributes {dimension_semantics = [], scalar_prefetch = 0 : i64, scratch_operands = 0 : i64, tpu.core_type = #tpu.core_type<tc>} {
    %c0 = arith.constant 0 : index
    %c0_0 = arith.constant 0 : index
    %c0_1 = arith.constant 0 : index
    %0 = vector.load %arg0[%c0, %c0_0, %c0_1] : memref<2x8x32xf32, #tpu.memory_space<vmem>>, vector<2x8x32xf32>
    %c0_2 = arith.constant 0 : index
    %c0_3 = arith.constant 0 : index
    %c0_4 = arith.constant 0 : index
    %1 = vector.load %arg1[%c0_2, %c0_3, %c0_4] : memref<2x8x32xf32, #tpu.memory_space<vmem>>, vector<2x8x32xf32>
    %c0_5 = arith.constant 0 : index
    %c0_6 = arith.constant 0 : index
    %c0_7 = arith.constant 0 : index
    %2 = vector.load %arg2[%c0_5, %c0_6, %c0_7] : memref<8x1x8xf32, #tpu.memory_space<vmem>>, vector<8x1x8xf32>
    %c0_8 = arith.constant 0 : index
    %c0_9 = arith.constant 0 : index
    %c0_10 = arith.constant 0 : index
    %3 = vector.load %arg3[%c0_8, %c0_9, %c0_10] : memref<8x1x8xf32, #tpu.memory_space<vmem>>, vector<8x1x8xf32>
    %c0_11 = arith.constant 0 : index
    %c0_12 = arith.constant 0 : index
    %c0_13 = arith.constant 0 : index
    %c0_14 = arith.constant 0 : index
    %4 = vector.load %arg4[%c0_11, %c0_12, %c0_13, %c0_14] : memref<2x24x32x8xf32, #tpu.memory_space<vmem>>, vector<1x24x32x8xf32>
    %5 = vector.shape_cast %4 : vector<1x24x32x8xf32> to vector<24x32x8xf32>
    %c0_15 = arith.constant 0 : index
    %c0_16 = arith.constant 0 : index
    %c0_17 = arith.constant 0 : index
    %c0_18 = arith.constant 0 : index
    %6 = vector.load %arg5[%c0_15, %c0_16, %c0_17, %c0_18] : memref<2x24x1x8xf32, #tpu.memory_space<vmem>>, vector<1x24x1x8xf32>
    %7 = vector.shape_cast %6 : vector<1x24x1x8xf32> to vector<24x1x8xf32>
    %c0_19 = arith.constant 0 : index
    %c0_20 = arith.constant 0 : index
    %c0_21 = arith.constant 0 : index
    %c0_22 = arith.constant 0 : index
    %8 = vector.load %arg6[%c0_19, %c0_20, %c0_21, %c0_22] : memref<2x8x8x32xf32, #tpu.memory_space<vmem>>, vector<1x8x8x32xf32>
    %9 = vector.shape_cast %8 : vector<1x8x8x32xf32> to vector<8x8x32xf32>
    %c0_23 = arith.constant 0 : index
    %c0_24 = arith.constant 0 : index
    %c0_25 = arith.constant 0 : index
    %c0_26 = arith.constant 0 : index
    %10 = vector.load %arg7[%c0_23, %c0_24, %c0_25, %c0_26] : memref<2x2x32x64xf32, #tpu.memory_space<vmem>>, vector<1x2x32x64xf32>
    %11 = vector.shape_cast %10 : vector<1x2x32x64xf32> to vector<2x32x64xf32>
    %c0_27 = arith.constant 0 : index
    %c0_28 = arith.constant 0 : index
    %c0_29 = arith.constant 0 : index
    %c0_30 = arith.constant 0 : index
    %12 = vector.load %arg8[%c0_27, %c0_28, %c0_29, %c0_30] : memref<2x4x1x64xf32, #tpu.memory_space<vmem>>, vector<1x4x1x64xf32>
    %13 = vector.shape_cast %12 : vector<1x4x1x64xf32> to vector<4x1x64xf32>
    %14 = vector.extract_strided_slice %5 {offsets = [0, 0, 0], sizes = [12, 32, 8], strides = [1, 1, 1]} : vector<24x32x8xf32> to vector<12x32x8xf32>
    %15 = vector.extract_strided_slice %7 {offsets = [0, 0, 0], sizes = [12, 1, 8], strides = [1, 1, 1]} : vector<24x1x8xf32> to vector<12x1x8xf32>
    %16 = vector.shape_cast %0 : vector<2x8x32xf32> to vector<2x1x8x32xf32>
    %17 = vector.shape_cast %16 : vector<2x1x8x32xf32> to vector<2x1x8x32xf32>
    %18 = vector.broadcast %17 : vector<2x1x8x32xf32> to vector<2x12x8x32xf32>
    %19 = vector.shape_cast %18 : vector<2x12x8x32xf32> to vector<24x8x32xf32>
    %20 = vector.shape_cast %14 : vector<12x32x8xf32> to vector<1x12x32x8xf32>
    %21 = vector.shape_cast %20 : vector<1x12x32x8xf32> to vector<1x12x32x8xf32>
    %22 = vector.broadcast %21 : vector<1x12x32x8xf32> to vector<2x12x32x8xf32>
    %23 = vector.shape_cast %22 : vector<2x12x32x8xf32> to vector<24x32x8xf32>
    "tpu.trace_start"() <{level = 10 : i32, message = "gsd,gde->gse"}> : () -> ()
    %cst = arith.constant dense<0.000000e+00> : vector<24x8x8xf32>
    %24 = tpu.matmul %19, %23, %cst {dimension_numbers = #tpu.dot_dimension_numbers<[2], [1], [1], [2], [0, 0, 0, 1, 1, 2], [0], [0]>} : vector<24x8x32xf32>, vector<24x32x8xf32>, vector<24x8x8xf32> -> vector<24x8x8xf32>
    "tpu.trace_stop"() : () -> ()
    %25 = vector.shape_cast %24 : vector<24x8x8xf32> to vector<2x12x8x8xf32>
    %26 = vector.shape_cast %15 : vector<12x1x8xf32> to vector<1x12x1x8xf32>
    %27 = vector.broadcast %26 : vector<1x12x1x8xf32> to vector<2x12x8x8xf32>
    %28 = arith.addf %25, %27 : vector<2x12x8x8xf32>
    %29 = vector.extract_strided_slice %28 {offsets = [0, 0, 0, 0], sizes = [2, 4, 8, 8], strides = [1, 1, 1, 1]} : vector<2x12x8x8xf32> to vector<2x4x8x8xf32>
    %30 = vector.extract_strided_slice %28 {offsets = [0, 4, 0, 0], sizes = [2, 4, 8, 8], strides = [1, 1, 1, 1]} : vector<2x12x8x8xf32> to vector<2x4x8x8xf32>
    %31 = vector.extract_strided_slice %28 {offsets = [0, 8, 0, 0], sizes = [2, 4, 8, 8], strides = [1, 1, 1, 1]} : vector<2x12x8x8xf32> to vector<2x4x8x8xf32>
    %32 = vector.extract_strided_slice %9 {offsets = [0, 0, 0], sizes = [4, 8, 32], strides = [1, 1, 1]} : vector<8x8x32xf32> to vector<4x8x32xf32>
    %33 = vector.extract_strided_slice %13 {offsets = [0, 0, 0], sizes = [1, 1, 32], strides = [1, 1, 1]} : vector<4x1x64xf32> to vector<1x1x32xf32>
    %34 = vector.shape_cast %33 : vector<1x1x32xf32> to vector<1x32xf32>
    %35 = vector.shape_cast %29 : vector<2x4x8x8xf32> to vector<8x8x8xf32>
    %36 = vector.shape_cast %30 : vector<2x4x8x8xf32> to vector<8x8x8xf32>
    %37 = vector.shape_cast %31 : vector<2x4x8x8xf32> to vector<8x8x8xf32>
    "tpu.trace_start"() <{level = 10 : i32, message = "gqe,gke->gqk"}> : () -> ()
    %cst_31 = arith.constant dense<0.000000e+00> : vector<8x8x8xf32>
    %38 = tpu.matmul %35, %36, %cst_31 {dimension_numbers = #tpu.dot_dimension_numbers<[2], [2], [1], [1], [0, 0, 0, 1, 1, 1], [0], [0]>} : vector<8x8x8xf32>, vector<8x8x8xf32>, vector<8x8x8xf32> -> vector<8x8x8xf32>
    "tpu.trace_stop"() : () -> ()
    %39 = vector.broadcast %2 : vector<8x1x8xf32> to vector<8x8x8xf32>
    %40 = arith.addf %38, %39 : vector<8x8x8xf32>
    %cst_32 = arith.constant dense<0xFF800000> : vector<8x8xf32>
    %41 = vector.multi_reduction <maximumf>, %40, %cst_32 [2] : vector<8x8x8xf32> to vector<8x8xf32>
    %42 = vector.shape_cast %41 : vector<8x8xf32> to vector<8x8x1xf32>
    %43 = vector.broadcast %42 : vector<8x8x1xf32> to vector<8x8x8xf32>
    %44 = arith.subf %40, %43 : vector<8x8x8xf32>
    %45 = math.exp %44 : vector<8x8x8xf32>
    %cst_33 = arith.constant dense<0.000000e+00> : vector<8x8xf32>
    %46 = vector.multi_reduction <add>, %45, %cst_33 [2] : vector<8x8x8xf32> to vector<8x8xf32>
    %47 = vector.shape_cast %46 : vector<8x8xf32> to vector<8x8x1xf32>
    %48 = tpu.reciprocal %47 {approx = true} : vector<8x8x1xf32> -> vector<8x8x1xf32>
    %49 = vector.broadcast %48 : vector<8x8x1xf32> to vector<8x8x8xf32>
    %50 = arith.mulf %45, %49 : vector<8x8x8xf32>
    "tpu.trace_start"() <{level = 10 : i32, message = "gqk,gke->gqe"}> : () -> ()
    %cst_34 = arith.constant dense<0.000000e+00> : vector<8x8x8xf32>
    %51 = tpu.matmul %50, %37, %cst_34 {dimension_numbers = #tpu.dot_dimension_numbers<[2], [1], [1], [2], [0, 0, 0, 1, 1, 2], [0], [0]>} : vector<8x8x8xf32>, vector<8x8x8xf32>, vector<8x8x8xf32> -> vector<8x8x8xf32>
    "tpu.trace_stop"() : () -> ()
    %52 = vector.shape_cast %32 : vector<4x8x32xf32> to vector<1x4x8x32xf32>
    %53 = vector.shape_cast %52 : vector<1x4x8x32xf32> to vector<1x4x8x32xf32>
    %54 = vector.broadcast %53 : vector<1x4x8x32xf32> to vector<2x4x8x32xf32>
    %55 = vector.shape_cast %54 : vector<2x4x8x32xf32> to vector<8x8x32xf32>
    "tpu.trace_start"() <{level = 10 : i32, message = "gse,gef->gsf"}> : () -> ()
    %cst_35 = arith.constant dense<0.000000e+00> : vector<8x8x32xf32>
    %56 = tpu.matmul %51, %55, %cst_35 {dimension_numbers = #tpu.dot_dimension_numbers<[2], [1], [1], [2], [0, 0, 0, 1, 1, 2], [0], [0]>} : vector<8x8x8xf32>, vector<8x8x32xf32>, vector<8x8x32xf32> -> vector<8x8x32xf32>
    "tpu.trace_stop"() : () -> ()
    %57 = vector.shape_cast %56 : vector<8x8x32xf32> to vector<2x4x8x32xf32>
    %58 = vector.extract_strided_slice %57 {offsets = [0, 0, 0, 0], sizes = [2, 1, 8, 32], strides = [1, 1, 1, 1]} : vector<2x4x8x32xf32> to vector<2x1x8x32xf32>
    %59 = vector.shape_cast %58 : vector<2x1x8x32xf32> to vector<2x8x32xf32>
    %60 = vector.extract_strided_slice %57 {offsets = [0, 1, 0, 0], sizes = [2, 1, 8, 32], strides = [1, 1, 1, 1]} : vector<2x4x8x32xf32> to vector<2x1x8x32xf32>
    %61 = vector.shape_cast %60 : vector<2x1x8x32xf32> to vector<2x8x32xf32>
    %62 = arith.addf %59, %61 : vector<2x8x32xf32>
    %63 = vector.extract_strided_slice %57 {offsets = [0, 2, 0, 0], sizes = [2, 1, 8, 32], strides = [1, 1, 1, 1]} : vector<2x4x8x32xf32> to vector<2x1x8x32xf32>
    %64 = vector.shape_cast %63 : vector<2x1x8x32xf32> to vector<2x8x32xf32>
    %65 = arith.addf %62, %64 : vector<2x8x32xf32>
    %66 = vector.extract_strided_slice %57 {offsets = [0, 3, 0, 0], sizes = [2, 1, 8, 32], strides = [1, 1, 1, 1]} : vector<2x4x8x32xf32> to vector<2x1x8x32xf32>
    %67 = vector.shape_cast %66 : vector<2x1x8x32xf32> to vector<2x8x32xf32>
    %68 = arith.addf %65, %67 : vector<2x8x32xf32>
    %69 = vector.shape_cast %34 : vector<1x32xf32> to vector<1x1x32xf32>
    %70 = vector.broadcast %69 : vector<1x1x32xf32> to vector<2x8x32xf32>
    %71 = arith.addf %68, %70 : vector<2x8x32xf32>
    %72 = arith.addf %0, %71 : vector<2x8x32xf32>
    %73 = vector.extract_strided_slice %5 {offsets = [12, 0, 0], sizes = [4, 32, 8], strides = [1, 1, 1]} : vector<24x32x8xf32> to vector<4x32x8xf32>
    %74 = vector.extract_strided_slice %7 {offsets = [12, 0, 0], sizes = [4, 1, 8], strides = [1, 1, 1]} : vector<24x1x8xf32> to vector<4x1x8xf32>
    %75 = vector.shape_cast %72 : vector<2x8x32xf32> to vector<2x1x8x32xf32>
    %76 = vector.shape_cast %75 : vector<2x1x8x32xf32> to vector<2x1x8x32xf32>
    %77 = vector.broadcast %76 : vector<2x1x8x32xf32> to vector<2x4x8x32xf32>
    %78 = vector.shape_cast %77 : vector<2x4x8x32xf32> to vector<8x8x32xf32>
    %79 = vector.shape_cast %73 : vector<4x32x8xf32> to vector<1x4x32x8xf32>
    %80 = vector.shape_cast %79 : vector<1x4x32x8xf32> to vector<1x4x32x8xf32>
    %81 = vector.broadcast %80 : vector<1x4x32x8xf32> to vector<2x4x32x8xf32>
    %82 = vector.shape_cast %81 : vector<2x4x32x8xf32> to vector<8x32x8xf32>
    "tpu.trace_start"() <{level = 10 : i32, message = "gsd,gde->gse"}> : () -> ()
    %cst_36 = arith.constant dense<0.000000e+00> : vector<8x8x8xf32>
    %83 = tpu.matmul %78, %82, %cst_36 {dimension_numbers = #tpu.dot_dimension_numbers<[2], [1], [1], [2], [0, 0, 0, 1, 1, 2], [0], [0]>} : vector<8x8x32xf32>, vector<8x32x8xf32>, vector<8x8x8xf32> -> vector<8x8x8xf32>
    "tpu.trace_stop"() : () -> ()
    %84 = vector.shape_cast %83 : vector<8x8x8xf32> to vector<2x4x8x8xf32>
    %85 = vector.shape_cast %74 : vector<4x1x8xf32> to vector<1x4x1x8xf32>
    %86 = vector.broadcast %85 : vector<1x4x1x8xf32> to vector<2x4x8x8xf32>
    %87 = arith.addf %84, %86 : vector<2x4x8x8xf32>
    %88 = vector.extract_strided_slice %5 {offsets = [16, 0, 0], sizes = [8, 32, 8], strides = [1, 1, 1]} : vector<24x32x8xf32> to vector<8x32x8xf32>
    %89 = vector.extract_strided_slice %7 {offsets = [16, 0, 0], sizes = [8, 1, 8], strides = [1, 1, 1]} : vector<24x1x8xf32> to vector<8x1x8xf32>
    %90 = vector.shape_cast %1 : vector<2x8x32xf32> to vector<2x1x8x32xf32>
    %91 = vector.shape_cast %90 : vector<2x1x8x32xf32> to vector<2x1x8x32xf32>
    %92 = vector.broadcast %91 : vector<2x1x8x32xf32> to vector<2x8x8x32xf32>
    %93 = vector.shape_cast %92 : vector<2x8x8x32xf32> to vector<16x8x32xf32>
    %94 = vector.shape_cast %88 : vector<8x32x8xf32> to vector<1x8x32x8xf32>
    %95 = vector.shape_cast %94 : vector<1x8x32x8xf32> to vector<1x8x32x8xf32>
    %96 = vector.broadcast %95 : vector<1x8x32x8xf32> to vector<2x8x32x8xf32>
    %97 = vector.shape_cast %96 : vector<2x8x32x8xf32> to vector<16x32x8xf32>
    "tpu.trace_start"() <{level = 10 : i32, message = "gsd,gde->gse"}> : () -> ()
    %cst_37 = arith.constant dense<0.000000e+00> : vector<16x8x8xf32>
    %98 = tpu.matmul %93, %97, %cst_37 {dimension_numbers = #tpu.dot_dimension_numbers<[2], [1], [1], [2], [0, 0, 0, 1, 1, 2], [0], [0]>} : vector<16x8x32xf32>, vector<16x32x8xf32>, vector<16x8x8xf32> -> vector<16x8x8xf32>
    "tpu.trace_stop"() : () -> ()
    %99 = vector.shape_cast %98 : vector<16x8x8xf32> to vector<2x8x8x8xf32>
    %100 = vector.shape_cast %89 : vector<8x1x8xf32> to vector<1x8x1x8xf32>
    %101 = vector.broadcast %100 : vector<1x8x1x8xf32> to vector<2x8x8x8xf32>
    %102 = arith.addf %99, %101 : vector<2x8x8x8xf32>
    %103 = vector.extract_strided_slice %102 {offsets = [0, 0, 0, 0], sizes = [2, 4, 8, 8], strides = [1, 1, 1, 1]} : vector<2x8x8x8xf32> to vector<2x4x8x8xf32>
    %104 = vector.extract_strided_slice %102 {offsets = [0, 4, 0, 0], sizes = [2, 4, 8, 8], strides = [1, 1, 1, 1]} : vector<2x8x8x8xf32> to vector<2x4x8x8xf32>
    %105 = vector.extract_strided_slice %9 {offsets = [4, 0, 0], sizes = [4, 8, 32], strides = [1, 1, 1]} : vector<8x8x32xf32> to vector<4x8x32xf32>
    %106 = vector.extract_strided_slice %13 {offsets = [1, 0, 0], sizes = [1, 1, 32], strides = [1, 1, 1]} : vector<4x1x64xf32> to vector<1x1x32xf32>
    %107 = vector.shape_cast %106 : vector<1x1x32xf32> to vector<1x32xf32>
    %108 = vector.shape_cast %87 : vector<2x4x8x8xf32> to vector<8x8x8xf32>
    %109 = vector.shape_cast %103 : vector<2x4x8x8xf32> to vector<8x8x8xf32>
    %110 = vector.shape_cast %104 : vector<2x4x8x8xf32> to vector<8x8x8xf32>
    "tpu.trace_start"() <{level = 10 : i32, message = "gqe,gke->gqk"}> : () -> ()
    %cst_38 = arith.constant dense<0.000000e+00> : vector<8x8x8xf32>
    %111 = tpu.matmul %108, %109, %cst_38 {dimension_numbers = #tpu.dot_dimension_numbers<[2], [2], [1], [1], [0, 0, 0, 1, 1, 1], [0], [0]>} : vector<8x8x8xf32>, vector<8x8x8xf32>, vector<8x8x8xf32> -> vector<8x8x8xf32>
    "tpu.trace_stop"() : () -> ()
    %112 = vector.broadcast %3 : vector<8x1x8xf32> to vector<8x8x8xf32>
    %113 = arith.addf %111, %112 : vector<8x8x8xf32>
    %cst_39 = arith.constant dense<0xFF800000> : vector<8x8xf32>
    %114 = vector.multi_reduction <maximumf>, %113, %cst_39 [2] : vector<8x8x8xf32> to vector<8x8xf32>
    %115 = vector.shape_cast %114 : vector<8x8xf32> to vector<8x8x1xf32>
    %116 = vector.broadcast %115 : vector<8x8x1xf32> to vector<8x8x8xf32>
    %117 = arith.subf %113, %116 : vector<8x8x8xf32>
    %118 = math.exp %117 : vector<8x8x8xf32>
    %cst_40 = arith.constant dense<0.000000e+00> : vector<8x8xf32>
    %119 = vector.multi_reduction <add>, %118, %cst_40 [2] : vector<8x8x8xf32> to vector<8x8xf32>
    %120 = vector.shape_cast %119 : vector<8x8xf32> to vector<8x8x1xf32>
    %121 = tpu.reciprocal %120 {approx = true} : vector<8x8x1xf32> -> vector<8x8x1xf32>
    %122 = vector.broadcast %121 : vector<8x8x1xf32> to vector<8x8x8xf32>
    %123 = arith.mulf %118, %122 : vector<8x8x8xf32>
    "tpu.trace_start"() <{level = 10 : i32, message = "gqk,gke->gqe"}> : () -> ()
    %cst_41 = arith.constant dense<0.000000e+00> : vector<8x8x8xf32>
    %124 = tpu.matmul %123, %110, %cst_41 {dimension_numbers = #tpu.dot_dimension_numbers<[2], [1], [1], [2], [0, 0, 0, 1, 1, 2], [0], [0]>} : vector<8x8x8xf32>, vector<8x8x8xf32>, vector<8x8x8xf32> -> vector<8x8x8xf32>
    "tpu.trace_stop"() : () -> ()
    %125 = vector.shape_cast %105 : vector<4x8x32xf32> to vector<1x4x8x32xf32>
    %126 = vector.shape_cast %125 : vector<1x4x8x32xf32> to vector<1x4x8x32xf32>
    %127 = vector.broadcast %126 : vector<1x4x8x32xf32> to vector<2x4x8x32xf32>
    %128 = vector.shape_cast %127 : vector<2x4x8x32xf32> to vector<8x8x32xf32>
    "tpu.trace_start"() <{level = 10 : i32, message = "gse,gef->gsf"}> : () -> ()
    %cst_42 = arith.constant dense<0.000000e+00> : vector<8x8x32xf32>
    %129 = tpu.matmul %124, %128, %cst_42 {dimension_numbers = #tpu.dot_dimension_numbers<[2], [1], [1], [2], [0, 0, 0, 1, 1, 2], [0], [0]>} : vector<8x8x8xf32>, vector<8x8x32xf32>, vector<8x8x32xf32> -> vector<8x8x32xf32>
    "tpu.trace_stop"() : () -> ()
    %130 = vector.shape_cast %129 : vector<8x8x32xf32> to vector<2x4x8x32xf32>
    %131 = vector.extract_strided_slice %130 {offsets = [0, 0, 0, 0], sizes = [2, 1, 8, 32], strides = [1, 1, 1, 1]} : vector<2x4x8x32xf32> to vector<2x1x8x32xf32>
    %132 = vector.shape_cast %131 : vector<2x1x8x32xf32> to vector<2x8x32xf32>
    %133 = vector.extract_strided_slice %130 {offsets = [0, 1, 0, 0], sizes = [2, 1, 8, 32], strides = [1, 1, 1, 1]} : vector<2x4x8x32xf32> to vector<2x1x8x32xf32>
    %134 = vector.shape_cast %133 : vector<2x1x8x32xf32> to vector<2x8x32xf32>
    %135 = arith.addf %132, %134 : vector<2x8x32xf32>
    %136 = vector.extract_strided_slice %130 {offsets = [0, 2, 0, 0], sizes = [2, 1, 8, 32], strides = [1, 1, 1, 1]} : vector<2x4x8x32xf32> to vector<2x1x8x32xf32>
    %137 = vector.shape_cast %136 : vector<2x1x8x32xf32> to vector<2x8x32xf32>
    %138 = arith.addf %135, %137 : vector<2x8x32xf32>
    %139 = vector.extract_strided_slice %130 {offsets = [0, 3, 0, 0], sizes = [2, 1, 8, 32], strides = [1, 1, 1, 1]} : vector<2x4x8x32xf32> to vector<2x1x8x32xf32>
    %140 = vector.shape_cast %139 : vector<2x1x8x32xf32> to vector<2x8x32xf32>
    %141 = arith.addf %138, %140 : vector<2x8x32xf32>
    %142 = vector.shape_cast %107 : vector<1x32xf32> to vector<1x1x32xf32>
    %143 = vector.broadcast %142 : vector<1x1x32xf32> to vector<2x8x32xf32>
    %144 = arith.addf %141, %143 : vector<2x8x32xf32>
    %145 = arith.addf %72, %144 : vector<2x8x32xf32>
    %146 = vector.extract_strided_slice %11 {offsets = [0, 0, 0], sizes = [1, 32, 64], strides = [1, 1, 1]} : vector<2x32x64xf32> to vector<1x32x64xf32>
    %147 = vector.shape_cast %146 : vector<1x32x64xf32> to vector<32x64xf32>
    "tpu.trace_start"() <{level = 10 : i32, message = "bsd,df->bsf"}> : () -> ()
    %cst_43 = arith.constant dense<0.000000e+00> : vector<2x8x64xf32>
    %148 = tpu.matmul %145, %147, %cst_43 {dimension_numbers = #tpu.dot_dimension_numbers<[2], [0], [0, 1], [1], [0, 0, 0, 1, 1, 1], [], []>} : vector<2x8x32xf32>, vector<32x64xf32>, vector<2x8x64xf32> -> vector<2x8x64xf32>
    "tpu.trace_stop"() : () -> ()
    %149 = vector.extract_strided_slice %13 {offsets = [3, 0, 0], sizes = [1, 1, 64], strides = [1, 1, 1]} : vector<4x1x64xf32> to vector<1x1x64xf32>
    %150 = vector.shape_cast %149 : vector<1x1x64xf32> to vector<1x64xf32>
    %151 = vector.shape_cast %150 : vector<1x64xf32> to vector<1x1x64xf32>
    %152 = vector.broadcast %151 : vector<1x1x64xf32> to vector<2x8x64xf32>
    %153 = arith.addf %148, %152 : vector<2x8x64xf32>
    %cst_44 = arith.constant 0.000000e+00 : f32
    %154 = vector.broadcast %cst_44 : f32 to vector<2x8x64xf32>
    %155 = arith.maximumf %153, %154 : vector<2x8x64xf32>
    %156 = vector.extract_strided_slice %11 {offsets = [1, 0, 0], sizes = [1, 32, 64], strides = [1, 1, 1]} : vector<2x32x64xf32> to vector<1x32x64xf32>
    %157 = vector.shape_cast %156 : vector<1x32x64xf32> to vector<32x64xf32>
    "tpu.trace_start"() <{level = 10 : i32, message = "bsf,df->bsd"}> : () -> ()
    %cst_45 = arith.constant dense<0.000000e+00> : vector<2x8x32xf32>
    %158 = tpu.matmul %155, %157, %cst_45 {dimension_numbers = #tpu.dot_dimension_numbers<[2], [1], [0, 1], [0], [0, 0, 0, 1, 1, 0], [], []>} : vector<2x8x64xf32>, vector<32x64xf32>, vector<2x8x32xf32> -> vector<2x8x32xf32>
    "tpu.trace_stop"() : () -> ()
    %159 = vector.extract_strided_slice %13 {offsets = [2, 0, 0], sizes = [1, 1, 32], strides = [1, 1, 1]} : vector<4x1x64xf32> to vector<1x1x32xf32>
    %160 = vector.shape_cast %159 : vector<1x1x32xf32> to vector<1x32xf32>
    %161 = vector.shape_cast %160 : vector<1x32xf32> to vector<1x1x32xf32>
    %162 = vector.broadcast %161 : vector<1x1x32xf32> to vector<2x8x32xf32>
    %163 = arith.addf %158, %162 : vector<2x8x32xf32>
    %c1 = arith.constant 1 : index
    %c0_46 = arith.constant 0 : index
    %c0_47 = arith.constant 0 : index
    %c0_48 = arith.constant 0 : index
    %164 = vector.load %arg4[%c1, %c0_46, %c0_47, %c0_48] : memref<2x24x32x8xf32, #tpu.memory_space<vmem>>, vector<1x24x32x8xf32>
    %165 = vector.shape_cast %164 : vector<1x24x32x8xf32> to vector<24x32x8xf32>
    %c1_49 = arith.constant 1 : index
    %c0_50 = arith.constant 0 : index
    %c0_51 = arith.constant 0 : index
    %c0_52 = arith.constant 0 : index
    %166 = vector.load %arg5[%c1_49, %c0_50, %c0_51, %c0_52] : memref<2x24x1x8xf32, #tpu.memory_space<vmem>>, vector<1x24x1x8xf32>
    %167 = vector.shape_cast %166 : vector<1x24x1x8xf32> to vector<24x1x8xf32>
    %c1_53 = arith.constant 1 : index
    %c0_54 = arith.constant 0 : index
    %c0_55 = arith.constant 0 : index
    %c0_56 = arith.constant 0 : index
    %168 = vector.load %arg6[%c1_53, %c0_54, %c0_55, %c0_56] : memref<2x8x8x32xf32, #tpu.memory_space<vmem>>, vector<1x8x8x32xf32>
    %169 = vector.shape_cast %168 : vector<1x8x8x32xf32> to vector<8x8x32xf32>
    %c1_57 = arith.constant 1 : index
    %c0_58 = arith.constant 0 : index
    %c0_59 = arith.constant 0 : index
    %c0_60 = arith.constant 0 : index
    %170 = vector.load %arg7[%c1_57, %c0_58, %c0_59, %c0_60] : memref<2x2x32x64xf32, #tpu.memory_space<vmem>>, vector<1x2x32x64xf32>
    %171 = vector.shape_cast %170 : vector<1x2x32x64xf32> to vector<2x32x64xf32>
    %c1_61 = arith.constant 1 : index
    %c0_62 = arith.constant 0 : index
    %c0_63 = arith.constant 0 : index
    %c0_64 = arith.constant 0 : index
    %172 = vector.load %arg8[%c1_61, %c0_62, %c0_63, %c0_64] : memref<2x4x1x64xf32, #tpu.memory_space<vmem>>, vector<1x4x1x64xf32>
    %173 = vector.shape_cast %172 : vector<1x4x1x64xf32> to vector<4x1x64xf32>
    %174 = vector.extract_strided_slice %165 {offsets = [0, 0, 0], sizes = [12, 32, 8], strides = [1, 1, 1]} : vector<24x32x8xf32> to vector<12x32x8xf32>
    %175 = vector.extract_strided_slice %167 {offsets = [0, 0, 0], sizes = [12, 1, 8], strides = [1, 1, 1]} : vector<24x1x8xf32> to vector<12x1x8xf32>
    %176 = vector.shape_cast %163 : vector<2x8x32xf32> to vector<2x1x8x32xf32>
    %177 = vector.shape_cast %176 : vector<2x1x8x32xf32> to vector<2x1x8x32xf32>
    %178 = vector.broadcast %177 : vector<2x1x8x32xf32> to vector<2x12x8x32xf32>
    %179 = vector.shape_cast %178 : vector<2x12x8x32xf32> to vector<24x8x32xf32>
    %180 = vector.shape_cast %174 : vector<12x32x8xf32> to vector<1x12x32x8xf32>
    %181 = vector.shape_cast %180 : vector<1x12x32x8xf32> to vector<1x12x32x8xf32>
    %182 = vector.broadcast %181 : vector<1x12x32x8xf32> to vector<2x12x32x8xf32>
    %183 = vector.shape_cast %182 : vector<2x12x32x8xf32> to vector<24x32x8xf32>
    "tpu.trace_start"() <{level = 10 : i32, message = "gsd,gde->gse"}> : () -> ()
    %cst_65 = arith.constant dense<0.000000e+00> : vector<24x8x8xf32>
    %184 = tpu.matmul %179, %183, %cst_65 {dimension_numbers = #tpu.dot_dimension_numbers<[2], [1], [1], [2], [0, 0, 0, 1, 1, 2], [0], [0]>} : vector<24x8x32xf32>, vector<24x32x8xf32>, vector<24x8x8xf32> -> vector<24x8x8xf32>
    "tpu.trace_stop"() : () -> ()
    %185 = vector.shape_cast %184 : vector<24x8x8xf32> to vector<2x12x8x8xf32>
    %186 = vector.shape_cast %175 : vector<12x1x8xf32> to vector<1x12x1x8xf32>
    %187 = vector.broadcast %186 : vector<1x12x1x8xf32> to vector<2x12x8x8xf32>
    %188 = arith.addf %185, %187 : vector<2x12x8x8xf32>
    %189 = vector.extract_strided_slice %188 {offsets = [0, 0, 0, 0], sizes = [2, 4, 8, 8], strides = [1, 1, 1, 1]} : vector<2x12x8x8xf32> to vector<2x4x8x8xf32>
    %190 = vector.extract_strided_slice %188 {offsets = [0, 4, 0, 0], sizes = [2, 4, 8, 8], strides = [1, 1, 1, 1]} : vector<2x12x8x8xf32> to vector<2x4x8x8xf32>
    %191 = vector.extract_strided_slice %188 {offsets = [0, 8, 0, 0], sizes = [2, 4, 8, 8], strides = [1, 1, 1, 1]} : vector<2x12x8x8xf32> to vector<2x4x8x8xf32>
    %192 = vector.extract_strided_slice %169 {offsets = [0, 0, 0], sizes = [4, 8, 32], strides = [1, 1, 1]} : vector<8x8x32xf32> to vector<4x8x32xf32>
    %193 = vector.extract_strided_slice %173 {offsets = [0, 0, 0], sizes = [1, 1, 32], strides = [1, 1, 1]} : vector<4x1x64xf32> to vector<1x1x32xf32>
    %194 = vector.shape_cast %193 : vector<1x1x32xf32> to vector<1x32xf32>
    %195 = vector.shape_cast %189 : vector<2x4x8x8xf32> to vector<8x8x8xf32>
    %196 = vector.shape_cast %190 : vector<2x4x8x8xf32> to vector<8x8x8xf32>
    %197 = vector.shape_cast %191 : vector<2x4x8x8xf32> to vector<8x8x8xf32>
    "tpu.trace_start"() <{level = 10 : i32, message = "gqe,gke->gqk"}> : () -> ()
    %cst_66 = arith.constant dense<0.000000e+00> : vector<8x8x8xf32>
    %198 = tpu.matmul %195, %196, %cst_66 {dimension_numbers = #tpu.dot_dimension_numbers<[2], [2], [1], [1], [0, 0, 0, 1, 1, 1], [0], [0]>} : vector<8x8x8xf32>, vector<8x8x8xf32>, vector<8x8x8xf32> -> vector<8x8x8xf32>
    "tpu.trace_stop"() : () -> ()
    %199 = vector.broadcast %2 : vector<8x1x8xf32> to vector<8x8x8xf32>
    %200 = arith.addf %198, %199 : vector<8x8x8xf32>
    %cst_67 = arith.constant dense<0xFF800000> : vector<8x8xf32>
    %201 = vector.multi_reduction <maximumf>, %200, %cst_67 [2] : vector<8x8x8xf32> to vector<8x8xf32>
    %202 = vector.shape_cast %201 : vector<8x8xf32> to vector<8x8x1xf32>
    %203 = vector.broadcast %202 : vector<8x8x1xf32> to vector<8x8x8xf32>
    %204 = arith.subf %200, %203 : vector<8x8x8xf32>
    %205 = math.exp %204 : vector<8x8x8xf32>
    %cst_68 = arith.constant dense<0.000000e+00> : vector<8x8xf32>
    %206 = vector.multi_reduction <add>, %205, %cst_68 [2] : vector<8x8x8xf32> to vector<8x8xf32>
    %207 = vector.shape_cast %206 : vector<8x8xf32> to vector<8x8x1xf32>
    %208 = tpu.reciprocal %207 {approx = true} : vector<8x8x1xf32> -> vector<8x8x1xf32>
    %209 = vector.broadcast %208 : vector<8x8x1xf32> to vector<8x8x8xf32>
    %210 = arith.mulf %205, %209 : vector<8x8x8xf32>
    "tpu.trace_start"() <{level = 10 : i32, message = "gqk,gke->gqe"}> : () -> ()
    %cst_69 = arith.constant dense<0.000000e+00> : vector<8x8x8xf32>
    %211 = tpu.matmul %210, %197, %cst_69 {dimension_numbers = #tpu.dot_dimension_numbers<[2], [1], [1], [2], [0, 0, 0, 1, 1, 2], [0], [0]>} : vector<8x8x8xf32>, vector<8x8x8xf32>, vector<8x8x8xf32> -> vector<8x8x8xf32>
    "tpu.trace_stop"() : () -> ()
    %212 = vector.shape_cast %192 : vector<4x8x32xf32> to vector<1x4x8x32xf32>
    %213 = vector.shape_cast %212 : vector<1x4x8x32xf32> to vector<1x4x8x32xf32>
    %214 = vector.broadcast %213 : vector<1x4x8x32xf32> to vector<2x4x8x32xf32>
    %215 = vector.shape_cast %214 : vector<2x4x8x32xf32> to vector<8x8x32xf32>
    "tpu.trace_start"() <{level = 10 : i32, message = "gse,gef->gsf"}> : () -> ()
    %cst_70 = arith.constant dense<0.000000e+00> : vector<8x8x32xf32>
    %216 = tpu.matmul %211, %215, %cst_70 {dimension_numbers = #tpu.dot_dimension_numbers<[2], [1], [1], [2], [0, 0, 0, 1, 1, 2], [0], [0]>} : vector<8x8x8xf32>, vector<8x8x32xf32>, vector<8x8x32xf32> -> vector<8x8x32xf32>
    "tpu.trace_stop"() : () -> ()
    %217 = vector.shape_cast %216 : vector<8x8x32xf32> to vector<2x4x8x32xf32>
    %218 = vector.extract_strided_slice %217 {offsets = [0, 0, 0, 0], sizes = [2, 1, 8, 32], strides = [1, 1, 1, 1]} : vector<2x4x8x32xf32> to vector<2x1x8x32xf32>
    %219 = vector.shape_cast %218 : vector<2x1x8x32xf32> to vector<2x8x32xf32>
    %220 = vector.extract_strided_slice %217 {offsets = [0, 1, 0, 0], sizes = [2, 1, 8, 32], strides = [1, 1, 1, 1]} : vector<2x4x8x32xf32> to vector<2x1x8x32xf32>
    %221 = vector.shape_cast %220 : vector<2x1x8x32xf32> to vector<2x8x32xf32>
    %222 = arith.addf %219, %221 : vector<2x8x32xf32>
    %223 = vector.extract_strided_slice %217 {offsets = [0, 2, 0, 0], sizes = [2, 1, 8, 32], strides = [1, 1, 1, 1]} : vector<2x4x8x32xf32> to vector<2x1x8x32xf32>
    %224 = vector.shape_cast %223 : vector<2x1x8x32xf32> to vector<2x8x32xf32>
    %225 = arith.addf %222, %224 : vector<2x8x32xf32>
    %226 = vector.extract_strided_slice %217 {offsets = [0, 3, 0, 0], sizes = [2, 1, 8, 32], strides = [1, 1, 1, 1]} : vector<2x4x8x32xf32> to vector<2x1x8x32xf32>
    %227 = vector.shape_cast %226 : vector<2x1x8x32xf32> to vector<2x8x32xf32>
    %228 = arith.addf %225, %227 : vector<2x8x32xf32>
    %229 = vector.shape_cast %194 : vector<1x32xf32> to vector<1x1x32xf32>
    %230 = vector.broadcast %229 : vector<1x1x32xf32> to vector<2x8x32xf32>
    %231 = arith.addf %228, %230 : vector<2x8x32xf32>
    %232 = arith.addf %163, %231 : vector<2x8x32xf32>
    %233 = vector.extract_strided_slice %165 {offsets = [12, 0, 0], sizes = [4, 32, 8], strides = [1, 1, 1]} : vector<24x32x8xf32> to vector<4x32x8xf32>
    %234 = vector.extract_strided_slice %167 {offsets = [12, 0, 0], sizes = [4, 1, 8], strides = [1, 1, 1]} : vector<24x1x8xf32> to vector<4x1x8xf32>
    %235 = vector.shape_cast %232 : vector<2x8x32xf32> to vector<2x1x8x32xf32>
    %236 = vector.shape_cast %235 : vector<2x1x8x32xf32> to vector<2x1x8x32xf32>
    %237 = vector.broadcast %236 : vector<2x1x8x32xf32> to vector<2x4x8x32xf32>
    %238 = vector.shape_cast %237 : vector<2x4x8x32xf32> to vector<8x8x32xf32>
    %239 = vector.shape_cast %233 : vector<4x32x8xf32> to vector<1x4x32x8xf32>
    %240 = vector.shape_cast %239 : vector<1x4x32x8xf32> to vector<1x4x32x8xf32>
    %241 = vector.broadcast %240 : vector<1x4x32x8xf32> to vector<2x4x32x8xf32>
    %242 = vector.shape_cast %241 : vector<2x4x32x8xf32> to vector<8x32x8xf32>
    "tpu.trace_start"() <{level = 10 : i32, message = "gsd,gde->gse"}> : () -> ()
    %cst_71 = arith.constant dense<0.000000e+00> : vector<8x8x8xf32>
    %243 = tpu.matmul %238, %242, %cst_71 {dimension_numbers = #tpu.dot_dimension_numbers<[2], [1], [1], [2], [0, 0, 0, 1, 1, 2], [0], [0]>} : vector<8x8x32xf32>, vector<8x32x8xf32>, vector<8x8x8xf32> -> vector<8x8x8xf32>
    "tpu.trace_stop"() : () -> ()
    %244 = vector.shape_cast %243 : vector<8x8x8xf32> to vector<2x4x8x8xf32>
    %245 = vector.shape_cast %234 : vector<4x1x8xf32> to vector<1x4x1x8xf32>
    %246 = vector.broadcast %245 : vector<1x4x1x8xf32> to vector<2x4x8x8xf32>
    %247 = arith.addf %244, %246 : vector<2x4x8x8xf32>
    %248 = vector.extract_strided_slice %165 {offsets = [16, 0, 0], sizes = [8, 32, 8], strides = [1, 1, 1]} : vector<24x32x8xf32> to vector<8x32x8xf32>
    %249 = vector.extract_strided_slice %167 {offsets = [16, 0, 0], sizes = [8, 1, 8], strides = [1, 1, 1]} : vector<24x1x8xf32> to vector<8x1x8xf32>
    %250 = vector.shape_cast %1 : vector<2x8x32xf32> to vector<2x1x8x32xf32>
    %251 = vector.shape_cast %250 : vector<2x1x8x32xf32> to vector<2x1x8x32xf32>
    %252 = vector.broadcast %251 : vector<2x1x8x32xf32> to vector<2x8x8x32xf32>
    %253 = vector.shape_cast %252 : vector<2x8x8x32xf32> to vector<16x8x32xf32>
    %254 = vector.shape_cast %248 : vector<8x32x8xf32> to vector<1x8x32x8xf32>
    %255 = vector.shape_cast %254 : vector<1x8x32x8xf32> to vector<1x8x32x8xf32>
    %256 = vector.broadcast %255 : vector<1x8x32x8xf32> to vector<2x8x32x8xf32>
    %257 = vector.shape_cast %256 : vector<2x8x32x8xf32> to vector<16x32x8xf32>
    "tpu.trace_start"() <{level = 10 : i32, message = "gsd,gde->gse"}> : () -> ()
    %cst_72 = arith.constant dense<0.000000e+00> : vector<16x8x8xf32>
    %258 = tpu.matmul %253, %257, %cst_72 {dimension_numbers = #tpu.dot_dimension_numbers<[2], [1], [1], [2], [0, 0, 0, 1, 1, 2], [0], [0]>} : vector<16x8x32xf32>, vector<16x32x8xf32>, vector<16x8x8xf32> -> vector<16x8x8xf32>
    "tpu.trace_stop"() : () -> ()
    %259 = vector.shape_cast %258 : vector<16x8x8xf32> to vector<2x8x8x8xf32>
    %260 = vector.shape_cast %249 : vector<8x1x8xf32> to vector<1x8x1x8xf32>
    %261 = vector.broadcast %260 : vector<1x8x1x8xf32> to vector<2x8x8x8xf32>
    %262 = arith.addf %259, %261 : vector<2x8x8x8xf32>
    %263 = vector.extract_strided_slice %262 {offsets = [0, 0, 0, 0], sizes = [2, 4, 8, 8], strides = [1, 1, 1, 1]} : vector<2x8x8x8xf32> to vector<2x4x8x8xf32>
    %264 = vector.extract_strided_slice %262 {offsets = [0, 4, 0, 0], sizes = [2, 4, 8, 8], strides = [1, 1, 1, 1]} : vector<2x8x8x8xf32> to vector<2x4x8x8xf32>
    %265 = vector.extract_strided_slice %169 {offsets = [4, 0, 0], sizes = [4, 8, 32], strides = [1, 1, 1]} : vector<8x8x32xf32> to vector<4x8x32xf32>
    %266 = vector.extract_strided_slice %173 {offsets = [1, 0, 0], sizes = [1, 1, 32], strides = [1, 1, 1]} : vector<4x1x64xf32> to vector<1x1x32xf32>
    %267 = vector.shape_cast %266 : vector<1x1x32xf32> to vector<1x32xf32>
    %268 = vector.shape_cast %247 : vector<2x4x8x8xf32> to vector<8x8x8xf32>
    %269 = vector.shape_cast %263 : vector<2x4x8x8xf32> to vector<8x8x8xf32>
    %270 = vector.shape_cast %264 : vector<2x4x8x8xf32> to vector<8x8x8xf32>
    "tpu.trace_start"() <{level = 10 : i32, message = "gqe,gke->gqk"}> : () -> ()
    %cst_73 = arith.constant dense<0.000000e+00> : vector<8x8x8xf32>
    %271 = tpu.matmul %268, %269, %cst_73 {dimension_numbers = #tpu.dot_dimension_numbers<[2], [2], [1], [1], [0, 0, 0, 1, 1, 1], [0], [0]>} : vector<8x8x8xf32>, vector<8x8x8xf32>, vector<8x8x8xf32> -> vector<8x8x8xf32>
    "tpu.trace_stop"() : () -> ()
    %272 = vector.broadcast %3 : vector<8x1x8xf32> to vector<8x8x8xf32>
    %273 = arith.addf %271, %272 : vector<8x8x8xf32>
    %cst_74 = arith.constant dense<0xFF800000> : vector<8x8xf32>
    %274 = vector.multi_reduction <maximumf>, %273, %cst_74 [2] : vector<8x8x8xf32> to vector<8x8xf32>
    %275 = vector.shape_cast %274 : vector<8x8xf32> to vector<8x8x1xf32>
    %276 = vector.broadcast %275 : vector<8x8x1xf32> to vector<8x8x8xf32>
    %277 = arith.subf %273, %276 : vector<8x8x8xf32>
    %278 = math.exp %277 : vector<8x8x8xf32>
    %cst_75 = arith.constant dense<0.000000e+00> : vector<8x8xf32>
    %279 = vector.multi_reduction <add>, %278, %cst_75 [2] : vector<8x8x8xf32> to vector<8x8xf32>
    %280 = vector.shape_cast %279 : vector<8x8xf32> to vector<8x8x1xf32>
    %281 = tpu.reciprocal %280 {approx = true} : vector<8x8x1xf32> -> vector<8x8x1xf32>
    %282 = vector.broadcast %281 : vector<8x8x1xf32> to vector<8x8x8xf32>
    %283 = arith.mulf %278, %282 : vector<8x8x8xf32>
    "tpu.trace_start"() <{level = 10 : i32, message = "gqk,gke->gqe"}> : () -> ()
    %cst_76 = arith.constant dense<0.000000e+00> : vector<8x8x8xf32>
    %284 = tpu.matmul %283, %270, %cst_76 {dimension_numbers = #tpu.dot_dimension_numbers<[2], [1], [1], [2], [0, 0, 0, 1, 1, 2], [0], [0]>} : vector<8x8x8xf32>, vector<8x8x8xf32>, vector<8x8x8xf32> -> vector<8x8x8xf32>
    "tpu.trace_stop"() : () -> ()
    %285 = vector.shape_cast %265 : vector<4x8x32xf32> to vector<1x4x8x32xf32>
    %286 = vector.shape_cast %285 : vector<1x4x8x32xf32> to vector<1x4x8x32xf32>
    %287 = vector.broadcast %286 : vector<1x4x8x32xf32> to vector<2x4x8x32xf32>
    %288 = vector.shape_cast %287 : vector<2x4x8x32xf32> to vector<8x8x32xf32>
    "tpu.trace_start"() <{level = 10 : i32, message = "gse,gef->gsf"}> : () -> ()
    %cst_77 = arith.constant dense<0.000000e+00> : vector<8x8x32xf32>
    %289 = tpu.matmul %284, %288, %cst_77 {dimension_numbers = #tpu.dot_dimension_numbers<[2], [1], [1], [2], [0, 0, 0, 1, 1, 2], [0], [0]>} : vector<8x8x8xf32>, vector<8x8x32xf32>, vector<8x8x32xf32> -> vector<8x8x32xf32>
    "tpu.trace_stop"() : () -> ()
    %290 = vector.shape_cast %289 : vector<8x8x32xf32> to vector<2x4x8x32xf32>
    %291 = vector.extract_strided_slice %290 {offsets = [0, 0, 0, 0], sizes = [2, 1, 8, 32], strides = [1, 1, 1, 1]} : vector<2x4x8x32xf32> to vector<2x1x8x32xf32>
    %292 = vector.shape_cast %291 : vector<2x1x8x32xf32> to vector<2x8x32xf32>
    %293 = vector.extract_strided_slice %290 {offsets = [0, 1, 0, 0], sizes = [2, 1, 8, 32], strides = [1, 1, 1, 1]} : vector<2x4x8x32xf32> to vector<2x1x8x32xf32>
    %294 = vector.shape_cast %293 : vector<2x1x8x32xf32> to vector<2x8x32xf32>
    %295 = arith.addf %292, %294 : vector<2x8x32xf32>
    %296 = vector.extract_strided_slice %290 {offsets = [0, 2, 0, 0], sizes = [2, 1, 8, 32], strides = [1, 1, 1, 1]} : vector<2x4x8x32xf32> to vector<2x1x8x32xf32>
    %297 = vector.shape_cast %296 : vector<2x1x8x32xf32> to vector<2x8x32xf32>
    %298 = arith.addf %295, %297 : vector<2x8x32xf32>
    %299 = vector.extract_strided_slice %290 {offsets = [0, 3, 0, 0], sizes = [2, 1, 8, 32], strides = [1, 1, 1, 1]} : vector<2x4x8x32xf32> to vector<2x1x8x32xf32>
    %300 = vector.shape_cast %299 : vector<2x1x8x32xf32> to vector<2x8x32xf32>
    %301 = arith.addf %298, %300 : vector<2x8x32xf32>
    %302 = vector.shape_cast %267 : vector<1x32xf32> to vector<1x1x32xf32>
    %303 = vector.broadcast %302 : vector<1x1x32xf32> to vector<2x8x32xf32>
    %304 = arith.addf %301, %303 : vector<2x8x32xf32>
    %305 = arith.addf %232, %304 : vector<2x8x32xf32>
    %306 = vector.extract_strided_slice %171 {offsets = [0, 0, 0], sizes = [1, 32, 64], strides = [1, 1, 1]} : vector<2x32x64xf32> to vector<1x32x64xf32>
    %307 = vector.shape_cast %306 : vector<1x32x64xf32> to vector<32x64xf32>
    "tpu.trace_start"() <{level = 10 : i32, message = "bsd,df->bsf"}> : () -> ()
    %cst_78 = arith.constant dense<0.000000e+00> : vector<2x8x64xf32>
    %308 = tpu.matmul %305, %307, %cst_78 {dimension_numbers = #tpu.dot_dimension_numbers<[2], [0], [0, 1], [1], [0, 0, 0, 1, 1, 1], [], []>} : vector<2x8x32xf32>, vector<32x64xf32>, vector<2x8x64xf32> -> vector<2x8x64xf32>
    "tpu.trace_stop"() : () -> ()
    %309 = vector.extract_strided_slice %173 {offsets = [3, 0, 0], sizes = [1, 1, 64], strides = [1, 1, 1]} : vector<4x1x64xf32> to vector<1x1x64xf32>
    %310 = vector.shape_cast %309 : vector<1x1x64xf32> to vector<1x64xf32>
    %311 = vector.shape_cast %310 : vector<1x64xf32> to vector<1x1x64xf32>
    %312 = vector.broadcast %311 : vector<1x1x64xf32> to vector<2x8x64xf32>
    %313 = arith.addf %308, %312 : vector<2x8x64xf32>
    %cst_79 = arith.constant 0.000000e+00 : f32
    %314 = vector.broadcast %cst_79 : f32 to vector<2x8x64xf32>
    %315 = arith.maximumf %313, %314 : vector<2x8x64xf32>
    %316 = vector.extract_strided_slice %171 {offsets = [1, 0, 0], sizes = [1, 32, 64], strides = [1, 1, 1]} : vector<2x32x64xf32> to vector<1x32x64xf32>
    %317 = vector.shape_cast %316 : vector<1x32x64xf32> to vector<32x64xf32>
    "tpu.trace_start"() <{level = 10 : i32, message = "bsf,df->bsd"}> : () -> ()
    %cst_80 = arith.constant dense<0.000000e+00> : vector<2x8x32xf32>
    %318 = tpu.matmul %315, %317, %cst_80 {dimension_numbers = #tpu.dot_dimension_numbers<[2], [1], [0, 1], [0], [0, 0, 0, 1, 1, 0], [], []>} : vector<2x8x64xf32>, vector<32x64xf32>, vector<2x8x32xf32> -> vector<2x8x32xf32>
    "tpu.trace_stop"() : () -> ()
    %319 = vector.extract_strided_slice %173 {offsets = [2, 0, 0], sizes = [1, 1, 32], strides = [1, 1, 1]} : vector<4x1x64xf32> to vector<1x1x32xf32>
    %320 = vector.shape_cast %319 : vector<1x1x32xf32> to vector<1x32xf32>
    %321 = vector.shape_cast %320 : vector<1x32xf32> to vector<1x1x32xf32>
    %322 = vector.broadcast %321 : vector<1x1x32xf32> to vector<2x8x32xf32>
    %323 = arith.addf %318, %322 : vector<2x8x32xf32>
    %c0_81 = arith.constant 0 : index
    %c0_82 = arith.constant 0 : index
    %c0_83 = arith.constant 0 : index
    %324 = vector.load %arg9[%c0_81, %c0_82, %c0_83] : memref<2x8x32xf32, #tpu.memory_space<vmem>>, vector<2x8x32xf32>
    tpu.vector_store %arg9[%c0_81, %c0_82, %c0_83], %323 {strides = array<i32>} : memref<2x8x32xf32, #tpu.memory_space<vmem>>, vector<2x8x32xf32>,
    return
  }
}

</mosaic_0001>

<bundles_post_ra>
// kernel: transformer_decoder.1
= control target key start
LH: loop header
LB: loop body
LE: loop exit
PB: predicated region body
PF: predicated region fallthrough
CT: control target
= control target key end

     0   :  { %v19006_v3 = vmov 0.0|0.0   ;;  %vm19007_vm0 = vmmov 0   ;;  %v19008_v11 = vmov 0.0   ;;  %vm193_vm1 = vcmask 261120   ;;  %s21557_s0 = inlined_call_operand.vmem [shape: f32[2,8,32], index: 0, kind: input, shape index: {}]   ;;  %s21558_s1 = inlined_call_operand.vmem [shape: f32[2,8,32], index: 1, kind: input, shape index: {}]   ;;  %s21559_s2 = inlined_call_operand.vmem [shape: f32[8,1,8], index: 2, kind: input, shape index: {}]   ;;  %s21560_s3 = inlined_call_operand.vmem [shape: f32[8,1,8], index: 3, kind: input, shape index: {}]   ;;  %s21561_s4 = inlined_call_operand.vmem [shape: f32[2,24,32,8], index: 4, kind: input, shape index: {}]   ;;  %s21562_s5 = inlined_call_operand.vmem [shape: f32[2,24,1,8], index: 5, kind: input, shape index: {}]   ;;  %s21563_s6 = inlined_call_operand.vmem [shape: f32[2,8,8,32], index: 6, kind: input, shape index: {}]   ;;  %s21564_s7 = inlined_call_operand.vmem [shape: f32[2,2,32,64], index: 7, kind: input, shape index: {}]   ;;  %s21565_s8 = inlined_call_operand.vmem [shape: f32[2,4,1,64], index: 8, kind: input, shape index: {}]   ;;  %s21566_s9 = inlined_call_operand.hbm [shape: f32[2,8,32], index: 9, kind: output, shape index: {}]  }
   0x1   :  { %v53_v0 = vld [vmem:[%s21561_s4] sm:$0xff]  ;;  %v54_v1 = vld [vmem:[%s21561_s4 + $0x8] sm:$0xff]  ;;  %18213 = vmatprep.subr.bf16.mxu0 %v19006_v3  ;;  %18219 = vmatprep.subr.bf16.mxu1 %v19006_v3  ;;  %v55_v6 = vld [vmem:[%s21561_s4 + $0x10] sm:$0xff] }
   0x2   :  { %v57_v2 = vld [vmem:[%s21561_s4 + $0x20] sm:$0xff]  ;;  %v19073_v4 = vpack.c.bf16 %v54_v1, %v53_v0  ;;  %v58_v5 = vld [vmem:[%s21561_s4 + $0x28] sm:$0xff]  ;;  %v56_v7 = vld [vmem:[%s21561_s4 + $0x18] sm:$0xff]  ;;  %16641 = vmatprep.mubr.msk.f32.mxu0 %vm19007_vm0, %v19008_v11  ;;  %16652 = vmatprep.mubr.msk.f32.mxu1 %vm19007_vm0, %v19008_v11 }
   0x3   :  { %v19084_v8 = vpack.c.bf16 %v58_v5, %v57_v2  ;;  %v59_v9 = vld [vmem:[%s21561_s4 + $0x30] sm:$0xff]  ;;  %v60_v10 = vld [vmem:[%s21561_s4 + $0x38] sm:$0xff]  ;;  %v19097_v12 = vpack.c.bf16 %v56_v7, %v55_v6  ;;  %v61_v14 = vld [vmem:[%s21561_s4 + $0x40] sm:$0xff] }
   0x4   :  { %18215 = vmatpush3.bf16.msra.mxu0 %v19073_v4  ;;  %v19101_v13 = vpack.c.bf16 %v60_v10, %v59_v9  ;;  %v62_v15 = vld [vmem:[%s21561_s4 + $0x48] sm:$0xff]  ;;  %v65_v16 = vld [vmem:[%s21561_s4 + $0x60] sm:$0xff]  ;;  %v63_v21 = vld [vmem:[%s21561_s4 + $0x50] sm:$0xff] }
   0x5   :  { %18221 = vmatpush3.bf16.msra.mxu1 %v19084_v8  ;;  %18216 = vmatprep.subr.bf16.mxu0 %v19006_v3  ;;  %v66_v17 = vld [vmem:[%s21561_s4 + $0x68] sm:$0xff]  ;;  %v19120_v18 = vld [vmem:[%s21557_s0] sm:$0xff]  ;;  %v19122_v19 = vpack.c.bf16 %v62_v15, %v61_v14  ;;  %v64_v22 = vld [vmem:[%s21561_s4 + $0x58] sm:$0xff] }
   0x6   :  { %18222 = vmatprep.subr.bf16.mxu1 %v19006_v3  ;;  %v19126_v20 = vpack.c.bf16 %v66_v17, %v65_v16  ;;  %v67_v23 = vld [vmem:[%s21561_s4 + $0x70] sm:$0xff]  ;;  %v68_v24 = vld [vmem:[%s21561_s4 + $0x78] sm:$0xff]  ;;  %v19146_v25 = vpack.c.bf16 %v64_v22, %v63_v21  ;;  %v69_v27 = vld [vmem:[%s21561_s4 + $0x80] sm:$0xff] }
   0x7   :  { %v19150_v26 = vpack.c.bf16 %v68_v24, %v67_v23  ;;  %v70_v28 = vld [vmem:[%s21561_s4 + $0x88] sm:$0xff]  ;;  %v73_v29 = vld [vmem:[%s21561_s4 + $0xa0] sm:$0xff]  ;;  %v71_v33 = vld [vmem:[%s21561_s4 + $0x90] sm:$0xff] }
   0x8   :  { %18218 = vmatpush3.bf16.msra.mxu0 %v19097_v12  ;;  %v74_v30 = vld [vmem:[%s21561_s4 + $0xa8] sm:$0xff]  ;;  %v19170_v31 = vpack.c.bf16 %v70_v28, %v69_v27  ;;  %v72_v34 = vld [vmem:[%s21561_s4 + $0x98] sm:$0xff]  ;;  %v75_v35 = vld [vmem:[%s21561_s4 + $0xb0] sm:$0xff] }
   0x9   :  { %18224 = vmatpush3.bf16.msra.mxu1 %v19101_v13  ;;  %18225 = vmatprep.subr.bf16.mxu0 %v19006_v3  ;;  %v19174_v32 = vpack.c.bf16 %v74_v30, %v73_v29  ;;  %v76_v36 = vld [vmem:[%s21561_s4 + $0xb8] sm:$0xff] }
   0xa   :  { %18231 = vmatprep.subr.bf16.mxu1 %v19006_v3 }
   0xb   :  { %16642 = vmatmul.mubr.msk.f32.vlgmr.msra.gmra.mrb[0].mxu0 %vm193_vm1, %v19120_v18 }
   0xc   :  { %16653 = vmatmul.mubr.msk.f32.vlgmr.msra.gmra.mrb[0].mxu1 %vm193_vm1, %v19120_v18  ;;  %18227 = vmatpush3.bf16.msra.mxu0 %v19122_v19 }
   0xd   :  { %18233 = vmatpush3.bf16.msra.mxu1 %v19126_v20  ;;  %18228 = vmatprep.subr.bf16.mxu0 %v19006_v3 }
   0xe   :  { %18234 = vmatprep.subr.bf16.mxu1 %v19006_v3  ;;  %16663 = vmatprep.mubr.msk.f32.mxu0 %vm19007_vm0, %v19008_v11 }
   0xf   :  { %16674 = vmatprep.mubr.msk.f32.mxu1 %vm19007_vm0, %v19008_v11 }
  0x10   :  { %18230 = vmatpush3.bf16.msra.mxu0 %v19146_v25 }
  0x11   :  { %18236 = vmatpush3.bf16.msra.mxu1 %v19150_v26  ;;  %18237 = vmatprep.subr.bf16.mxu0 %v19006_v3 }
  0x12   :  { %18243 = vmatprep.subr.bf16.mxu1 %v19006_v3 }
  0x13   :  { %14 = vsyncpa [#allocation3], 0  ;;  %16664 = vmatmul.mubr.msk.f32.vlgmr.msra.gmra.mrb[2].mxu0 %vm193_vm1, %v19120_v18  ;;  %v19194_v37 = vpack.c.bf16 %v72_v34, %v71_v33  ;;  %v19198_v38 = vpack.c.bf16 %v76_v36, %v75_v35  ;;  %v77_v39 = vld [vmem:[%s21561_s4 + $0xc0] sm:$0xff]  ;;  %v78_v40 = vld [vmem:[%s21561_s4 + $0xc8] sm:$0xff]  ;;  %vm2024_vm2 = vcmask 64512   ;;  %vm7716_vm3 = vcmask 523264  }
  0x14   :  { %16675 = vmatmul.mubr.msk.f32.vlgmr.msra.gmra.mrb[2].mxu1 %vm193_vm1, %v19120_v18  ;;  %18239 = vmatpush3.bf16.msra.mxu0 %v19170_v31  ;;  %v81_v41 = vld [vmem:[%s21561_s4 + $0xe0] sm:$0xff]  ;;  %v82_v42 = vld [vmem:[%s21561_s4 + $0xe8] sm:$0xff]  ;;  %v19218_v43 = vpack.c.bf16 %v78_v40, %v77_v39  ;;  %v79_v45 = vld [vmem:[%s21561_s4 + $0xd0] sm:$0xff]  ;;  %s19009_s19 = smov [#allocation2]  }
  0x15   :  { %18245 = vmatpush3.bf16.msra.mxu1 %v19174_v32  ;;  %18240 = vmatprep.subr.bf16.mxu0 %v19006_v3  ;;  %v19222_v44 = vpack.c.bf16 %v82_v42, %v81_v41  ;;  %v80_v46 = vld [vmem:[%s21561_s4 + $0xd8] sm:$0xff]  ;;  %v83_v47 = vld [vmem:[%s21561_s4 + $0xf0] sm:$0xff]  ;;  %v85_v51 = vld [vmem:[%s21561_s4 + $0x100] sm:$0xff]  ;;  %s15474_s20 = sshll.u32 %s19009_s19, 4  ;;  %s15475_s20 = int_to_ptr.vmem [resolvable:$true] %s15474_s20 }
  0x16   :  { %18246 = vmatprep.subr.bf16.mxu1 %v19006_v3  ;;  %16685 = vmatprep.mubr.msk.f32.mxu0 %vm19007_vm0, %v19008_v11  ;;  %v84_v48 = vld [vmem:[%s21561_s4 + $0xf8] sm:$0xff]  ;;  %v19242_v49 = vpack.c.bf16 %v80_v46, %v79_v45  ;;  %v86_v52 = vld [vmem:[%s21561_s4 + $0x108] sm:$0xff]  ;;  %v89_v53 = vld [vmem:[%s21561_s4 + $0x120] sm:$0xff]  ;;  %s18982_s21 = scalar_lea.vmem %s15475_s20, 256  ;;  %p18987_p1 = scmp.lt.s32.totalorder %s15475_s20, %s15475_s20 }
  0x17   :  { %16696 = vmatprep.mubr.msk.f32.mxu1 %vm19007_vm0, %v19008_v11  ;;  %v19246_v50 = vpack.c.bf16 %v84_v48, %v83_v47  ;;  %v90_v54 = vld [vmem:[%s21561_s4 + $0x128] sm:$0xff]  ;;  %v19266_v55 = vpack.c.bf16 %v86_v52, %v85_v51  ;;  %v87_v57 = vld [vmem:[%s21561_s4 + $0x110] sm:$0xff]  ;;  %v88_v58 = vld [vmem:[%s21561_s4 + $0x118] sm:$0xff]  ;;  %p18983_p0 = scmp.ne.s32.totalorder %s15475_s20, %s18982_s21  ;;  %p18988_p2 = scmp.lt.s32.totalorder %s18982_s21, %s18982_s21 }
  0x18   :  { %18242 = vmatpush3.bf16.msra.mxu0 %v19194_v37  ;;  %v19270_v56 = vpack.c.bf16 %v90_v54, %v89_v53  ;;  %v91_v59 = vld [vmem:[%s21561_s4 + $0x130] sm:$0xff]  ;;  %v92_v60 = vld [vmem:[%s21561_s4 + $0x138] sm:$0xff]  ;;  %v19290_v61 = vpack.c.bf16 %v88_v58, %v87_v57  ;;  %v93_v63 = vld [vmem:[%s21561_s4 + $0x140] sm:$0xff] }
  0x19   :  { %18248 = vmatpush3.bf16.msra.mxu1 %v19198_v38  ;;  %18249 = vmatprep.subr.bf16.mxu0 %v19006_v3  ;;  %v19294_v62 = vpack.c.bf16 %v92_v60, %v91_v59  ;;  %v94_v0 = vld [vmem:[%s21561_s4 + $0x148] sm:$0xff]  ;;  %v97_v1 = vld [vmem:[%s21561_s4 + $0x160] sm:$0xff]  ;;  %v95_v7 = vld [vmem:[%s21561_s4 + $0x150] sm:$0xff]  ;;  %p18989_p3 = por %p18988_p2, %p18987_p1 }
  0x1a   :  { %18255 = vmatprep.subr.bf16.mxu1 %v19006_v3  ;;  %v98_v2 = vld [vmem:[%s21561_s4 + $0x168] sm:$0xff]  ;;  %v19314_v5 = vpack.c.bf16 %v94_v0, %v93_v63  ;;  %v96_v9 = vld [vmem:[%s21561_s4 + $0x158] sm:$0xff]  ;;  %v99_v10 = vld [vmem:[%s21561_s4 + $0x170] sm:$0xff] }
  0x1b   :  { %16686 = vmatmul.mubr.msk.f32.vlgmr.msra.gmra.mrb[4].mxu0 %vm193_vm1, %v19120_v18  ;;  %v19318_v6 = vpack.c.bf16 %v98_v2, %v97_v1  ;;  %v100_v14 = vld [vmem:[%s21561_s4 + $0x178] sm:$0xff]  ;;  %v19338_v15 = vpack.c.bf16 %v96_v9, %v95_v7  ;;  %v19369_v17 = vld [vmem:[%s21557_s0 + $0x8] sm:$0xff]  ;;  %v15513_v22 = vld [vmem:[%s21562_s5 + $0x4] ss:$0 sm:$0xff]  ;;  %p18990_p4 = pnand %p18989_p3, %p18983_p0 }
  0x1c   :  { %16697 = vmatmul.mubr.msk.f32.vlgmr.msra.gmra.mrb[4].mxu1 %vm193_vm1, %v19120_v18  ;;  %18251 = vmatpush3.bf16.msra.mxu0 %v19218_v43  ;;  %v19342_v16 = vpack.c.bf16 %v100_v14, %v99_v10  ;;  %v15514_v24 = vld [vmem:[%s21562_s5 + $0x5] ss:$0 sm:$0xff]  ;;  %v15515_v33 = vld [vmem:[%s21562_s5 + $0x6] ss:$0 sm:$0xff]  ;;  %v15516_v34 = vld [vmem:[%s21562_s5 + $0x7] ss:$0 sm:$0xff] }
  0x1d   :  { %18257 = vmatpush3.bf16.msra.mxu1 %v19222_v44  ;;  %18252 = vmatprep.subr.bf16.mxu0 %v19006_v3  ;;  %v15512_v41 = vld [vmem:[%s21562_s5 + $0x3] ss:$0 sm:$0xff]  ;;  %vm20279_vm4 = vmpackc.low %vm7716_vm3, %vm7716_vm3 }
  0x1e   :  { %18258 = vmatprep.subr.bf16.mxu1 %v19006_v3  ;;  %16707 = vmatprep.mubr.msk.f32.mxu0 %vm19007_vm0, %v19008_v11 }
  0x1f   :  { %16718 = vmatprep.mubr.msk.f32.mxu1 %vm19007_vm0, %v19008_v11 }
  0x20   :  { %18254 = vmatpush3.bf16.msra.mxu0 %v19242_v49 }
  0x21   :  { %18260 = vmatpush3.bf16.msra.mxu1 %v19246_v50  ;;  %18261 = vmatprep.subr.bf16.mxu0 %v19006_v3 }
  0x22   :  { %18267 = vmatprep.subr.bf16.mxu1 %v19006_v3 }
  0x23   :  { %16708 = vmatmul.mubr.msk.f32.vlgmr.msra.gmra.mrb[6].mxu0 %vm193_vm1, %v19120_v18 }
  0x24   :  { %16719 = vmatmul.mubr.msk.f32.vlgmr.msra.gmra.mrb[6].mxu1 %vm193_vm1, %v19120_v18  ;;  %18263 = vmatpush3.bf16.msra.mxu0 %v19266_v55 }
  0x25   :  { %18269 = vmatpush3.bf16.msra.mxu1 %v19270_v56  ;;  %18264 = vmatprep.subr.bf16.mxu0 %v19006_v3 }
  0x26   :  { %18270 = vmatprep.subr.bf16.mxu1 %v19006_v3  ;;  %16729 = vmatprep.mubr.msk.f32.mxu0 %vm19007_vm0, %v19008_v11 }
  0x27   :  { %16740 = vmatprep.mubr.msk.f32.mxu1 %vm19007_vm0, %v19008_v11 }
  0x28   :  { %18266 = vmatpush3.bf16.msra.mxu0 %v19290_v61 }
  0x29   :  { %18272 = vmatpush3.bf16.msra.mxu1 %v19294_v62  ;;  %18273 = vmatprep.subr.bf16.mxu0 %v19006_v3 }
  0x2a   :  { %18279 = vmatprep.subr.bf16.mxu1 %v19006_v3 }
  0x2b   :  { %16730 = vmatmul.mubr.msk.f32.vlgmr.msra.gmra.mrb[8].mxu0 %vm193_vm1, %v19120_v18 }
  0x2c   :  { %16741 = vmatmul.mubr.msk.f32.vlgmr.msra.gmra.mrb[8].mxu1 %vm193_vm1, %v19120_v18  ;;  %18275 = vmatpush3.bf16.msra.mxu0 %v19314_v5 }
  0x2d   :  { %18281 = vmatpush3.bf16.msra.mxu1 %v19318_v6  ;;  %18276 = vmatprep.subr.bf16.mxu0 %v19006_v3 }
  0x2e   :  { %18282 = vmatprep.subr.bf16.mxu1 %v19006_v3  ;;  %16751 = vmatprep.mubr.msk.f32.mxu0 %vm19007_vm0, %v19008_v11 }
  0x2f   :  { %16762 = vmatprep.mubr.msk.f32.mxu1 %vm19007_vm0, %v19008_v11 }
  0x30   :  { %18278 = vmatpush3.bf16.msra.mxu0 %v19338_v15 }
  0x31   :  { %18284 = vmatpush3.bf16.msra.mxu1 %v19342_v16  ;;  %18285 = vmatprep.subr.bf16.mxu0 %v19006_v3 }
  0x32   :  { %18291 = vmatprep.subr.bf16.mxu1 %v19006_v3 }
  0x33   :  { %16752 = vmatmul.mubr.msk.f32.vlgmr.msra.gmra.mrb[10].mxu0 %vm193_vm1, %v19120_v18 }
  0x34   :  { %16763 = vmatmul.mubr.msk.f32.vlgmr.msra.gmra.mrb[10].mxu1 %vm193_vm1, %v19120_v18  ;;  %18287 = vmatpush3.bf16.msra.mxu0 %v19073_v4 }
  0x35   :  { %18293 = vmatpush3.bf16.msra.mxu1 %v19084_v8  ;;  %18288 = vmatprep.subr.bf16.mxu0 %v19006_v3 }
  0x36   :  { %18294 = vmatprep.subr.bf16.mxu1 %v19006_v3  ;;  %16773 = vmatprep.mubr.msk.f32.mxu0 %vm19007_vm0, %v19008_v11 }
  0x37   :  { %16784 = vmatprep.mubr.msk.f32.mxu1 %vm19007_vm0, %v19008_v11 }
  0x38   :  { %18290 = vmatpush3.bf16.msra.mxu0 %v19097_v12 }
  0x39   :  { %18296 = vmatpush3.bf16.msra.mxu1 %v19101_v13  ;;  %18297 = vmatprep.subr.bf16.mxu0 %v19006_v3 }
  0x3a   :  { %18303 = vmatprep.subr.bf16.mxu1 %v19006_v3 }
  0x3b   :  { %16774 = vmatmul.mubr.msk.f32.vlgmr.msra.gmra.mrb[12].mxu0 %vm193_vm1, %v19369_v17 }
  0x3c   :  { %16785 = vmatmul.mubr.msk.f32.vlgmr.msra.gmra.mrb[12].mxu1 %vm193_vm1, %v19369_v17  ;;  %18299 = vmatpush3.bf16.msra.mxu0 %v19122_v19 }
  0x3d   :  { %18305 = vmatpush3.bf16.msra.mxu1 %v19126_v20  ;;  %18300 = vmatprep.subr.bf16.mxu0 %v19006_v3 }
  0x3e   :  { %18306 = vmatprep.subr.bf16.mxu1 %v19006_v3  ;;  %16795 = vmatprep.mubr.msk.f32.mxu0 %vm19007_vm0, %v19008_v11 }
  0x3f   :  { %16806 = vmatprep.mubr.msk.f32.mxu1 %vm19007_vm0, %v19008_v11 }
  0x40   :  { %18302 = vmatpush3.bf16.msra.mxu0 %v19146_v25  ;;  %v15509_v25 = vld [vmem:[%s21562_s5] ss:$0 sm:$0xff] }
  0x41   :  { %18308 = vmatpush3.bf16.msra.mxu1 %v19150_v26  ;;  %18309 = vmatprep.subr.bf16.mxu0 %v19006_v3 }
  0x42   :  { %18315 = vmatprep.subr.bf16.mxu1 %v19006_v3 }
  0x43   :  { %16796 = vmatmul.mubr.msk.f32.vlgmr.msra.gmra.mrb[14].mxu0 %vm193_vm1, %v19369_v17 }
  0x44   :  { %16807 = vmatmul.mubr.msk.f32.vlgmr.msra.gmra.mrb[14].mxu1 %vm193_vm1, %v19369_v17  ;;  %18311 = vmatpush3.bf16.msra.mxu0 %v19170_v31 }
  0x45   :  { %18317 = vmatpush3.bf16.msra.mxu1 %v19174_v32  ;;  %18312 = vmatprep.subr.bf16.mxu0 %v19006_v3  ;;  %v15510_v32 = vld [vmem:[%s21562_s5 + $0x1] ss:$0 sm:$0xff] }
  0x46   :  { %18318 = vmatprep.subr.bf16.mxu1 %v19006_v3  ;;  %16817 = vmatprep.mubr.msk.f32.mxu0 %vm19007_vm0, %v19008_v11 }
  0x47   :  { %16828 = vmatprep.mubr.msk.f32.mxu1 %vm19007_vm0, %v19008_v11 }
  0x48   :  { %18314 = vmatpush3.bf16.msra.mxu0 %v19194_v37  ;;  %v15511_v37 = vld [vmem:[%s21562_s5 + $0x2] ss:$0 sm:$0xff] }
  0x49   :  { %18320 = vmatpush3.bf16.msra.mxu1 %v19198_v38  ;;  %18321 = vmatprep.subr.bf16.mxu0 %v19006_v3 }
  0x4a   :  { %18327 = vmatprep.subr.bf16.mxu1 %v19006_v3 }
  0x4b   :  { %16818 = vmatmul.mubr.msk.f32.vlgmr.msra.gmra.mrb[16].mxu0 %vm193_vm1, %v19369_v17 }
  0x4c   :  { %16829 = vmatmul.mubr.msk.f32.vlgmr.msra.gmra.mrb[16].mxu1 %vm193_vm1, %v19369_v17  ;;  %18323 = vmatpush3.bf16.msra.mxu0 %v19218_v43 }
  0x4d   :  { %18329 = vmatpush3.bf16.msra.mxu1 %v19222_v44  ;;  %18324 = vmatprep.subr.bf16.mxu0 %v19006_v3 }
  0x4e   :  { %18330 = vmatprep.subr.bf16.mxu1 %v19006_v3  ;;  %16839 = vmatprep.mubr.msk.f32.mxu0 %vm19007_vm0, %v19008_v11 }
  0x4f   :  { %16850 = vmatprep.mubr.msk.f32.mxu1 %vm19007_vm0, %v19008_v11 }
  0x50   :  { %18326 = vmatpush3.bf16.msra.mxu0 %v19242_v49 }
  0x51   :  { %18332 = vmatpush3.bf16.msra.mxu1 %v19246_v50  ;;  %18333 = vmatprep.subr.bf16.mxu0 %v19006_v3 }
  0x52   :  { %18339 = vmatprep.subr.bf16.mxu1 %v19006_v3 }
  0x53   :  { %16840 = vmatmul.mubr.msk.f32.vlgmr.msra.gmra.mrb[18].mxu0 %vm193_vm1, %v19369_v17 }
  0x54   :  { %16851 = vmatmul.mubr.msk.f32.vlgmr.msra.gmra.mrb[18].mxu1 %vm193_vm1, %v19369_v17  ;;  %18335 = vmatpush3.bf16.msra.mxu0 %v19266_v55 }
  0x55   :  { %18336 = vmatprep.subr.bf16.mxu0 %v19006_v3  ;;  %16861 = vmatprep.mubr.msk.f32.mxu0 %vm19007_vm0, %v19008_v11 }
  0x56   :  { %18341 = vmatpush3.bf16.msra.mxu1 %v19270_v56  ;;  %16872 = vmatprep.mubr.msk.f32.mxu1 %vm19007_vm0, %v19008_v11 }
  0x57   :  { %18342 = vmatprep.subr.bf16.mxu1 %v19006_v3 }
  0x58   :  { %18338 = vmatpush3.bf16.msra.mxu0 %v19290_v61 }
  0x59   :  { %18345 = vmatprep.subr.bf16.mxu0 %v19006_v3 }
  0x5a   :  { %18344 = vmatpush3.bf16.msra.mxu1 %v19294_v62 }
  0x5b   :  { %16862 = vmatmul.mubr.msk.f32.vlgmr.msra.gmra.mrb[20].mxu0 %vm193_vm1, %v19369_v17  ;;  %18351 = vmatprep.subr.bf16.mxu1 %v19006_v3 }
  0x5c   :  { %18347 = vmatpush3.bf16.msra.mxu0 %v19314_v5  ;;  %16883 = vmatprep.mubr.msk.f32.mxu0 %vm19007_vm0, %v19008_v11 }
  0x5d   :  { %18348 = vmatprep.subr.bf16.mxu0 %v19006_v3  ;;  %16873 = vmatmul.mubr.msk.f32.vlgmr.msra.gmra.mrb[20].mxu1 %vm193_vm1, %v19369_v17 }
  0x5e   :  { %18353 = vmatpush3.bf16.msra.mxu1 %v19318_v6  ;;  %16894 = vmatprep.mubr.msk.f32.mxu1 %vm19007_vm0, %v19008_v11 }
  0x5f   :  { %18354 = vmatprep.subr.bf16.mxu1 %v19006_v3 }
  0x60   :  { %18350 = vmatpush3.bf16.msra.mxu0 %v19338_v15 }
  0x61   :  { %16897 = vmatprep.subr.mxu0 %v19008_v11 }
  0x62   :  { %18356 = vmatpush3.bf16.msra.mxu1 %v19342_v16  ;;  %v15517_v16 = vld [vmem:[%s21562_s5 + $0x8] ss:$0 sm:$0xff] }
  0x63   :  { %16884 = vmatmul.mubr.msk.f32.vlgmr.msra.gmra.mrb[22].mxu0 %vm193_vm1, %v19369_v17  ;;  %16912 = vmatprep.subr.mxu1 %v19008_v11 }
  0x64   :  { %16899 = vmatprep.mubr.msk.f32.mxu0 %vm19007_vm0, %v19008_v11 }
  0x65   :  { %16895 = vmatmul.mubr.msk.f32.vlgmr.msra.gmra.mrb[22].mxu1 %vm193_vm1, %v19369_v17 }
  0x66   :  { %16914 = vmatprep.mubr.msk.f32.mxu1 %vm19007_vm0, %v19008_v11 }
  0xde   :  { %v263_v4 = vpop.f32.mrb[0].mxu0 }
  0xdf   :  { %v16643_v8 = vpop.f32.mrb[1].mxu0  ;;  %v333_v12 = vpop.f32.mrb[0].mxu1  ;;  %v1952_v31 = vadd.f32 %v15509_v25, %v263_v4 }
  0xe0   :  { %v16654_v13 = vpop.f32.mrb[1].mxu1  ;;  %v1953_v35 = vadd.f32 %v15510_v32, %v333_v12  ;;  %v19526_v12 = vld [vmem:[%s21562_s5 + $0x9] ss:$0 sm:$0xff] }
  0xe6   :  { %v403_v18 = vpop.f32.mrb[2].mxu0 }
  0xe7   :  { %v16665_v19 = vpop.f32.mrb[3].mxu0  ;;  %v473_v20 = vpop.f32.mrb[2].mxu1  ;;  %v1954_v44 = vadd.f32 %v15511_v37, %v403_v18 }
  0xe8   :  { %v16676_v21 = vpop.f32.mrb[3].mxu1  ;;  %v1955_v45 = vadd.f32 %v15512_v41, %v473_v20 }
  0xee   :  { %v543_v23 = vpop.f32.mrb[4].mxu0 }
  0xef   :  { %v1956_v26 = vadd.f32 %v15513_v22, %v543_v23  ;;  %v16687_v27 = vpop.f32.mrb[5].mxu0  ;;  %v613_v28 = vpop.f32.mrb[4].mxu1 }
  0xf0   :  { %v16698_v29 = vpop.f32.mrb[5].mxu1  ;;  %v1957_v30 = vadd.f32 %v15514_v24, %v613_v28 }
  0xf1   :  { %16898 = vmatpush3.xpose.msk.msra.mxu0 %vm2024_vm2, %v1956_v26 }
  0xf2   :  { %16902 = vmatprep.subr.mxu0 %v19008_v11 }
  0xf4   :  { %16900 = vmatmul.mubr.msk.f32.vlgmr.msra.gmra.mrb[24].mxu0 %vm2024_vm2, %v1952_v31 }
  0xf5   :  { %16903 = vmatpush3.xpose.msk.msra.mxu0 %vm2024_vm2, %v1957_v30  ;;  %16904 = vmatprep.mubr.msk.f32.mxu0 %vm19007_vm0, %v19008_v11  ;;  %v15521_v30 = vld [vmem:[%s21559_s2] ss:$0 sm:$0xff] }
  0xf6   :  { %v683_v36 = vpop.f32.mrb[6].mxu0  ;;  %16907 = vmatprep.subr.mxu0 %v19008_v11 }
  0xf7   :  { %v1958_v38 = vadd.f32 %v15515_v33, %v683_v36  ;;  %v753_v39 = vpop.f32.mrb[6].mxu1  ;;  %v16709_v40 = vpop.f32.mrb[7].mxu0 }
  0xf8   :  { %v1959_v42 = vadd.f32 %v15516_v34, %v753_v39  ;;  %16905 = vmatmul.mubr.msk.f32.vlgmr.msra.gmra.mrb[26].mxu0 %vm2024_vm2, %v1953_v35  ;;  %v16720_v43 = vpop.f32.mrb[7].mxu1  ;;  %v15523_v39 = vld [vmem:[%s21559_s2 + $0x2] ss:$0 sm:$0xff] }
  0xf9   :  { %16908 = vmatpush3.xpose.msk.msra.mxu0 %vm2024_vm2, %v1958_v38  ;;  %16909 = vmatprep.mubr.msk.f32.mxu0 %vm19007_vm0, %v19008_v11 }
  0xfa   :  { %16913 = vmatpush3.xpose.msk.msra.mxu1 %vm2024_vm2, %v1959_v42  ;;  %16917 = vmatprep.subr.mxu0 %v19008_v11 }
  0xfb   :  { %16922 = vmatprep.subr.mxu1 %v19008_v11 }
  0xfc   :  { %16910 = vmatmul.mubr.msk.f32.vlgmr.msra.gmra.mrb[28].mxu0 %vm2024_vm2, %v1954_v44 }
  0xfd   :  { %16915 = vmatmul.mubr.msk.f32.vlgmr.msra.gmra.mrb[24].mxu1 %vm2024_vm2, %v1955_v45  ;;  %16919 = vmatprep.mubr.msk.f32.mxu0 %vm19007_vm0, %v19008_v11 }
  0xfe   :  { %v823_v46 = vpop.f32.mrb[8].mxu0  ;;  %16924 = vmatprep.mubr.msk.f32.mxu1 %vm19007_vm0, %v19008_v11 }
  0xff   :  { %v16731_v47 = vpop.f32.mrb[9].mxu0  ;;  %v893_v48 = vpop.f32.mrb[8].mxu1  ;;  %v1960_v18 = vadd.f32 %v15517_v16, %v823_v46 }
 0x100   :  { %v16742_v49 = vpop.f32.mrb[9].mxu1  ;;  %v1961_v20 = vadd.f32 %v19526_v12, %v893_v48 }
 0x106   :  { %v19506_v50 = vpop.f32.mrb[10].mxu0 }
 0x107   :  { %v16753_v51 = vpop.f32.mrb[11].mxu0  ;;  %v19508_v52 = vpop.f32.mrb[10].mxu1 }
 0x108   :  { %v16764_v53 = vpop.f32.mrb[11].mxu1  ;;  %v15525_v51 = vld [vmem:[%s21559_s2 + $0x4] ss:$0 sm:$0xff] }
 0x109   :  { %v15526_v53 = vld [vmem:[%s21559_s2 + $0x5] ss:$0 sm:$0xff] }
 0x10e   :  { %v1106_v54 = vpop.f32.mrb[12].mxu0 }
 0x10f   :  { %v16775_v55 = vpop.f32.mrb[13].mxu0  ;;  %v1176_v56 = vpop.f32.mrb[12].mxu1  ;;  %v1964_v6 = vadd.f32 %v15509_v25, %v1106_v54 }
 0x110   :  { %v16786_v57 = vpop.f32.mrb[13].mxu1  ;;  %v1965_v7 = vadd.f32 %v15510_v32, %v1176_v56 }
 0x116   :  { %v1246_v58 = vpop.f32.mrb[14].mxu0 }
 0x117   :  { %v16797_v59 = vpop.f32.mrb[15].mxu0  ;;  %v1316_v60 = vpop.f32.mrb[14].mxu1  ;;  %v1966_v13 = vadd.f32 %v15511_v37, %v1246_v58 }
 0x118   :  { %v16808_v61 = vpop.f32.mrb[15].mxu1  ;;  %v1967_v19 = vadd.f32 %v15512_v41, %v1316_v60  ;;  %v15524_v41 = vld [vmem:[%s21559_s2 + $0x3] ss:$0 sm:$0xff] }
 0x11e   :  { %v1386_v62 = vpop.f32.mrb[16].mxu0 }
 0x11f   :  { %v1968_v63 = vadd.f32 %v15513_v22, %v1386_v62  ;;  %v1456_v0 = vpop.f32.mrb[16].mxu1  ;;  %v16819_v1 = vpop.f32.mrb[17].mxu0  ;;  %v15527_v62 = vld [vmem:[%s21559_s2 + $0x6] ss:$0 sm:$0xff] }
 0x120   :  { %v1969_v2 = vadd.f32 %v15514_v24, %v1456_v0  ;;  %v16830_v5 = vpop.f32.mrb[17].mxu1 }
 0x121   :  { %16918 = vmatpush3.xpose.msk.msra.mxu0 %vm2024_vm2, %v1968_v63  ;;  %v15528_v63 = vld [vmem:[%s21559_s2 + $0x7] ss:$0 sm:$0xff] }
 0x122   :  { %16923 = vmatpush3.xpose.msk.msra.mxu1 %vm2024_vm2, %v1969_v2  ;;  %16927 = vmatprep.subr.mxu0 %v19008_v11 }
 0x123   :  { %16932 = vmatprep.subr.mxu1 %v19008_v11 }
 0x124   :  { %16920 = vmatmul.mubr.msk.f32.vlgmr.msra.gmra.mrb[30].mxu0 %vm2024_vm2, %v1964_v6 }
 0x125   :  { %16925 = vmatmul.mubr.msk.f32.vlgmr.msra.gmra.mrb[26].mxu1 %vm2024_vm2, %v1965_v7  ;;  %16929 = vmatprep.mubr.msk.f32.mxu0 %vm19007_vm0, %v19008_v11 }
 0x126   :  { %v1526_v9 = vpop.f32.mrb[18].mxu0  ;;  %16934 = vmatprep.mubr.msk.f32.mxu1 %vm19007_vm0, %v19008_v11 }
 0x127   :  { %v1970_v10 = vadd.f32 %v15515_v33, %v1526_v9  ;;  %v1596_v14 = vpop.f32.mrb[18].mxu1  ;;  %v16841_v15 = vpop.f32.mrb[19].mxu0 }
 0x128   :  { %v1971_v4 = vadd.f32 %v15516_v34, %v1596_v14  ;;  %v16852_v8 = vpop.f32.mrb[19].mxu1  ;;  %v15522_v34 = vld [vmem:[%s21559_s2 + $0x1] ss:$0 sm:$0xff] }
 0x129   :  { %16928 = vmatpush3.xpose.msk.msra.mxu0 %vm2024_vm2, %v1970_v10 }
 0x12a   :  { %16933 = vmatpush3.xpose.msk.msra.mxu1 %vm2024_vm2, %v1971_v4  ;;  %16937 = vmatprep.subr.mxu0 %v19008_v11 }
 0x12b   :  { %16942 = vmatprep.subr.mxu1 %v19008_v11 }
 0x12c   :  { %16930 = vmatmul.mubr.msk.f32.vlgmr.msra.gmra.mrb[32].mxu0 %vm2024_vm2, %v1966_v13 }
 0x12d   :  { %16935 = vmatmul.mubr.msk.f32.vlgmr.msra.gmra.mrb[28].mxu1 %vm2024_vm2, %v1967_v19  ;;  %16938 = vmatpush3.msra.mxu0 %v1960_v18 }
 0x12e   :  { %16943 = vmatpush3.msra.mxu1 %v1961_v20  ;;  %v1666_v21 = vpop.f32.mrb[20].mxu0  ;;  %16939 = vmatprep.mubr.msk.f32.mxu0 %vm19007_vm0, %v19008_v11 }
 0x12f   :  { %v19537_v22 = vadd.f32 %v15517_v16, %v1666_v21  ;;  %v16863_v23 = vpop.f32.mrb[21].mxu0  ;;  %16947 = vmatprep.subr.mxu0 %v19008_v11  ;;  %16944 = vmatprep.mubr.msk.f32.mxu1 %vm19007_vm0, %v19008_v11 }
 0x130   :  { %16952 = vmatprep.subr.mxu1 %v19008_v11  ;;  %v19545_v26 = vpop.f32.mrb[20].mxu1 }
 0x131   :  { %v16874_v27 = vpop.f32.mrb[21].mxu1 }
 0x136   :  { %v19543_v24 = vpop.f32.mrb[22].mxu0 }
 0x137   :  { %v16885_v25 = vpop.f32.mrb[23].mxu0 }
 0x138   :  { %v19547_v28 = vpop.f32.mrb[22].mxu1 }
 0x139   :  { %v16896_v29 = vpop.f32.mrb[23].mxu1 }
 0x1c7   :  { %v2097_v31 = vpop.f32.mrb[24].mxu0 }
 0x1c8   :  { %v2098_v32 = vadd.f32 %v15521_v30, %v2097_v31  ;;  %v16901_v33 = vpop.f32.mrb[25].mxu0 }
 0x1ca   :  { %v2633_v35 = vsel %vm2024_vm2, %v2098_v32, -inf }
 0x1cb   :  { %2634 = vmax.xlane.f32.xlu0 %v2633_v35  ;;  %v2173_v36 = vpop.f32.mrb[26].mxu0 }
 0x1cc   :  { %v2174_v37 = vadd.f32 %v15522_v34, %v2173_v36  ;;  %v16906_v38 = vpop.f32.mrb[27].mxu0 }
 0x1ce   :  { %v2636_v40 = vsel %vm2024_vm2, %v2174_v37, -inf }
 0x1cf   :  { %2637 = vmax.xlane.f32.xlu0 %v2636_v40  ;;  %v2249_v42 = vpop.f32.mrb[28].mxu0 }
 0x1d0   :  { %v2325_v43 = vpop.f32.mrb[24].mxu1  ;;  %v2250_v44 = vadd.f32 %v15523_v39, %v2249_v42  ;;  %v16911_v45 = vpop.f32.mrb[29].mxu0 }
 0x1d1   :  { %v16916_v46 = vpop.f32.mrb[25].mxu1  ;;  %v2326_v47 = vadd.f32 %v15524_v41, %v2325_v43 }
 0x1d2   :  { %v2639_v48 = vsel %vm2024_vm2, %v2250_v44, -inf }
 0x1d3   :  { %2640 = vmax.xlane.f32.xlu1 %v2639_v48  ;;  %v2642_v49 = vsel %vm2024_vm2, %v2326_v47, -inf }
 0x1d7   :  { %2643 = vmax.xlane.f32.xlu1 %v2642_v49 }
 0x1f7   :  { %v2401_v54 = vpop.f32.mrb[30].mxu0 }
 0x1f8   :  { %v2402_v55 = vadd.f32 %v15525_v51, %v2401_v54  ;;  %v2477_v56 = vpop.f32.mrb[26].mxu1  ;;  %v16921_v57 = vpop.f32.mrb[31].mxu0 }
 0x1f9   :  { %v2478_v58 = vadd.f32 %v15526_v53, %v2477_v56  ;;  %v16926_v59 = vpop.f32.mrb[27].mxu1 }
 0x1fa   :  { %v2645_v60 = vsel %vm2024_vm2, %v2402_v55, -inf }
 0x1fb   :  { %v2648_v61 = vsel %vm2024_vm2, %v2478_v58, -inf  ;;  %2646 = vmax.xlane.f32.xlu0 %v2645_v60 }
 0x1fc   :  { %2649 = vmax.xlane.f32.xlu1 %v2648_v61  ;;  %v15519_v61 = vld [vmem:[%s21562_s5 + $0xa] ss:$0 sm:$0xff] }
 0x1ff   :  { %v2553_v0 = vpop.f32.mrb[32].mxu0 }
 0x200   :  { %v2554_v1 = vadd.f32 %v15527_v62, %v2553_v0  ;;  %v2629_v2 = vpop.f32.mrb[28].mxu1  ;;  %v16931_v5 = vpop.f32.mrb[33].mxu0 }
 0x201   :  { %v2630_v6 = vadd.f32 %v15528_v63, %v2629_v2  ;;  %v16936_v7 = vpop.f32.mrb[29].mxu1  ;;  %v15520_v2 = vld [vmem:[%s21562_s5 + $0xb] ss:$0 sm:$0xff] }
 0x202   :  { %v2651_v9 = vsel %vm2024_vm2, %v2554_v1, -inf  ;;  %v1963_v7 = vadd.f32 %v15520_v2, %v19508_v52  ;;  %v1973_v52 = vadd.f32 %v19526_v12, %v19545_v26  ;;  %v1974_v12 = vadd.f32 %v15519_v61, %v19543_v24 }
 0x203   :  { %v2654_v10 = vsel %vm2024_vm2, %v2630_v6, -inf  ;;  %2652 = vmax.xlane.f32.xlu0 %v2651_v9 }
 0x204   :  { %2655 = vmax.xlane.f32.xlu1 %v2654_v10 }
 0x258   :  { %v2635_v14 = vpop.xlane.xlu0 %2634 }
 0x259   :  { %v2657_v15 = vsub.f32 %v2098_v32, %v2635_v14 }
 0x25b   :  { %v2665_v16 = vmul.f32 1.442695, %v2657_v15 }
 0x25c   :  { %v2638_v4 = vpop.xlane.xlu0 %2637 }
 0x25d   :  { %18835 = vpow2.f32 %v2665_v16  ;;  %v2658_v8 = vsub.f32 %v2174_v37, %v2638_v4 }
 0x25f   :  { %v2667_v13 = vmul.f32 1.442695, %v2658_v8 }
 0x260   :  { %v2641_v18 = vpop.xlane.xlu1 %2640 }
 0x261   :  { %18837 = vpow2.f32 %v2667_v13  ;;  %v2659_v19 = vsub.f32 %v2250_v44, %v2641_v18 }
 0x263   :  { %v2669_v20 = vmul.f32 1.442695, %v2659_v19  ;;  %v1975_v19 = vadd.f32 %v15520_v2, %v19547_v28 }
 0x264   :  { %v2644_v21 = vpop.xlane.xlu1 %2643 }
 0x265   :  { %18839 = vpow2.f32 %v2669_v20  ;;  %v2660_v23 = vsub.f32 %v2326_v47, %v2644_v21 }
 0x267   :  { %v18836_v25 = vpop.eup %18835  ;;  %v2671_v27 = vmul.f32 1.442695, %v2660_v23  ;;  %v173_v23 = vld [vmem:[%s21563_s6] sm:$0xff] }
 0x268   :  { %v2681_v29 = vsel %vm2024_vm2, %v18836_v25, 0.0 }
 0x269   :  { %18841 = vpow2.f32 %v2671_v27  ;;  %2682 = vadd.xlane.f32.xlu0 %v2681_v29  ;;  %v175_v27 = vld [vmem:[%s21563_s6 + $0x10] sm:$0xff] }
 0x26b   :  { %v18838_v30 = vpop.eup %18837 }
 0x26c   :  { %v2684_v31 = vsel %vm2024_vm2, %v18838_v30, 0.0 }
 0x26d   :  { %2685 = vadd.xlane.f32.xlu1 %v2684_v31  ;;  %v176_v31 = vld [vmem:[%s21563_s6 + $0x18] sm:$0xff] }
 0x26f   :  { %v18840_v32 = vpop.eup %18839 }
 0x270   :  { %v2687_v33 = vsel %vm2024_vm2, %v18840_v32, 0.0 }
 0x271   :  { %2688 = vadd.xlane.f32.xlu0 %v2687_v33 }
 0x273   :  { %v18842_v34 = vpop.eup %18841 }
 0x274   :  { %v2690_v35 = vsel %vm2024_vm2, %v18842_v34, 0.0 }
 0x275   :  { %2691 = vadd.xlane.f32.xlu1 %v2690_v35 }
 0x288   :  { %v2647_v36 = vpop.xlane.xlu0 %2646 }
 0x289   :  { %v2650_v37 = vpop.xlane.xlu1 %2649  ;;  %v2661_v38 = vsub.f32 %v2402_v55, %v2647_v36 }
 0x28a   :  { %v2662_v39 = vsub.f32 %v2478_v58, %v2650_v37 }
 0x28b   :  { %v2673_v40 = vmul.f32 1.442695, %v2661_v38 }
 0x28c   :  { %v2675_v41 = vmul.f32 1.442695, %v2662_v39 }
 0x28d   :  { %18843 = vpow2.f32 %v2673_v40 }
 0x28e   :  { %18845 = vpow2.f32 %v2675_v41 }
 0x290   :  { %v2653_v42 = vpop.xlane.xlu0 %2652 }
 0x291   :  { %v2656_v43 = vpop.xlane.xlu1 %2655  ;;  %v2663_v44 = vsub.f32 %v2554_v1, %v2653_v42  ;;  %v1962_v1 = vadd.f32 %v15519_v61, %v19506_v50 }
 0x292   :  { %v2664_v45 = vsub.f32 %v2630_v6, %v2656_v43 }
 0x293   :  { %v2677_v46 = vmul.f32 1.442695, %v2663_v44 }
 0x294   :  { %v2679_v47 = vmul.f32 1.442695, %v2664_v45 }
 0x295   :  { %18847 = vpow2.f32 %v2677_v46  ;;  %v101_v46 = vld [vmem:[%s21561_s4 + $0x180] sm:$0xff] }
 0x296   :  { %18849 = vpow2.f32 %v2679_v47  ;;  %v102_v47 = vld [vmem:[%s21561_s4 + $0x188] sm:$0xff] }
 0x297   :  { %v18844_v48 = vpop.eup %18843 }
 0x298   :  { %v18846_v49 = vpop.eup %18845  ;;  %v2693_v51 = vsel %vm2024_vm2, %v18844_v48, 0.0 }
 0x299   :  { %v2696_v53 = vsel %vm2024_vm2, %v18846_v49, 0.0  ;;  %2694 = vadd.xlane.f32.xlu0 %v2693_v51  ;;  %v106_v51 = vld [vmem:[%s21561_s4 + $0x1a8] sm:$0xff] }
 0x29a   :  { %2697 = vadd.xlane.f32.xlu1 %v2696_v53 }
 0x29f   :  { %v19587_v54 = vpop.eup %18847 }
 0x2a0   :  { %v19589_v55 = vpop.eup %18849  ;;  %v2699_v56 = vsel %vm2024_vm2, %v19587_v54, 0.0 }
 0x2a1   :  { %v2702_v57 = vsel %vm2024_vm2, %v19589_v55, 0.0  ;;  %2700 = vadd.xlane.f32.xlu0 %v2699_v56  ;;  %v107_v56 = vld [vmem:[%s21561_s4 + $0x1b0] sm:$0xff] }
 0x2a2   :  { %2703 = vadd.xlane.f32.xlu1 %v2702_v57 }
 0x2f6   :  { %v2683_v58 = vpop.xlane.xlu0 %2682 }
 0x2f7   :  { %18851 = vrcp.f32 %v2683_v58  ;;  %v108_v58 = vld [vmem:[%s21561_s4 + $0x1b8] sm:$0xff] }
 0x2fa   :  { %v2686_v59 = vpop.xlane.xlu1 %2685 }
 0x2fb   :  { %18853 = vrcp.f32 %v2686_v59  ;;  %v18367_v59 = vpack.c.bf16 %v108_v58, %v107_v56  ;;  %v128_v58 = vld [vmem:[%s21561_s4 + $0x258] sm:$0xff] }
 0x2fe   :  { %v2689_v60 = vpop.xlane.xlu0 %2688 }
 0x2ff   :  { %18855 = vrcp.f32 %v2689_v60 }
 0x301   :  { %v18852_v62 = vpop.eup %18851 }
 0x302   :  { %v2713_v63 = vmul.f32 %v18852_v62, %v18836_v25  ;;  %v2692_v0 = vpop.xlane.xlu1 %2691  ;;  %v174_v25 = vld [vmem:[%s21563_s6 + $0x8] sm:$0xff] }
 0x303   :  { %18857 = vrcp.f32 %v2692_v0 }
 0x304   :  { %16940 = vmatmul.mubr.msk.f32.vlgmr.msra.gmra.mrb[34].mxu0 %vm2024_vm2, %v2713_v63 }
 0x305   :  { %v18854_v5 = vpop.eup %18853  ;;  %16948 = vmatpush3.msra.mxu0 %v1962_v1  ;;  %16949 = vmatprep.mubr.msk.f32.mxu0 %vm19007_vm0, %v19008_v11 }
 0x306   :  { %v2714_v6 = vmul.f32 %v18854_v5, %v18838_v30  ;;  %16957 = vmatprep.subr.mxu0 %v19008_v11 }
 0x308   :  { %16945 = vmatmul.mubr.msk.f32.vlgmr.msra.gmra.mrb[30].mxu1 %vm2024_vm2, %v2714_v6  ;;  %v15561_v6 = vld [vmem:[%s21565_s8] ss:$0 sm:$0xff] }
 0x309   :  { %v18856_v50 = vpop.eup %18855  ;;  %16953 = vmatpush3.msra.mxu1 %v1963_v7  ;;  %16954 = vmatprep.mubr.msk.f32.mxu1 %vm19007_vm0, %v19008_v11 }
 0x30a   :  { %v2715_v9 = vmul.f32 %v18856_v50, %v18840_v32  ;;  %16962 = vmatprep.subr.mxu1 %v19008_v11  ;;  %v109_v50 = vld [vmem:[%s21561_s4 + $0x1c0] sm:$0xff] }
 0x30c   :  { %16950 = vmatmul.mubr.msk.f32.vlgmr.msra.gmra.mrb[36].mxu0 %vm2024_vm2, %v2715_v9 }
 0x30d   :  { %v18858_v10 = vpop.eup %18857  ;;  %16958 = vmatpush3.msra.mxu0 %v19537_v22  ;;  %16959 = vmatprep.mubr.msk.f32.mxu0 %vm19007_vm0, %v19008_v11 }
 0x30e   :  { %v2716_v14 = vmul.f32 %v18858_v10, %v18842_v34  ;;  %16967 = vmatprep.subr.mxu0 %v19008_v11 }
 0x310   :  { %16955 = vmatmul.mubr.msk.f32.vlgmr.msra.gmra.mrb[32].mxu1 %vm2024_vm2, %v2716_v14  ;;  %v110_v14 = vld [vmem:[%s21561_s4 + $0x1c8] sm:$0xff] }
 0x311   :  { %16963 = vmatpush3.msra.mxu1 %v1973_v52  ;;  %16964 = vmatprep.mubr.msk.f32.mxu1 %vm19007_vm0, %v19008_v11  ;;  %v113_v52 = vld [vmem:[%s21561_s4 + $0x1e0] sm:$0xff] }
 0x312   :  { %16972 = vmatprep.subr.mxu1 %v19008_v11 }
 0x326   :  { %v2695_v15 = vpop.xlane.xlu0 %2694 }
 0x327   :  { %v2698_v16 = vpop.xlane.xlu1 %2697  ;;  %18859 = vrcp.f32 %v2695_v15  ;;  %v114_v15 = vld [vmem:[%s21561_s4 + $0x1e8] sm:$0xff] }
 0x328   :  { %18861 = vrcp.f32 %v2698_v16 }
 0x32e   :  { %v2701_v22 = vpop.xlane.xlu0 %2700 }
 0x32f   :  { %v2704_v4 = vpop.xlane.xlu1 %2703  ;;  %18863 = vrcp.f32 %v2701_v22  ;;  %v18370_v22 = vpack.c.bf16 %v110_v14, %v109_v50  ;;  %v136_v50 = vld [vmem:[%s21561_s4 + $0x298] sm:$0xff] }
 0x330   :  { %18865 = vrcp.f32 %v2704_v4  ;;  %v18376_v4 = vpack.c.bf16 %v114_v15, %v113_v52  ;;  %v141_v15 = vld [vmem:[%s21561_s4 + $0x2c0] sm:$0xff] }
 0x331   :  { %v18860_v8 = vpop.eup %18859 }
 0x332   :  { %v18862_v13 = vpop.eup %18861  ;;  %v2717_v18 = vmul.f32 %v18860_v8, %v18844_v48  ;;  %v105_v48 = vld [vmem:[%s21561_s4 + $0x1a0] sm:$0xff]  ;;  %v111_v8 = vld [vmem:[%s21561_s4 + $0x1d0] sm:$0xff] }
 0x333   :  { %v2718_v26 = vmul.f32 %v18862_v13, %v18846_v49  ;;  %v18358_v49 = vpack.c.bf16 %v102_v47, %v101_v46  ;;  %v18364_v53 = vpack.c.bf16 %v106_v51, %v105_v48  ;;  %v18963_v13 = vld [vmem:[%s21557_s0] sm:$0xff] }
 0x334   :  { %16960 = vmatmul.mubr.msk.f32.vlgmr.msra.gmra.mrb[38].mxu0 %vm2024_vm2, %v2717_v18  ;;  %v125_v48 = vld [vmem:[%s21561_s4 + $0x240] sm:$0xff] }
 0x335   :  { %16965 = vmatmul.mubr.msk.f32.vlgmr.msra.gmra.mrb[34].mxu1 %vm2024_vm2, %v2718_v26  ;;  %16968 = vmatpush3.msra.mxu0 %v1974_v12  ;;  %v112_v12 = vld [vmem:[%s21561_s4 + $0x1d8] sm:$0xff]  ;;  %v115_v26 = vld [vmem:[%s21561_s4 + $0x1f0] sm:$0xff]  ;;  %v129_v51 = vld [vmem:[%s21561_s4 + $0x260] sm:$0xff] }
 0x336   :  { %16973 = vmatpush3.msra.mxu1 %v1975_v19  ;;  %16969 = vmatprep.mubr.msk.f32.mxu0 %vm19007_vm0, %v19008_v11  ;;  %v116_v19 = vld [vmem:[%s21561_s4 + $0x1f8] sm:$0xff] }
 0x337   :  { %16974 = vmatprep.mubr.msk.f32.mxu1 %vm19007_vm0, %v19008_v11  ;;  %16977 = vmatprep.subr.mxu0 %v19008_v11 }
 0x338   :  { %16982 = vmatprep.subr.mxu1 %v19008_v11 }
 0x339   :  { %v18864_v24 = vpop.eup %18863 }
 0x33a   :  { %v18866_v20 = vpop.eup %18865  ;;  %v2719_v28 = vmul.f32 %v18864_v24, %v19587_v54  ;;  %v103_v54 = vld [vmem:[%s21561_s4 + $0x190] sm:$0xff]  ;;  %v18373_v24 = vpack.c.bf16 %v112_v12, %v111_v8 }
 0x33b   :  { %v2720_v21 = vmul.f32 %v18866_v20, %v19589_v55  ;;  %v104_v55 = vld [vmem:[%s21561_s4 + $0x198] sm:$0xff]  ;;  %v18379_v20 = vpack.c.bf16 %v116_v19, %v115_v26  ;;  %v143_v12 = vld [vmem:[%s21561_s4 + $0x2d0] sm:$0xff] }
 0x33c   :  { %16970 = vmatmul.mubr.msk.f32.vlgmr.msra.gmra.mrb[40].mxu0 %vm2024_vm2, %v2719_v28  ;;  %v18361_v57 = vpack.c.bf16 %v104_v55, %v103_v54  ;;  %v19844_v54 = vld [vmem:[%s21558_s1] sm:$0xff]  ;;  %v144_v26 = vld [vmem:[%s21561_s4 + $0x2d8] sm:$0xff]  ;;  %v147_v19 = vld [vmem:[%s21561_s4 + $0x2f0] sm:$0xff] }
 0x33d   :  { %16975 = vmatmul.mubr.msk.f32.vlgmr.msra.gmra.mrb[36].mxu1 %vm2024_vm2, %v2720_v21  ;;  %16979 = vmatprep.mubr.msk.f32.mxu0 %vm19007_vm0, %v19008_v11 }
 0x33e   :  { %16984 = vmatprep.mubr.msk.f32.mxu1 %vm19007_vm0, %v19008_v11  ;;  %16978 = vmatpush3.msra.mxu0 %v173_v23 }
 0x33f   :  { %16987 = vmatprep.subr.mxu0 %v19008_v11  ;;  %16983 = vmatpush3.msra.mxu1 %v174_v25 }
 0x340   :  { %16992 = vmatprep.subr.mxu1 %v19008_v11 }
 0x3d7   :  { %v2790_v29 = vpop.f32.mrb[34].mxu0 }
 0x3d8   :  { %v16941_v30 = vpop.f32.mrb[35].mxu0  ;;  %16980 = vmatmul.mubr.msk.f32.vlgmr.msra.gmra.mrb[42].mxu0 %vm2024_vm2, %v2790_v29 }
 0x3d9   :  { %16988 = vmatpush3.msra.mxu0 %v175_v27  ;;  %16989 = vmatprep.mubr.msk.f32.mxu0 %vm19007_vm0, %v19008_v11 }
 0x3da   :  { %16997 = vmatprep.subr.mxu0 %v19008_v11 }
 0x3db   :  { %v2863_v32 = vpop.f32.mrb[30].mxu1 }
 0x3dc   :  { %v16946_v33 = vpop.f32.mrb[31].mxu1  ;;  %16985 = vmatmul.mubr.msk.f32.vlgmr.msra.gmra.mrb[38].mxu1 %vm2024_vm2, %v2863_v32 }
 0x3dd   :  { %16993 = vmatpush3.msra.mxu1 %v176_v31  ;;  %16994 = vmatprep.mubr.msk.f32.mxu1 %vm19007_vm0, %v19008_v11 }
 0x3de   :  { %17002 = vmatprep.subr.mxu1 %v19008_v11 }
 0x3df   :  { %v2936_v34 = vpop.f32.mrb[36].mxu0 }
 0x3e0   :  { %v16951_v35 = vpop.f32.mrb[37].mxu0  ;;  %16990 = vmatmul.mubr.msk.f32.vlgmr.msra.gmra.mrb[44].mxu0 %vm2024_vm2, %v2936_v34 }
 0x3e1   :  { %16998 = vmatpush3.msra.mxu0 %v173_v23  ;;  %16999 = vmatprep.mubr.msk.f32.mxu0 %vm19007_vm0, %v19008_v11 }
 0x3e2   :  { %17007 = vmatprep.subr.mxu0 %v19008_v11 }
 0x3e3   :  { %v3009_v36 = vpop.f32.mrb[32].mxu1 }
 0x3e4   :  { %v16956_v37 = vpop.f32.mrb[33].mxu1  ;;  %16995 = vmatmul.mubr.msk.f32.vlgmr.msra.gmra.mrb[40].mxu1 %vm2024_vm2, %v3009_v36 }
 0x3e5   :  { %17003 = vmatpush3.msra.mxu1 %v174_v25  ;;  %17004 = vmatprep.mubr.msk.f32.mxu1 %vm19007_vm0, %v19008_v11  ;;  %v117_v37 = vld [vmem:[%s21561_s4 + $0x200] sm:$0xff] }
 0x3e6   :  { %17012 = vmatprep.subr.mxu1 %v19008_v11 }
 0x407   :  { %v3082_v38 = vpop.f32.mrb[38].mxu0 }
 0x408   :  { %v3155_v39 = vpop.f32.mrb[34].mxu1  ;;  %v16961_v40 = vpop.f32.mrb[39].mxu0  ;;  %17000 = vmatmul.mubr.msk.f32.vlgmr.msra.gmra.mrb[46].mxu0 %vm2024_vm2, %v3082_v38  ;;  %v121_v38 = vld [vmem:[%s21561_s4 + $0x220] sm:$0xff] }
 0x409   :  { %v16966_v41 = vpop.f32.mrb[35].mxu1  ;;  %17005 = vmatmul.mubr.msk.f32.vlgmr.msra.gmra.mrb[42].mxu1 %vm2024_vm2, %v3155_v39  ;;  %17008 = vmatpush3.msra.mxu0 %v175_v27  ;;  %v122_v39 = vld [vmem:[%s21561_s4 + $0x228] sm:$0xff] }
 0x40a   :  { %17009 = vmatprep.mubr.msk.f32.mxu0 %vm19007_vm0, %v19008_v11  ;;  %17013 = vmatpush3.msra.mxu1 %v176_v31  ;;  %v19795_v41 = vpack.c.bf16 %v122_v39, %v121_v38 }
 0x40b   :  { %17014 = vmatprep.mubr.msk.f32.mxu1 %vm19007_vm0, %v19008_v11  ;;  %18357 = vmatprep.subr.bf16.mxu0 %v19006_v3 }
 0x40c   :  { %18363 = vmatprep.subr.bf16.mxu1 %v19006_v3 }
 0x40f   :  { %v3228_v42 = vpop.f32.mrb[40].mxu0 }
 0x410   :  { %v3301_v43 = vpop.f32.mrb[36].mxu1  ;;  %v16971_v44 = vpop.f32.mrb[41].mxu0  ;;  %17010 = vmatmul.mubr.msk.f32.vlgmr.msra.gmra.mrb[48].mxu0 %vm2024_vm2, %v3228_v42  ;;  %v119_v42 = vld [vmem:[%s21561_s4 + $0x210] sm:$0xff] }
 0x411   :  { %v16976_v45 = vpop.f32.mrb[37].mxu1  ;;  %17015 = vmatmul.mubr.msk.f32.vlgmr.msra.gmra.mrb[44].mxu1 %vm2024_vm2, %v3301_v43  ;;  %17025 = vmatprep.mubr.msk.f32.mxu0 %vm19007_vm0, %v19008_v11  ;;  %v120_v43 = vld [vmem:[%s21561_s4 + $0x218] sm:$0xff]  ;;  %v123_v44 = vld [vmem:[%s21561_s4 + $0x230] sm:$0xff] }
 0x412   :  { %17036 = vmatprep.mubr.msk.f32.mxu1 %vm19007_vm0, %v19008_v11  ;;  %18359 = vmatpush3.bf16.msra.mxu0 %v18358_v49  ;;  %v124_v45 = vld [vmem:[%s21561_s4 + $0x238] sm:$0xff]  ;;  %v19817_v46 = vpack.c.bf16 %v120_v43, %v119_v42  ;;  %v15590_v42 = vld [vmem:[%s21562_s5 + $0x10] ss:$0 sm:$0xff]  ;;  %v15591_v43 = vld [vmem:[%s21562_s5 + $0x11] ss:$0 sm:$0xff] }
 0x413   :  { %18365 = vmatpush3.bf16.msra.mxu1 %v18364_v53  ;;  %18360 = vmatprep.subr.bf16.mxu0 %v19006_v3  ;;  %v19819_v47 = vpack.c.bf16 %v124_v45, %v123_v44 }
 0x414   :  { %18366 = vmatprep.subr.bf16.mxu1 %v19006_v3 }
 0x416   :  { %18362 = vmatpush3.bf16.msra.mxu0 %v18361_v57 }
 0x417   :  { %18368 = vmatpush3.bf16.msra.mxu1 %v18367_v59  ;;  %18369 = vmatprep.subr.bf16.mxu0 %v19006_v3 }
 0x418   :  { %18375 = vmatprep.subr.bf16.mxu1 %v19006_v3 }
 0x4ab   :  { %v3374_v60 = vpop.f32.mrb[42].mxu0 }
 0x4ac   :  { %v16981_v61 = vpop.f32.mrb[43].mxu0 }
 0x4af   :  { %v3447_v62 = vpop.f32.mrb[38].mxu1 }
 0x4b0   :  { %v3889_v63 = vadd.f32 %v3447_v62, %v3374_v60  ;;  %v16986_v0 = vpop.f32.mrb[39].mxu1  ;;  %v132_v60 = vld [vmem:[%s21561_s4 + $0x278] sm:$0xff] }
 0x4b1   :  { %v134_v0 = vld [vmem:[%s21561_s4 + $0x288] sm:$0xff] }
 0x4b3   :  { %v3520_v1 = vpop.f32.mrb[44].mxu0 }
 0x4b4   :  { %v3891_v2 = vadd.f32 %v3889_v63, %v3520_v1  ;;  %v16991_v5 = vpop.f32.mrb[45].mxu0  ;;  %v133_v63 = vld [vmem:[%s21561_s4 + $0x280] sm:$0xff] }
 0x4b5   :  { %v137_v1 = vld [vmem:[%s21561_s4 + $0x2a0] sm:$0xff]  ;;  %v19894_v5 = vpack.c.bf16 %v134_v0, %v133_v63 }
 0x4b7   :  { %v3593_v7 = vpop.f32.mrb[40].mxu1 }
 0x4b8   :  { %v3893_v9 = vadd.f32 %v3891_v2, %v3593_v7  ;;  %v16996_v10 = vpop.f32.mrb[41].mxu1  ;;  %v138_v2 = vld [vmem:[%s21561_s4 + $0x2a8] sm:$0xff]  ;;  %v135_v7 = vld [vmem:[%s21561_s4 + $0x290] sm:$0xff] }
 0x4b9   :  { %v140_v10 = vld [vmem:[%s21561_s4 + $0x2b8] sm:$0xff]  ;;  %v19918_v14 = vpack.c.bf16 %v136_v50, %v135_v7 }
 0x4ba   :  { %v3901_v16 = vadd.f32 %v15561_v6, %v3893_v9  ;;  %v139_v9 = vld [vmem:[%s21561_s4 + $0x2b0] sm:$0xff] }
 0x4bb   :  { %v19920_v52 = vpack.c.bf16 %v140_v10, %v139_v9 }
 0x4bc   :  { %v19733_v18 = vadd.f32 %v18963_v13, %v3901_v16  ;;  %v142_v16 = vld [vmem:[%s21561_s4 + $0x2c8] sm:$0xff] }
 0x4bd   :  { %v18442_v8 = vpack.c.bf16 %v142_v16, %v141_v15 }
 0x4be   :  { %17026 = vmatmul.mubr.msk.f32.vlgmr.msra.gmra.mrb[50].mxu0 %vm193_vm1, %v19733_v18  ;;  %17037 = vmatmul.mubr.msk.f32.vlgmr.msra.gmra.mrb[46].mxu1 %vm193_vm1, %v19733_v18 }
 0x4bf   :  { %18371 = vmatpush3.bf16.msra.mxu0 %v18370_v22  ;;  %18377 = vmatpush3.bf16.msra.mxu1 %v18376_v4 }
 0x4c0   :  { %18372 = vmatprep.subr.bf16.mxu0 %v19006_v3  ;;  %18378 = vmatprep.subr.bf16.mxu1 %v19006_v3 }
 0x4c1   :  { %17047 = vmatprep.mubr.msk.f32.mxu0 %vm19007_vm0, %v19008_v11  ;;  %17058 = vmatprep.mubr.msk.f32.mxu1 %vm19007_vm0, %v19008_v11 }
 0x4c3   :  { %18374 = vmatpush3.bf16.msra.mxu0 %v18373_v24  ;;  %18380 = vmatpush3.bf16.msra.mxu1 %v18379_v20 }
 0x4c4   :  { %18381 = vmatprep.subr.bf16.mxu0 %v19006_v3  ;;  %18387 = vmatprep.subr.bf16.mxu1 %v19006_v3 }
 0x4c6   :  { %17048 = vmatmul.mubr.msk.f32.vlgmr.msra.gmra.mrb[52].mxu0 %vm193_vm1, %v19733_v18  ;;  %17059 = vmatmul.mubr.msk.f32.vlgmr.msra.gmra.mrb[48].mxu1 %vm193_vm1, %v19733_v18 }
 0x4c7   :  { %18383 = vmatpush3.bf16.msra.mxu0 %v18358_v49  ;;  %18389 = vmatpush3.bf16.msra.mxu1 %v18364_v53  ;;  %v126_v49 = vld [vmem:[%s21561_s4 + $0x248] sm:$0xff] }
 0x4c8   :  { %18384 = vmatprep.subr.bf16.mxu0 %v19006_v3  ;;  %18390 = vmatprep.subr.bf16.mxu1 %v19006_v3  ;;  %v130_v53 = vld [vmem:[%s21561_s4 + $0x268] sm:$0xff]  ;;  %v19846_v55 = vpack.c.bf16 %v126_v49, %v125_v48 }
 0x4c9   :  { %17069 = vmatprep.mubr.msk.f32.mxu0 %vm19007_vm0, %v19008_v11  ;;  %17080 = vmatprep.mubr.msk.f32.mxu1 %vm19007_vm0, %v19008_v11  ;;  %v19848_v56 = vpack.c.bf16 %v130_v53, %v129_v51 }
 0x4cb   :  { %18386 = vmatpush3.bf16.msra.mxu0 %v18361_v57  ;;  %18392 = vmatpush3.bf16.msra.mxu1 %v18367_v59  ;;  %v127_v57 = vld [vmem:[%s21561_s4 + $0x250] sm:$0xff] }
 0x4cc   :  { %18393 = vmatprep.subr.bf16.mxu0 %v19006_v3  ;;  %18399 = vmatprep.subr.bf16.mxu1 %v19006_v3  ;;  %v131_v59 = vld [vmem:[%s21561_s4 + $0x270] sm:$0xff]  ;;  %v19870_v61 = vpack.c.bf16 %v128_v58, %v127_v57 }
 0x4cd   :  { %v19872_v62 = vpack.c.bf16 %v132_v60, %v131_v59  ;;  %v15593_v57 = vld [vmem:[%s21562_s5 + $0x13] ss:$0 sm:$0xff]  ;;  %v15572_v60 = vld [vmem:[%s21562_s5 + $0xe] ss:$0 sm:$0xff] }
 0x4db   :  { %v3666_v28 = vpop.f32.mrb[46].mxu0 }
 0x4dc   :  { %v3739_v21 = vpop.f32.mrb[42].mxu1  ;;  %v17001_v23 = vpop.f32.mrb[47].mxu0 }
 0x4dd   :  { %v3890_v25 = vadd.f32 %v3739_v21, %v3666_v28  ;;  %v17006_v27 = vpop.f32.mrb[43].mxu1  ;;  %v36_v21 = vld [vmem:[%s21558_s1 + $0x8] sm:$0xff] }
 0x4e3   :  { %v3812_v29 = vpop.f32.mrb[48].mxu0 }
 0x4e4   :  { %v3892_v30 = vadd.f32 %v3890_v25, %v3812_v29  ;;  %v3885_v31 = vpop.f32.mrb[44].mxu1  ;;  %v17011_v32 = vpop.f32.mrb[49].mxu0 }
 0x4e5   :  { %v17016_v33 = vpop.f32.mrb[45].mxu1 }
 0x4e6   :  { %v3894_v34 = vadd.f32 %v3892_v30, %v3885_v31 }
 0x4e8   :  { %v3902_v35 = vadd.f32 %v15561_v6, %v3894_v34  ;;  %v19896_v6 = vpack.c.bf16 %v138_v2, %v137_v1 }
 0x4ea   :  { %v19769_v36 = vadd.f32 %v3902_v35, %v19369_v17  ;;  %v118_v17 = vld [vmem:[%s21561_s4 + $0x208] sm:$0xff] }
 0x4eb   :  { %v19793_v40 = vpack.c.bf16 %v118_v17, %v117_v37 }
 0x4ec   :  { %17070 = vmatmul.mubr.msk.f32.vlgmr.msra.gmra.mrb[54].mxu0 %vm193_vm1, %v19769_v36  ;;  %17081 = vmatmul.mubr.msk.f32.vlgmr.msra.gmra.mrb[50].mxu1 %vm193_vm1, %v19769_v36 }
 0x4ed   :  { %18395 = vmatpush3.bf16.msra.mxu0 %v18370_v22  ;;  %18401 = vmatpush3.bf16.msra.mxu1 %v18376_v4  ;;  %v145_v22 = vld [vmem:[%s21561_s4 + $0x2e0] sm:$0xff]  ;;  %v146_v4 = vld [vmem:[%s21561_s4 + $0x2e8] sm:$0xff] }
 0x4ee   :  { %18396 = vmatprep.subr.bf16.mxu0 %v19006_v3  ;;  %18402 = vmatprep.subr.bf16.mxu1 %v19006_v3  ;;  %v18448_v13 = vpack.c.bf16 %v146_v4, %v145_v22 }
 0x4ef   :  { %17091 = vmatprep.mubr.msk.f32.mxu0 %vm19007_vm0, %v19008_v11  ;;  %17102 = vmatprep.mubr.msk.f32.mxu1 %vm19007_vm0, %v19008_v11 }
 0x4f1   :  { %18398 = vmatpush3.bf16.msra.mxu0 %v18373_v24  ;;  %18404 = vmatpush3.bf16.msra.mxu1 %v18379_v20  ;;  %v148_v24 = vld [vmem:[%s21561_s4 + $0x2f8] sm:$0xff]  ;;  %v18445_v20 = vpack.c.bf16 %v144_v26, %v143_v12 }
 0x4f2   :  { %18405 = vmatprep.subr.bf16.mxu0 %v19006_v3  ;;  %18411 = vmatprep.subr.bf16.mxu1 %v19006_v3  ;;  %v18451_v28 = vpack.c.bf16 %v148_v24, %v147_v19 }
 0x4f4   :  { %17092 = vmatmul.mubr.msk.f32.vlgmr.msra.gmra.mrb[56].mxu0 %vm193_vm1, %v19769_v36  ;;  %17103 = vmatmul.mubr.msk.f32.vlgmr.msra.gmra.mrb[52].mxu1 %vm193_vm1, %v19769_v36 }
 0x4f5   :  { %18407 = vmatpush3.bf16.msra.mxu0 %v19793_v40  ;;  %18413 = vmatpush3.bf16.msra.mxu1 %v19795_v41 }
 0x4f6   :  { %18408 = vmatprep.subr.bf16.mxu0 %v19006_v3  ;;  %18414 = vmatprep.subr.bf16.mxu1 %v19006_v3 }
 0x4f7   :  { %17113 = vmatprep.mubr.msk.f32.mxu0 %vm19007_vm0, %v19008_v11  ;;  %17124 = vmatprep.mubr.msk.f32.mxu1 %vm19007_vm0, %v19008_v11 }
 0x4f9   :  { %18410 = vmatpush3.bf16.msra.mxu0 %v19817_v46  ;;  %18416 = vmatpush3.bf16.msra.mxu1 %v19819_v47 }
 0x4fa   :  { %18417 = vmatprep.subr.bf16.mxu0 %v19006_v3  ;;  %18423 = vmatprep.subr.bf16.mxu1 %v19006_v3 }
 0x4fc   :  { %17114 = vmatmul.mubr.msk.f32.vlgmr.msra.gmra.mrb[58].mxu0 %vm193_vm1, %v19844_v54  ;;  %17125 = vmatmul.mubr.msk.f32.vlgmr.msra.gmra.mrb[54].mxu1 %vm193_vm1, %v19844_v54 }
 0x4fd   :  { %18419 = vmatpush3.bf16.msra.mxu0 %v19846_v55  ;;  %18425 = vmatpush3.bf16.msra.mxu1 %v19848_v56 }
 0x4fe   :  { %18420 = vmatprep.subr.bf16.mxu0 %v19006_v3  ;;  %18426 = vmatprep.subr.bf16.mxu1 %v19006_v3 }
 0x4ff   :  { %17135 = vmatprep.mubr.msk.f32.mxu0 %vm19007_vm0, %v19008_v11  ;;  %17146 = vmatprep.mubr.msk.f32.mxu1 %vm19007_vm0, %v19008_v11 }
 0x501   :  { %18422 = vmatpush3.bf16.msra.mxu0 %v19870_v61  ;;  %18428 = vmatpush3.bf16.msra.mxu1 %v19872_v62 }
 0x502   :  { %18429 = vmatprep.subr.bf16.mxu0 %v19006_v3  ;;  %18435 = vmatprep.subr.bf16.mxu1 %v19006_v3 }
 0x504   :  { %17136 = vmatmul.mubr.msk.f32.vlgmr.msra.gmra.mrb[60].mxu0 %vm193_vm1, %v19844_v54  ;;  %17147 = vmatmul.mubr.msk.f32.vlgmr.msra.gmra.mrb[56].mxu1 %vm193_vm1, %v19844_v54 }
 0x505   :  { %18431 = vmatpush3.bf16.msra.mxu0 %v19894_v5  ;;  %18437 = vmatpush3.bf16.msra.mxu1 %v19896_v6 }
 0x506   :  { %18432 = vmatprep.subr.bf16.mxu0 %v19006_v3  ;;  %18438 = vmatprep.subr.bf16.mxu1 %v19006_v3 }
 0x507   :  { %17157 = vmatprep.mubr.msk.f32.mxu0 %vm19007_vm0, %v19008_v11  ;;  %17168 = vmatprep.mubr.msk.f32.mxu1 %vm19007_vm0, %v19008_v11 }
 0x509   :  { %18434 = vmatpush3.bf16.msra.mxu0 %v19918_v14  ;;  %18440 = vmatpush3.bf16.msra.mxu1 %v19920_v52 }
 0x50a   :  { %18441 = vmatprep.subr.bf16.mxu0 %v19006_v3  ;;  %18447 = vmatprep.subr.bf16.mxu1 %v19006_v3 }
 0x50c   :  { %17158 = vmatmul.mubr.msk.f32.vlgmr.msra.gmra.mrb[62].mxu0 %vm193_vm1, %v19844_v54  ;;  %17169 = vmatmul.mubr.msk.f32.vlgmr.msra.gmra.mrb[58].mxu1 %vm193_vm1, %v19844_v54 }
 0x50d   :  { %18443 = vmatpush3.bf16.msra.mxu0 %v18442_v8  ;;  %18449 = vmatpush3.bf16.msra.mxu1 %v18448_v13 }
 0x50e   :  { %18444 = vmatprep.subr.bf16.mxu0 %v19006_v3  ;;  %18450 = vmatprep.subr.bf16.mxu1 %v19006_v3 }
 0x50f   :  { %17179 = vmatprep.mubr.msk.f32.mxu0 %vm19007_vm0, %v19008_v11  ;;  %17190 = vmatprep.mubr.msk.f32.mxu1 %vm19007_vm0, %v19008_v11 }
 0x511   :  { %18446 = vmatpush3.bf16.msra.mxu0 %v18445_v20  ;;  %18452 = vmatpush3.bf16.msra.mxu1 %v18451_v28 }
 0x512   :  { %18453 = vmatprep.subr.bf16.mxu0 %v19006_v3  ;;  %18459 = vmatprep.subr.bf16.mxu1 %v19006_v3 }
 0x514   :  { %17180 = vmatmul.mubr.msk.f32.vlgmr.msra.gmra.mrb[64].mxu0 %vm193_vm1, %v19844_v54  ;;  %17191 = vmatmul.mubr.msk.f32.vlgmr.msra.gmra.mrb[60].mxu1 %vm193_vm1, %v19844_v54 }
 0x515   :  { %18455 = vmatpush3.bf16.msra.mxu0 %v19793_v40  ;;  %18461 = vmatpush3.bf16.msra.mxu1 %v19795_v41 }
 0x516   :  { %18456 = vmatprep.subr.bf16.mxu0 %v19006_v3  ;;  %18462 = vmatprep.subr.bf16.mxu1 %v19006_v3 }
 0x517   :  { %17201 = vmatprep.mubr.msk.f32.mxu0 %vm19007_vm0, %v19008_v11  ;;  %17212 = vmatprep.mubr.msk.f32.mxu1 %vm19007_vm0, %v19008_v11 }
 0x519   :  { %18458 = vmatpush3.bf16.msra.mxu0 %v19817_v46  ;;  %18464 = vmatpush3.bf16.msra.mxu1 %v19819_v47  ;;  %v15570_v46 = vld [vmem:[%s21562_s5 + $0xc] ss:$0 sm:$0xff]  ;;  %v15571_v47 = vld [vmem:[%s21562_s5 + $0xd] ss:$0 sm:$0xff] }
 0x51a   :  { %18465 = vmatprep.subr.bf16.mxu0 %v19006_v3  ;;  %18471 = vmatprep.subr.bf16.mxu1 %v19006_v3 }
 0x51c   :  { %17202 = vmatmul.mubr.msk.f32.vlgmr.msra.gmra.mrb[66].mxu0 %vm193_vm1, %v36_v21  ;;  %17213 = vmatmul.mubr.msk.f32.vlgmr.msra.gmra.mrb[62].mxu1 %vm193_vm1, %v36_v21 }
 0x51d   :  { %18467 = vmatpush3.bf16.msra.mxu0 %v19846_v55  ;;  %18473 = vmatpush3.bf16.msra.mxu1 %v19848_v56  ;;  %v15592_v56 = vld [vmem:[%s21562_s5 + $0x12] ss:$0 sm:$0xff] }
 0x51e   :  { %18468 = vmatprep.subr.bf16.mxu0 %v19006_v3  ;;  %18474 = vmatprep.subr.bf16.mxu1 %v19006_v3 }
 0x51f   :  { %17223 = vmatprep.mubr.msk.f32.mxu0 %vm19007_vm0, %v19008_v11  ;;  %17234 = vmatprep.mubr.msk.f32.mxu1 %vm19007_vm0, %v19008_v11 }
 0x521   :  { %18470 = vmatpush3.bf16.msra.mxu0 %v19870_v61  ;;  %18476 = vmatpush3.bf16.msra.mxu1 %v19872_v62  ;;  %v15573_v61 = vld [vmem:[%s21562_s5 + $0xf] ss:$0 sm:$0xff] }
 0x522   :  { %18477 = vmatprep.subr.bf16.mxu0 %v19006_v3  ;;  %18483 = vmatprep.subr.bf16.mxu1 %v19006_v3 }
 0x524   :  { %17224 = vmatmul.mubr.msk.f32.vlgmr.msra.gmra.mrb[68].mxu0 %vm193_vm1, %v36_v21  ;;  %17235 = vmatmul.mubr.msk.f32.vlgmr.msra.gmra.mrb[64].mxu1 %vm193_vm1, %v36_v21 }
 0x525   :  { %18479 = vmatpush3.bf16.msra.mxu0 %v19894_v5  ;;  %18485 = vmatpush3.bf16.msra.mxu1 %v19896_v6 }
 0x526   :  { %18480 = vmatprep.subr.bf16.mxu0 %v19006_v3  ;;  %18486 = vmatprep.subr.bf16.mxu1 %v19006_v3 }
 0x527   :  { %17245 = vmatprep.mubr.msk.f32.mxu0 %vm19007_vm0, %v19008_v11  ;;  %17256 = vmatprep.mubr.msk.f32.mxu1 %vm19007_vm0, %v19008_v11 }
 0x529   :  { %18482 = vmatpush3.bf16.msra.mxu0 %v19918_v14  ;;  %18488 = vmatpush3.bf16.msra.mxu1 %v19920_v52 }
 0x52a   :  { %18489 = vmatprep.subr.bf16.mxu0 %v19006_v3  ;;  %18495 = vmatprep.subr.bf16.mxu1 %v19006_v3 }
 0x52c   :  { %17246 = vmatmul.mubr.msk.f32.vlgmr.msra.gmra.mrb[70].mxu0 %vm193_vm1, %v36_v21  ;;  %17257 = vmatmul.mubr.msk.f32.vlgmr.msra.gmra.mrb[66].mxu1 %vm193_vm1, %v36_v21 }
 0x52d   :  { %18491 = vmatpush3.bf16.msra.mxu0 %v18442_v8  ;;  %18497 = vmatpush3.bf16.msra.mxu1 %v18448_v13 }
 0x52e   :  { %18492 = vmatprep.subr.bf16.mxu0 %v19006_v3  ;;  %18498 = vmatprep.subr.bf16.mxu1 %v19006_v3 }
 0x52f   :  { %17267 = vmatprep.mubr.msk.f32.mxu0 %vm19007_vm0, %v19008_v11  ;;  %17278 = vmatprep.mubr.msk.f32.mxu1 %vm19007_vm0, %v19008_v11 }
 0x531   :  { %18494 = vmatpush3.bf16.msra.mxu0 %v18445_v20  ;;  %18500 = vmatpush3.bf16.msra.mxu1 %v18451_v28 }
 0x532   :  { %17281 = vmatprep.subr.mxu0 %v19008_v11  ;;  %17286 = vmatprep.subr.mxu1 %v19008_v11 }
 0x534   :  { %17268 = vmatmul.mubr.msk.f32.vlgmr.msra.gmra.mrb[72].mxu0 %vm193_vm1, %v36_v21  ;;  %17279 = vmatmul.mubr.msk.f32.vlgmr.msra.gmra.mrb[68].mxu1 %vm193_vm1, %v36_v21 }
 0x535   :  { %17283 = vmatprep.mubr.msk.f32.mxu0 %vm19007_vm0, %v19008_v11  ;;  %17288 = vmatprep.mubr.msk.f32.mxu1 %vm19007_vm0, %v19008_v11 }
 0x591   :  { %v3974_v23 = vpop.f32.mrb[50].mxu0  ;;  %v4044_v25 = vpop.f32.mrb[46].mxu1 }
 0x592   :  { %v17027_v27 = vpop.f32.mrb[51].mxu0  ;;  %v17038_v29 = vpop.f32.mrb[47].mxu1  ;;  %v4495_v54 = vadd.f32 %v15570_v46, %v3974_v23  ;;  %v4496_v55 = vadd.f32 %v15571_v47, %v4044_v25 }
 0x593   :  { %v15594_v27 = vld [vmem:[%s21562_s5 + $0x14] ss:$0 sm:$0xff]  ;;  %v15595_v29 = vld [vmem:[%s21562_s5 + $0x15] ss:$0 sm:$0xff] }
 0x599   :  { %v4114_v30 = vpop.f32.mrb[52].mxu0  ;;  %v4184_v31 = vpop.f32.mrb[48].mxu1 }
 0x59a   :  { %v17049_v32 = vpop.f32.mrb[53].mxu0  ;;  %v17060_v33 = vpop.f32.mrb[49].mxu1  ;;  %v4497_v2 = vadd.f32 %v15572_v60, %v4114_v30  ;;  %v4498_v5 = vadd.f32 %v15573_v61, %v4184_v31 }
 0x5bf   :  { %v20031_v34 = vpop.f32.mrb[54].mxu0  ;;  %v20033_v35 = vpop.f32.mrb[50].mxu1 }
 0x5c0   :  { %v17071_v37 = vpop.f32.mrb[55].mxu0  ;;  %v17082_v17 = vpop.f32.mrb[51].mxu1  ;;  %v4499_v26 = vadd.f32 %v15570_v46, %v20031_v34  ;;  %v4500_v19 = vadd.f32 %v15571_v47, %v20033_v35 }
 0x5c7   :  { %v20035_v38 = vpop.f32.mrb[56].mxu0  ;;  %v20037_v39 = vpop.f32.mrb[52].mxu1 }
 0x5c8   :  { %v17093_v40 = vpop.f32.mrb[57].mxu0  ;;  %v17104_v41 = vpop.f32.mrb[53].mxu1  ;;  %v4501_v30 = vadd.f32 %v15572_v60, %v20035_v38  ;;  %v4502_v31 = vadd.f32 %v15573_v61, %v20037_v39 }
 0x5cf   :  { %v4572_v44 = vpop.f32.mrb[58].mxu0  ;;  %v4642_v45 = vpop.f32.mrb[54].mxu1 }
 0x5d0   :  { %v5677_v48 = vadd.f32 %v15590_v42, %v4572_v44  ;;  %v5678_v49 = vadd.f32 %v15591_v43, %v4642_v45  ;;  %v17115_v51 = vpop.f32.mrb[59].mxu0  ;;  %v17126_v53 = vpop.f32.mrb[55].mxu1  ;;  %v15598_v44 = vld [vmem:[%s21560_s3] ss:$0 sm:$0xff]  ;;  %v15599_v45 = vld [vmem:[%s21560_s3 + $0x1] ss:$0 sm:$0xff] }
 0x5d2   :  { %17282 = vmatpush3.xpose.msk.msra.mxu0 %vm2024_vm2, %v5677_v48  ;;  %17287 = vmatpush3.xpose.msk.msra.mxu1 %vm2024_vm2, %v5678_v49 }
 0x5d3   :  { %17291 = vmatprep.subr.mxu0 %v19008_v11  ;;  %17296 = vmatprep.subr.mxu1 %v19008_v11 }
 0x5d5   :  { %17284 = vmatmul.mubr.msk.f32.vlgmr.msra.gmra.mrb[74].mxu0 %vm2024_vm2, %v4495_v54  ;;  %17289 = vmatmul.mubr.msk.f32.vlgmr.msra.gmra.mrb[70].mxu1 %vm2024_vm2, %v4496_v55 }
 0x5d6   :  { %17293 = vmatprep.mubr.msk.f32.mxu0 %vm19007_vm0, %v19008_v11  ;;  %17298 = vmatprep.mubr.msk.f32.mxu1 %vm19007_vm0, %v19008_v11 }
 0x5d7   :  { %v4712_v58 = vpop.f32.mrb[60].mxu0  ;;  %v4782_v59 = vpop.f32.mrb[56].mxu1 }
 0x5d8   :  { %v5679_v62 = vadd.f32 %v15592_v56, %v4712_v58  ;;  %v5680_v63 = vadd.f32 %v15593_v57, %v4782_v59  ;;  %v17137_v0 = vpop.f32.mrb[61].mxu0  ;;  %v17148_v1 = vpop.f32.mrb[57].mxu1 }
 0x5da   :  { %17292 = vmatpush3.xpose.msk.msra.mxu0 %vm2024_vm2, %v5679_v62  ;;  %17297 = vmatpush3.xpose.msk.msra.mxu1 %vm2024_vm2, %v5680_v63 }
 0x5db   :  { %17301 = vmatprep.subr.mxu0 %v19008_v11  ;;  %17306 = vmatprep.subr.mxu1 %v19008_v11 }
 0x5dd   :  { %17294 = vmatmul.mubr.msk.f32.vlgmr.msra.gmra.mrb[76].mxu0 %vm2024_vm2, %v4497_v2  ;;  %17299 = vmatmul.mubr.msk.f32.vlgmr.msra.gmra.mrb[72].mxu1 %vm2024_vm2, %v4498_v5  ;;  %v15602_v2 = vld [vmem:[%s21560_s3 + $0x4] ss:$0 sm:$0xff]  ;;  %v15603_v5 = vld [vmem:[%s21560_s3 + $0x5] ss:$0 sm:$0xff] }
 0x5de   :  { %17303 = vmatprep.mubr.msk.f32.mxu0 %vm19007_vm0, %v19008_v11  ;;  %17308 = vmatprep.mubr.msk.f32.mxu1 %vm19007_vm0, %v19008_v11 }
 0x5df   :  { %v4852_v6 = vpop.f32.mrb[62].mxu0  ;;  %v4922_v7 = vpop.f32.mrb[58].mxu1 }
 0x5e0   :  { %v17159_v50 = vpop.f32.mrb[63].mxu0  ;;  %v17170_v9 = vpop.f32.mrb[59].mxu1  ;;  %v5681_v32 = vadd.f32 %v15594_v27, %v4852_v6  ;;  %v5682_v33 = vadd.f32 %v15595_v29, %v4922_v7 }
 0x5e7   :  { %v20083_v10 = vpop.f32.mrb[64].mxu0  ;;  %v20085_v14 = vpop.f32.mrb[60].mxu1 }
 0x5e8   :  { %v17181_v52 = vpop.f32.mrb[65].mxu0  ;;  %v17192_v15 = vpop.f32.mrb[61].mxu1 }
 0x5ef   :  { %v5135_v16 = vpop.f32.mrb[66].mxu0  ;;  %v5205_v22 = vpop.f32.mrb[62].mxu1 }
 0x5f0   :  { %v5685_v4 = vadd.f32 %v15590_v42, %v5135_v16  ;;  %v5686_v8 = vadd.f32 %v15591_v43, %v5205_v22  ;;  %v17203_v13 = vpop.f32.mrb[67].mxu0  ;;  %v17214_v12 = vpop.f32.mrb[63].mxu1 }
 0x5f2   :  { %17302 = vmatpush3.xpose.msk.msra.mxu0 %vm2024_vm2, %v5685_v4  ;;  %17307 = vmatpush3.xpose.msk.msra.mxu1 %vm2024_vm2, %v5686_v8  ;;  %v15604_v4 = vld [vmem:[%s21560_s3 + $0x6] ss:$0 sm:$0xff]  ;;  %v15605_v8 = vld [vmem:[%s21560_s3 + $0x7] ss:$0 sm:$0xff] }
 0x5f3   :  { %17311 = vmatprep.subr.mxu0 %v19008_v11  ;;  %17316 = vmatprep.subr.mxu1 %v19008_v11 }
 0x5f5   :  { %17304 = vmatmul.mubr.msk.f32.vlgmr.msra.gmra.mrb[78].mxu0 %vm2024_vm2, %v4499_v26  ;;  %17309 = vmatmul.mubr.msk.f32.vlgmr.msra.gmra.mrb[74].mxu1 %vm2024_vm2, %v4500_v19 }
 0x5f6   :  { %17313 = vmatprep.mubr.msk.f32.mxu0 %vm19007_vm0, %v19008_v11  ;;  %17318 = vmatprep.mubr.msk.f32.mxu1 %vm19007_vm0, %v19008_v11 }
 0x5f7   :  { %v5275_v24 = vpop.f32.mrb[68].mxu0  ;;  %v5345_v20 = vpop.f32.mrb[64].mxu1 }
 0x5f8   :  { %v5687_v28 = vadd.f32 %v15592_v56, %v5275_v24  ;;  %v5688_v21 = vadd.f32 %v15593_v57, %v5345_v20  ;;  %v17225_v23 = vpop.f32.mrb[69].mxu0  ;;  %v17236_v25 = vpop.f32.mrb[65].mxu1  ;;  %v15600_v56 = vld [vmem:[%s21560_s3 + $0x2] ss:$0 sm:$0xff]  ;;  %v15601_v57 = vld [vmem:[%s21560_s3 + $0x3] ss:$0 sm:$0xff] }
 0x5fa   :  { %17312 = vmatpush3.xpose.msk.msra.mxu0 %vm2024_vm2, %v5687_v28  ;;  %17317 = vmatpush3.xpose.msk.msra.mxu1 %vm2024_vm2, %v5688_v21 }
 0x5fb   :  { %17321 = vmatprep.subr.mxu0 %v19008_v11  ;;  %17326 = vmatprep.subr.mxu1 %v19008_v11 }
 0x5fd   :  { %17314 = vmatmul.mubr.msk.f32.vlgmr.msra.gmra.mrb[80].mxu0 %vm2024_vm2, %v4501_v30  ;;  %17319 = vmatmul.mubr.msk.f32.vlgmr.msra.gmra.mrb[76].mxu1 %vm2024_vm2, %v4502_v31 }
 0x5fe   :  { %17322 = vmatpush3.msra.mxu0 %v5681_v32  ;;  %17327 = vmatpush3.msra.mxu1 %v5682_v33 }
 0x5ff   :  { %v5415_v34 = vpop.f32.mrb[70].mxu0  ;;  %v5485_v35 = vpop.f32.mrb[66].mxu1  ;;  %17323 = vmatprep.mubr.msk.f32.mxu0 %vm19007_vm0, %v19008_v11  ;;  %17328 = vmatprep.mubr.msk.f32.mxu1 %vm19007_vm0, %v19008_v11 }
 0x600   :  { %v20117_v37 = vadd.f32 %v15594_v27, %v5415_v34  ;;  %v20119_v17 = vadd.f32 %v15595_v29, %v5485_v35  ;;  %v17247_v38 = vpop.f32.mrb[71].mxu0  ;;  %v17258_v39 = vpop.f32.mrb[67].mxu1  ;;  %17331 = vmatprep.subr.mxu0 %v19008_v11  ;;  %17336 = vmatprep.subr.mxu1 %v19008_v11 }
 0x607   :  { %v20123_v40 = vpop.f32.mrb[72].mxu0  ;;  %v20125_v41 = vpop.f32.mrb[68].mxu1 }
 0x608   :  { %v17269_v42 = vpop.f32.mrb[73].mxu0  ;;  %v17280_v43 = vpop.f32.mrb[69].mxu1 }
 0x6a8   :  { %v5813_v46 = vpop.f32.mrb[74].mxu0  ;;  %v5889_v47 = vpop.f32.mrb[70].mxu1 }
 0x6a9   :  { %v5814_v48 = vadd.f32 %v15598_v44, %v5813_v46  ;;  %v5890_v49 = vadd.f32 %v15599_v45, %v5889_v47  ;;  %v17285_v51 = vpop.f32.mrb[75].mxu0  ;;  %v17290_v53 = vpop.f32.mrb[71].mxu1 }
 0x6ab   :  { %v6352_v54 = vsel %vm2024_vm2, %v5890_v49, -inf  ;;  %v6349_v55 = vsel %vm2024_vm2, %v5814_v48, -inf }
 0x6ac   :  { %6353 = vmax.xlane.f32.xlu1 %v6352_v54  ;;  %6350 = vmax.xlane.f32.xlu0 %v6349_v55 }
 0x6b0   :  { %v5965_v58 = vpop.f32.mrb[76].mxu0  ;;  %v6041_v59 = vpop.f32.mrb[72].mxu1 }
 0x6b1   :  { %v5966_v60 = vadd.f32 %v15600_v56, %v5965_v58  ;;  %v6042_v61 = vadd.f32 %v15601_v57, %v6041_v59  ;;  %v17295_v62 = vpop.f32.mrb[77].mxu0  ;;  %v17300_v63 = vpop.f32.mrb[73].mxu1 }
 0x6b3   :  { %v6358_v0 = vsel %vm2024_vm2, %v6042_v61, -inf  ;;  %v6355_v1 = vsel %vm2024_vm2, %v5966_v60, -inf }
 0x6b4   :  { %6359 = vmax.xlane.f32.xlu1 %v6358_v0  ;;  %6356 = vmax.xlane.f32.xlu0 %v6355_v1 }
 0x6c8   :  { %v6117_v6 = vpop.f32.mrb[78].mxu0  ;;  %v6193_v7 = vpop.f32.mrb[74].mxu1 }
 0x6c9   :  { %v6118_v50 = vadd.f32 %v15602_v2, %v6117_v6  ;;  %v6194_v9 = vadd.f32 %v15603_v5, %v6193_v7  ;;  %v17305_v52 = vpop.f32.mrb[79].mxu0  ;;  %v17310_v15 = vpop.f32.mrb[75].mxu1 }
 0x6cb   :  { %v6364_v16 = vsel %vm2024_vm2, %v6194_v9, -inf  ;;  %v6361_v22 = vsel %vm2024_vm2, %v6118_v50, -inf }
 0x6cc   :  { %6365 = vmax.xlane.f32.xlu1 %v6364_v16  ;;  %6362 = vmax.xlane.f32.xlu0 %v6361_v22 }
 0x6d0   :  { %v6269_v13 = vpop.f32.mrb[80].mxu0  ;;  %v6345_v12 = vpop.f32.mrb[76].mxu1 }
 0x6d1   :  { %v6270_v26 = vadd.f32 %v15604_v4, %v6269_v13  ;;  %v6346_v19 = vadd.f32 %v15605_v8, %v6345_v12  ;;  %v17315_v24 = vpop.f32.mrb[81].mxu0  ;;  %v17320_v20 = vpop.f32.mrb[77].mxu1  ;;  %v15597_v4 = vld [vmem:[%s21562_s5 + $0x17] ss:$0 sm:$0xff]  ;;  %v15596_v13 = vld [vmem:[%s21562_s5 + $0x16] ss:$0 sm:$0xff] }
 0x6d2   :  { %v5683_v20 = vadd.f32 %v15596_v13, %v20083_v10 }
 0x6d3   :  { %v6370_v28 = vsel %vm2024_vm2, %v6346_v19, -inf  ;;  %v6367_v21 = vsel %vm2024_vm2, %v6270_v26, -inf }
 0x6d4   :  { %6371 = vmax.xlane.f32.xlu1 %v6370_v28  ;;  %6368 = vmax.xlane.f32.xlu0 %v6367_v21 }
 0x739   :  { %v6354_v23 = vpop.xlane.xlu1 %6353  ;;  %v6351_v25 = vpop.xlane.xlu0 %6350 }
 0x73a   :  { %v6374_v27 = vsub.f32 %v5890_v49, %v6354_v23  ;;  %v6373_v29 = vsub.f32 %v5814_v48, %v6351_v25 }
 0x73c   :  { %v6383_v30 = vmul.f32 1.442695, %v6374_v27  ;;  %v6381_v31 = vmul.f32 1.442695, %v6373_v29 }
 0x73e   :  { %18867 = vpow2.f32 %v6383_v30 }
 0x73f   :  { %18869 = vpow2.f32 %v6381_v31  ;;  %v5692_v31 = vadd.f32 %v15597_v4, %v20125_v41 }
 0x741   :  { %v6360_v32 = vpop.xlane.xlu1 %6359  ;;  %v6357_v33 = vpop.xlane.xlu0 %6356 }
 0x742   :  { %v6376_v34 = vsub.f32 %v6042_v61, %v6360_v32  ;;  %v6375_v35 = vsub.f32 %v5966_v60, %v6357_v33  ;;  %v5691_v33 = vadd.f32 %v15596_v13, %v20123_v40 }
 0x744   :  { %v6387_v38 = vmul.f32 1.442695, %v6376_v34  ;;  %v6385_v39 = vmul.f32 1.442695, %v6375_v35 }
 0x746   :  { %18871 = vpow2.f32 %v6387_v38  ;;  %v177_v38 = vld [vmem:[%s21563_s6 + $0x20] sm:$0xff] }
 0x747   :  { %18873 = vpow2.f32 %v6385_v39  ;;  %v178_v39 = vld [vmem:[%s21563_s6 + $0x28] sm:$0xff] }
 0x748   :  { %v18868_v42 = vpop.eup %18867 }
 0x749   :  { %v18870_v43 = vpop.eup %18869  ;;  %v6400_v44 = vsel %vm2024_vm2, %v18868_v42, 0.0 }
 0x74a   :  { %6401 = vadd.xlane.f32.xlu1 %v6400_v44  ;;  %v6397_v45 = vsel %vm2024_vm2, %v18870_v43, 0.0  ;;  %v179_v44 = vld [vmem:[%s21563_s6 + $0x30] sm:$0xff] }
 0x74b   :  { %6398 = vadd.xlane.f32.xlu0 %v6397_v45 }
 0x750   :  { %v18872_v46 = vpop.eup %18871 }
 0x751   :  { %v18874_v47 = vpop.eup %18873  ;;  %v6406_v48 = vsel %vm2024_vm2, %v18872_v46, 0.0 }
 0x752   :  { %6407 = vadd.xlane.f32.xlu1 %v6406_v48  ;;  %v6403_v49 = vsel %vm2024_vm2, %v18874_v47, 0.0 }
 0x753   :  { %6404 = vadd.xlane.f32.xlu0 %v6403_v49 }
 0x759   :  { %v6366_v51 = vpop.xlane.xlu1 %6365  ;;  %v6363_v53 = vpop.xlane.xlu0 %6362 }
 0x75a   :  { %v6378_v54 = vsub.f32 %v6194_v9, %v6366_v51  ;;  %v6377_v55 = vsub.f32 %v6118_v50, %v6363_v53 }
 0x75c   :  { %v6391_v56 = vmul.f32 1.442695, %v6378_v54  ;;  %v6389_v57 = vmul.f32 1.442695, %v6377_v55 }
 0x75e   :  { %18875 = vpow2.f32 %v6391_v56 }
 0x75f   :  { %18877 = vpow2.f32 %v6389_v57 }
 0x761   :  { %v6372_v58 = vpop.xlane.xlu1 %6371  ;;  %v6369_v59 = vpop.xlane.xlu0 %6368 }
 0x762   :  { %v6380_v60 = vsub.f32 %v6346_v19, %v6372_v58  ;;  %v6379_v61 = vsub.f32 %v6270_v26, %v6369_v59  ;;  %v5684_v19 = vadd.f32 %v15597_v4, %v20085_v14 }
 0x764   :  { %v6395_v62 = vmul.f32 1.442695, %v6380_v60  ;;  %v6393_v63 = vmul.f32 1.442695, %v6379_v61 }
 0x766   :  { %18879 = vpow2.f32 %v6395_v62  ;;  %v181_v62 = vld [vmem:[%s21564_s7] sm:$0xff] }
 0x767   :  { %18881 = vpow2.f32 %v6393_v63  ;;  %v182_v63 = vld [vmem:[%s21564_s7 + $0x8] sm:$0xff] }
 0x768   :  { %v18876_v0 = vpop.eup %18875 }
 0x769   :  { %v18878_v1 = vpop.eup %18877  ;;  %v6412_v2 = vsel %vm2024_vm2, %v18876_v0, 0.0 }
 0x76a   :  { %6413 = vadd.xlane.f32.xlu1 %v6412_v2  ;;  %v6409_v5 = vsel %vm2024_vm2, %v18878_v1, 0.0  ;;  %v184_v2 = vld [vmem:[%s21564_s7 + $0x18] sm:$0xff] }
 0x76b   :  { %6410 = vadd.xlane.f32.xlu0 %v6409_v5 }
 0x770   :  { %v20165_v6 = vpop.eup %18879 }
 0x771   :  { %v20167_v7 = vpop.eup %18881  ;;  %v6418_v50 = vsel %vm2024_vm2, %v20165_v6, 0.0 }
 0x772   :  { %6419 = vadd.xlane.f32.xlu1 %v6418_v50  ;;  %v6415_v9 = vsel %vm2024_vm2, %v20167_v7, 0.0  ;;  %v187_v50 = vld [vmem:[%s21564_s7 + $0x30] sm:$0xff] }
 0x773   :  { %6416 = vadd.xlane.f32.xlu0 %v6415_v9 }
 0x7d7   :  { %v6402_v52 = vpop.xlane.xlu1 %6401 }
 0x7d8   :  { %18883 = vrcp.f32 %v6402_v52  ;;  %v6399_v15 = vpop.xlane.xlu0 %6398 }
 0x7d9   :  { %18885 = vrcp.f32 %v6399_v15  ;;  %v188_v15 = vld [vmem:[%s21564_s7 + $0x38] sm:$0xff] }
 0x7df   :  { %v6408_v16 = vpop.xlane.xlu1 %6407 }
 0x7e0   :  { %18887 = vrcp.f32 %v6408_v16  ;;  %v6405_v22 = vpop.xlane.xlu0 %6404  ;;  %v18515_v16 = vpack.c.bf16 %v188_v15, %v187_v50  ;;  %v15656_v50 = vld [vmem:[%s21561_s4 + $0x338] sm:$0xff] }
 0x7e1   :  { %18889 = vrcp.f32 %v6405_v22  ;;  %v15668_v15 = vld [vmem:[%s21561_s4 + $0x398] sm:$0xff] }
 0x7e2   :  { %v18884_v8 = vpop.eup %18883 }
 0x7e3   :  { %v18886_v12 = vpop.eup %18885  ;;  %v6430_v26 = vmul.f32 %v18884_v8, %v18868_v42  ;;  %v180_v42 = vld [vmem:[%s21563_s6 + $0x38] sm:$0xff] }
 0x7e4   :  { %v6429_v24 = vmul.f32 %v18886_v12, %v18870_v43 }
 0x7e5   :  { %17329 = vmatmul.mubr.msk.f32.vlgmr.msra.gmra.mrb[78].mxu1 %vm2024_vm2, %v6430_v26 }
 0x7e6   :  { %17324 = vmatmul.mubr.msk.f32.vlgmr.msra.gmra.mrb[82].mxu0 %vm2024_vm2, %v6429_v24  ;;  %17337 = vmatpush3.msra.mxu1 %v5684_v19 }
 0x7e7   :  { %17332 = vmatpush3.msra.mxu0 %v5683_v20  ;;  %17333 = vmatprep.mubr.msk.f32.mxu0 %vm19007_vm0, %v19008_v11 }
 0x7e8   :  { %17338 = vmatprep.mubr.msk.f32.mxu1 %vm19007_vm0, %v19008_v11  ;;  %17341 = vmatprep.subr.mxu0 %v19008_v11 }
 0x7e9   :  { %17346 = vmatprep.subr.mxu1 %v19008_v11 }
 0x7ea   :  { %v18888_v14 = vpop.eup %18887 }
 0x7eb   :  { %v18890_v28 = vpop.eup %18889  ;;  %v6432_v21 = vmul.f32 %v18888_v14, %v18872_v46 }
 0x7ec   :  { %v6431_v10 = vmul.f32 %v18890_v28, %v18874_v47  ;;  %v15638_v28 = vld [vmem:[%s21565_s8 + $0x1] ss:$0 sm:$0xff] }
 0x7ed   :  { %17339 = vmatmul.mubr.msk.f32.vlgmr.msra.gmra.mrb[80].mxu1 %vm2024_vm2, %v6432_v21 }
 0x7ee   :  { %17334 = vmatmul.mubr.msk.f32.vlgmr.msra.gmra.mrb[84].mxu0 %vm2024_vm2, %v6431_v10  ;;  %17347 = vmatpush3.msra.mxu1 %v20119_v17 }
 0x7ef   :  { %17342 = vmatpush3.msra.mxu0 %v20117_v37  ;;  %17343 = vmatprep.mubr.msk.f32.mxu0 %vm19007_vm0, %v19008_v11 }
 0x7f0   :  { %17348 = vmatprep.mubr.msk.f32.mxu1 %vm19007_vm0, %v19008_v11  ;;  %17351 = vmatprep.subr.mxu0 %v19008_v11 }
 0x7f1   :  { %17356 = vmatprep.subr.mxu1 %v19008_v11 }
 0x7f7   :  { %v6414_v23 = vpop.xlane.xlu1 %6413 }
 0x7f8   :  { %18891 = vrcp.f32 %v6414_v23  ;;  %v6411_v25 = vpop.xlane.xlu0 %6410 }
 0x7f9   :  { %18893 = vrcp.f32 %v6411_v25 }
 0x7ff   :  { %v6420_v27 = vpop.xlane.xlu1 %6419 }
 0x800   :  { %18895 = vrcp.f32 %v6420_v27  ;;  %v6417_v29 = vpop.xlane.xlu0 %6416 }
 0x801   :  { %18897 = vrcp.f32 %v6417_v29 }
 0x802   :  { %v18892_v17 = vpop.eup %18891 }
 0x803   :  { %v18894_v37 = vpop.eup %18893  ;;  %v6434_v30 = vmul.f32 %v18892_v17, %v18876_v0  ;;  %v18501_v0 = vpack.c.bf16 %v182_v63, %v181_v62  ;;  %v15666_v62 = vld [vmem:[%s21561_s4 + $0x388] sm:$0xff]  ;;  %v20366_v63 = vld [vmem:[%s21565_s8 + $0x2] ss:$0 sm:$0xff] }
 0x804   :  { %v6433_v32 = vmul.f32 %v18894_v37, %v18878_v1  ;;  %v183_v1 = vld [vmem:[%s21564_s7 + $0x10] sm:$0xff] }
 0x805   :  { %17349 = vmatmul.mubr.msk.f32.vlgmr.msra.gmra.mrb[82].mxu1 %vm2024_vm2, %v6434_v30  ;;  %v18505_v5 = vpack.c.bf16 %v184_v2, %v183_v1 }
 0x806   :  { %17344 = vmatmul.mubr.msk.f32.vlgmr.msra.gmra.mrb[86].mxu0 %vm2024_vm2, %v6433_v32  ;;  %17357 = vmatpush3.msra.mxu1 %v5692_v31 }
 0x807   :  { %17352 = vmatpush3.msra.mxu0 %v5691_v33  ;;  %17353 = vmatprep.mubr.msk.f32.mxu0 %vm19007_vm0, %v19008_v11 }
 0x808   :  { %17358 = vmatprep.mubr.msk.f32.mxu1 %vm19007_vm0, %v19008_v11  ;;  %17361 = vmatprep.subr.mxu0 %v19008_v11 }
 0x809   :  { %17366 = vmatprep.subr.mxu1 %v19008_v11 }
 0x80a   :  { %v18896_v41 = vpop.eup %18895 }
 0x80b   :  { %v18898_v34 = vpop.eup %18897  ;;  %v6436_v40 = vmul.f32 %v18896_v41, %v20165_v6  ;;  %v185_v6 = vld [vmem:[%s21564_s7 + $0x20] sm:$0xff] }
 0x80c   :  { %v6435_v35 = vmul.f32 %v18898_v34, %v20167_v7  ;;  %v186_v7 = vld [vmem:[%s21564_s7 + $0x28] sm:$0xff] }
 0x80d   :  { %17359 = vmatmul.mubr.msk.f32.vlgmr.msra.gmra.mrb[84].mxu1 %vm2024_vm2, %v6436_v40  ;;  %v18509_v9 = vpack.c.bf16 %v186_v7, %v185_v6  ;;  %v15655_v6 = vld [vmem:[%s21561_s4 + $0x330] sm:$0xff] }
 0x80e   :  { %17354 = vmatmul.mubr.msk.f32.vlgmr.msra.gmra.mrb[88].mxu0 %vm2024_vm2, %v6435_v35  ;;  %17368 = vmatprep.mubr.msk.f32.mxu1 %vm19007_vm0, %v19008_v11 }
 0x80f   :  { %17363 = vmatprep.mubr.msk.f32.mxu0 %vm19007_vm0, %v19008_v11  ;;  %17362 = vmatpush3.msra.mxu0 %v177_v38 }
 0x810   :  { %17367 = vmatpush3.msra.mxu1 %v178_v39  ;;  %17371 = vmatprep.subr.mxu0 %v19008_v11 }
 0x811   :  { %17376 = vmatprep.subr.mxu1 %v19008_v11 }
 0x8b8   :  { %v6579_v43 = vpop.f32.mrb[78].mxu1 }
 0x8b9   :  { %v6506_v45 = vpop.f32.mrb[82].mxu0  ;;  %v17330_v46 = vpop.f32.mrb[79].mxu1  ;;  %17369 = vmatmul.mubr.msk.f32.vlgmr.msra.gmra.mrb[86].mxu1 %vm2024_vm2, %v6579_v43 }
 0x8ba   :  { %v17325_v47 = vpop.f32.mrb[83].mxu0  ;;  %17364 = vmatmul.mubr.msk.f32.vlgmr.msra.gmra.mrb[90].mxu0 %vm2024_vm2, %v6506_v45  ;;  %17377 = vmatpush3.msra.mxu1 %v180_v42  ;;  %v15657_v45 = vld [vmem:[%s21561_s4 + $0x340] sm:$0xff]  ;;  %v15658_v46 = vld [vmem:[%s21561_s4 + $0x348] sm:$0xff] }
 0x8bb   :  { %17372 = vmatpush3.msra.mxu0 %v179_v44  ;;  %17373 = vmatprep.mubr.msk.f32.mxu0 %vm19007_vm0, %v19008_v11 }
 0x8bc   :  { %17378 = vmatprep.mubr.msk.f32.mxu1 %vm19007_vm0, %v19008_v11  ;;  %17381 = vmatprep.subr.mxu0 %v19008_v11 }
 0x8bd   :  { %17386 = vmatprep.subr.mxu1 %v19008_v11 }
 0x8c0   :  { %v6725_v48 = vpop.f32.mrb[80].mxu1 }
 0x8c1   :  { %v6652_v49 = vpop.f32.mrb[84].mxu0  ;;  %v17340_v51 = vpop.f32.mrb[81].mxu1  ;;  %17379 = vmatmul.mubr.msk.f32.vlgmr.msra.gmra.mrb[88].mxu1 %vm2024_vm2, %v6725_v48 }
 0x8c2   :  { %v17335_v53 = vpop.f32.mrb[85].mxu0  ;;  %17374 = vmatmul.mubr.msk.f32.vlgmr.msra.gmra.mrb[92].mxu0 %vm2024_vm2, %v6652_v49  ;;  %17387 = vmatpush3.msra.mxu1 %v178_v39  ;;  %v20323_v49 = vpack.c.bf16 %v15658_v46, %v15657_v45  ;;  %v15691_v45 = vld [vmem:[%s21561_s4 + $0x450] sm:$0xff]  ;;  %v15692_v46 = vld [vmem:[%s21561_s4 + $0x458] sm:$0xff] }
 0x8c3   :  { %17382 = vmatpush3.msra.mxu0 %v177_v38  ;;  %17383 = vmatprep.mubr.msk.f32.mxu0 %vm19007_vm0, %v19008_v11  ;;  %v15650_v38 = vld [vmem:[%s21561_s4 + $0x308] sm:$0xff]  ;;  %v15651_v53 = vld [vmem:[%s21561_s4 + $0x310] sm:$0xff] }
 0x8c4   :  { %17388 = vmatprep.mubr.msk.f32.mxu1 %vm19007_vm0, %v19008_v11  ;;  %17391 = vmatprep.subr.mxu0 %v19008_v11 }
 0x8c5   :  { %17396 = vmatprep.subr.mxu1 %v19008_v11 }
 0x8d8   :  { %v6871_v54 = vpop.f32.mrb[82].mxu1 }
 0x8d9   :  { %v6798_v55 = vpop.f32.mrb[86].mxu0  ;;  %v17350_v56 = vpop.f32.mrb[83].mxu1  ;;  %17389 = vmatmul.mubr.msk.f32.vlgmr.msra.gmra.mrb[90].mxu1 %vm2024_vm2, %v6871_v54  ;;  %v15652_v54 = vld [vmem:[%s21561_s4 + $0x318] sm:$0xff] }
 0x8da   :  { %v17345_v57 = vpop.f32.mrb[87].mxu0  ;;  %17384 = vmatmul.mubr.msk.f32.vlgmr.msra.gmra.mrb[94].mxu0 %vm2024_vm2, %v6798_v55  ;;  %17397 = vmatpush3.msra.mxu1 %v180_v42  ;;  %v15659_v55 = vld [vmem:[%s21561_s4 + $0x350] sm:$0xff]  ;;  %v20340_v56 = vpack.c.bf16 %v15652_v54, %v15651_v53  ;;  %v15686_v53 = vld [vmem:[%s21561_s4 + $0x428] sm:$0xff] }
 0x8db   :  { %17392 = vmatpush3.msra.mxu0 %v179_v44  ;;  %17393 = vmatprep.mubr.msk.f32.mxu0 %vm19007_vm0, %v19008_v11  ;;  %v15660_v57 = vld [vmem:[%s21561_s4 + $0x358] sm:$0xff] }
 0x8dc   :  { %17398 = vmatprep.mubr.msk.f32.mxu1 %vm19007_vm0, %v19008_v11  ;;  %18502 = vmatprep.subr.bf16.mxu0 %v18501_v0 }
 0x8dd   :  { %18511 = vmatprep.subr.msk.bf16.mxu1 %vm20279_vm4, %v18509_v9 }
 0x8e0   :  { %v7017_v58 = vpop.f32.mrb[84].mxu1 }
 0x8e1   :  { %v6944_v59 = vpop.f32.mrb[88].mxu0  ;;  %v17360_v60 = vpop.f32.mrb[85].mxu1  ;;  %17399 = vmatmul.mubr.msk.f32.vlgmr.msra.gmra.mrb[92].mxu1 %vm2024_vm2, %v7017_v58  ;;  %v20345_v58 = vpack.c.bf16 %v15660_v57, %v15659_v55  ;;  %v15687_v55 = vld [vmem:[%s21561_s4 + $0x430] sm:$0xff]  ;;  %v15688_v57 = vld [vmem:[%s21561_s4 + $0x438] sm:$0xff] }
 0x8e2   :  { %v17355_v61 = vpop.f32.mrb[89].mxu0  ;;  %17394 = vmatmul.mubr.msk.f32.vlgmr.msra.gmra.mrb[96].mxu0 %vm2024_vm2, %v6944_v59  ;;  %18514 = vmatpush3.bf16.xpose.msk.msra.mxu1 %vm20279_vm4, %v18509_v9  ;;  %v15653_v59 = vld [vmem:[%s21561_s4 + $0x320] sm:$0xff]  ;;  %v15654_v60 = vld [vmem:[%s21561_s4 + $0x328] sm:$0xff]  ;;  %v15667_v9 = vld [vmem:[%s21561_s4 + $0x390] sm:$0xff] }
 0x8e3   :  { %18504 = vmatpush3.bf16.msra.mxu0 %v18501_v0  ;;  %18517 = vmatprep.subr.msk.bf16.mxu1 %vm20279_vm4, %v18515_v16  ;;  %v15665_v61 = vld [vmem:[%s21561_s4 + $0x380] sm:$0xff]  ;;  %v20370_v2 = vpack.c.bf16 %v15654_v60, %v15653_v59  ;;  %v20573_v59 = vpack.c.bf16 %v15688_v57, %v15687_v55 }
 0x8e4   :  { %18506 = vmatprep.subr.bf16.mxu0 %v18505_v5  ;;  %v15693_v60 = vld [vmem:[%s21561_s4 + $0x460] sm:$0xff] }
 0x8e7   :  { %18508 = vmatpush3.bf16.msra.mxu0 %v18505_v5  ;;  %v20372_v5 = vpack.c.bf16 %v15666_v62, %v15665_v61  ;;  %v15694_v61 = vld [vmem:[%s21561_s4 + $0x468] sm:$0xff] }
 0x8e8   :  { %18521 = vmatprep.subr.bf16.mxu0 %v19006_v3 }
 0x8ea   :  { %18520 = vmatpush3.bf16.xpose.msk.msra.mxu1 %vm20279_vm4, %v18515_v16  ;;  %v20395_v16 = vpack.c.bf16 %v15656_v50, %v15655_v6  ;;  %v15696_v6 = vld [vmem:[%s21561_s4 + $0x478] sm:$0xff] }
 0x8eb   :  { %18533 = vmatprep.subr.bf16.mxu1 %v19006_v3 }
 0x98c   :  { %v7163_v22 = vpop.f32.mrb[86].mxu1 }
 0x98d   :  { %v7090_v4 = vpop.f32.mrb[90].mxu0  ;;  %v17370_v8 = vpop.f32.mrb[87].mxu1 }
 0x98e   :  { %v7605_v13 = vadd.f32 %v7163_v22, %v7090_v4  ;;  %v17365_v12 = vpop.f32.mrb[91].mxu0  ;;  %v20397_v22 = vpack.c.bf16 %v15668_v15, %v15667_v9  ;;  %v15661_v4 = vld [vmem:[%s21561_s4 + $0x360] sm:$0xff]  ;;  %v15662_v8 = vld [vmem:[%s21561_s4 + $0x368] sm:$0xff]  ;;  %v15813_v9 = vld [vmem:[%s21562_s5 + $0x18] ss:$0 sm:$0xff] }
 0x98f   :  { %v15674_v12 = vld [vmem:[%s21561_s4 + $0x3c8] sm:$0xff] }
 0x994   :  { %v7309_v26 = vpop.f32.mrb[88].mxu1 }
 0x995   :  { %v7236_v19 = vpop.f32.mrb[92].mxu0  ;;  %v17380_v24 = vpop.f32.mrb[89].mxu1 }
 0x996   :  { %v7607_v20 = vadd.f32 %v7605_v13, %v7236_v19  ;;  %v17375_v14 = vpop.f32.mrb[93].mxu0  ;;  %v15673_v13 = vld [vmem:[%s21561_s4 + $0x3c0] sm:$0xff]  ;;  %v15663_v24 = vld [vmem:[%s21561_s4 + $0x370] sm:$0xff] }
 0x997   :  { %v20421_v19 = vpack.c.bf16 %v15674_v12, %v15673_v13  ;;  %v15675_v14 = vld [vmem:[%s21561_s4 + $0x3d0] sm:$0xff] }
 0x998   :  { %v7609_v21 = vadd.f32 %v7607_v20, %v7309_v26  ;;  %v20419_v26 = vpack.c.bf16 %v15662_v8, %v15661_v4  ;;  %v15664_v20 = vld [vmem:[%s21561_s4 + $0x378] sm:$0xff] }
 0x999   :  { %v15819_v8 = vld [vmem:[%s21562_s5 + $0x1e] ss:$0 sm:$0xff] }
 0x99a   :  { %v7617_v10 = vadd.f32 %v15638_v28, %v7609_v21  ;;  %v20443_v21 = vpack.c.bf16 %v15664_v20, %v15663_v24 }
 0x99c   :  { %v7619_v23 = vadd.f32 %v7617_v10, %v19733_v18  ;;  %v15649_v18 = vld [vmem:[%s21561_s4 + $0x300] sm:$0xff] }
 0x99d   :  { %v20310_v39 = vpack.c.bf16 %v15650_v38, %v15649_v18  ;;  %v15689_v18 = vld [vmem:[%s21561_s4 + $0x440] sm:$0xff]  ;;  %v15690_v38 = vld [vmem:[%s21561_s4 + $0x448] sm:$0xff] }
 0x99e   :  { %17409 = vmatprep.mubr.msk.f32.mxu0 %vm193_vm1, %v7619_v23  ;;  %v15669_v23 = vld [vmem:[%s21561_s4 + $0x3a0] sm:$0xff] }
 0x9ac   :  { %v7455_v25 = vpop.f32.mrb[90].mxu1 }
 0x9ad   :  { %v7382_v27 = vpop.f32.mrb[94].mxu0  ;;  %v17390_v29 = vpop.f32.mrb[91].mxu1 }
 0x9ae   :  { %v7606_v17 = vadd.f32 %v7455_v25, %v7382_v27  ;;  %v17385_v37 = vpop.f32.mrb[95].mxu0  ;;  %v15670_v25 = vld [vmem:[%s21561_s4 + $0x3a8] sm:$0xff]  ;;  %v15681_v27 = vld [vmem:[%s21561_s4 + $0x400] sm:$0xff] }
 0x9af   :  { %v15682_v29 = vld [vmem:[%s21561_s4 + $0x408] sm:$0xff] }
 0x9b0   :  { %v20469_v37 = vpack.c.bf16 %v15682_v29, %v15681_v27 }
 0x9b4   :  { %v7601_v30 = vpop.f32.mrb[92].mxu1 }
 0x9b5   :  { %v7528_v31 = vpop.f32.mrb[96].mxu0  ;;  %v17400_v32 = vpop.f32.mrb[93].mxu1 }
 0x9b6   :  { %v7608_v33 = vadd.f32 %v7606_v17, %v7528_v31  ;;  %v17395_v41 = vpop.f32.mrb[97].mxu0  ;;  %v20467_v17 = vpack.c.bf16 %v15670_v25, %v15669_v23  ;;  %v15672_v31 = vld [vmem:[%s21561_s4 + $0x3b8] sm:$0xff]  ;;  %v15683_v32 = vld [vmem:[%s21561_s4 + $0x410] sm:$0xff] }
 0x9b7   :  { %v15814_v23 = vld [vmem:[%s21562_s5 + $0x19] ss:$0 sm:$0xff] }
 0x9b8   :  { %v7610_v34 = vadd.f32 %v7608_v33, %v7601_v30  ;;  %v15671_v30 = vld [vmem:[%s21561_s4 + $0x3b0] sm:$0xff]  ;;  %v15684_v33 = vld [vmem:[%s21561_s4 + $0x418] sm:$0xff] }
 0x9b9   :  { %v20491_v41 = vpack.c.bf16 %v15672_v31, %v15671_v30 }
 0x9ba   :  { %v7618_v40 = vadd.f32 %v15638_v28, %v7610_v34  ;;  %v15676_v28 = vld [vmem:[%s21561_s4 + $0x3d8] sm:$0xff]  ;;  %v20493_v34 = vpack.c.bf16 %v15684_v33, %v15683_v32 }
 0x9bb   :  { %v20445_v10 = vpack.c.bf16 %v15676_v28, %v15675_v14  ;;  %v15818_v28 = vld [vmem:[%s21562_s5 + $0x1d] ss:$0 sm:$0xff]  ;;  %v15816_v32 = vld [vmem:[%s21562_s5 + $0x1b] ss:$0 sm:$0xff] }
 0x9bc   :  { %v7620_v35 = vadd.f32 %v7618_v40, %v19769_v36  ;;  %v15639_v36 = vld [vmem:[%s21565_s8 + $0x3] ss:$0 sm:$0xff] }
 0x9bd   :  { %v15677_v40 = vld [vmem:[%s21561_s4 + $0x3e0] sm:$0xff] }
 0x9be   :  { %17410 = vmatmul.mubr.msk.f32.vlgmr.msra.gmra.mrb[98].mxu0 %vm193_vm1, %v7620_v35  ;;  %v15678_v35 = vld [vmem:[%s21561_s4 + $0x3e8] sm:$0xff] }
 0x9bf   :  { %17431 = vmatprep.mubr.msk.f32.mxu0 %vm19007_vm0, %v19008_v11  ;;  %18523 = vmatpush3.bf16.msra.mxu0 %v20310_v39 }
 0x9c0   :  { %18524 = vmatprep.subr.bf16.mxu0 %v19006_v3 }
 0x9c3   :  { %18526 = vmatpush3.bf16.msra.mxu0 %v20340_v56 }
 0x9c4   :  { %18527 = vmatprep.subr.bf16.mxu0 %v19006_v3 }
 0xa91   :  { %v17411_v42 = vpop.f32.mrb[98].mxu0 }
 0xa92   :  { %v7705_v43 = vadd.f32 %v17411_v42, %v15639_v36  ;;  %v7699_v44 = vpop.f32.mrb[99].mxu0  ;;  %v20517_v42 = vpack.c.bf16 %v15690_v38, %v15689_v18 }
 0xa93   :  { %v7700_v47 = vadd.f32 %v15639_v36, %v7699_v44  ;;  %v20515_v36 = vpack.c.bf16 %v15678_v35, %v15677_v40  ;;  %v15680_v44 = vld [vmem:[%s21561_s4 + $0x3f8] sm:$0xff] }
 0xa94   :  { %v7709_v51 = vmax.f32 %v7705_v43, 0.0  ;;  %v15679_v43 = vld [vmem:[%s21561_s4 + $0x3f0] sm:$0xff] }
 0xa95   :  { %v7708_v48 = vmax.f32 %v7700_v47, 0.0  ;;  %v20539_v47 = vpack.c.bf16 %v15680_v44, %v15679_v43 }
 0xa97   :  { %17420 = vmatprep.mubr.msk.f32.mxu1 %vm7716_vm3, %v7708_v48  ;;  %v20541_v48 = vpack.c.bf16 %v15692_v46, %v15691_v45 }
 0xa98   :  { %17421 = vmatmul.mubr.msk.f32.vlgmr.msra.gmra.mrb[94].mxu1 %vm7716_vm3, %v7709_v51  ;;  %v15685_v51 = vld [vmem:[%s21561_s4 + $0x420] sm:$0xff] }
 0xa99   :  { %18535 = vmatpush3.bf16.msra.mxu1 %v20323_v49  ;;  %17453 = vmatprep.mubr.msk.f32.mxu1 %vm19007_vm0, %v19008_v11  ;;  %v20557_v54 = vpack.c.bf16 %v15686_v53, %v15685_v51 }
 0xa9a   :  { %18536 = vmatprep.subr.bf16.mxu1 %v19006_v3 }
 0xa9d   :  { %18538 = vmatpush3.bf16.msra.mxu1 %v20345_v58 }
 0xa9e   :  { %18545 = vmatprep.subr.bf16.mxu1 %v19006_v3 }
 0xb6b   :  { %v20368_v0 = vpop.f32.mrb[94].mxu1 }
 0xb6c   :  { %v7801_v1 = vpop.f32.mrb[95].mxu1  ;;  %v20593_v62 = vadd.f32 %v20368_v0, %v20366_v63 }
 0xb6d   :  { %v20378_v7 = vadd.f32 %v20366_v63, %v7801_v1  ;;  %v15695_v1 = vld [vmem:[%s21561_s4 + $0x470] sm:$0xff] }
 0xb6f   :  { %17432 = vmatmul.mubr.msk.f32.vlgmr.msra.gmra.mrb[100].mxu0 %vm193_vm1, %v20378_v7  ;;  %17454 = vmatmul.mubr.msk.f32.vlgmr.msra.gmra.mrb[96].mxu1 %vm193_vm1, %v20378_v7 }
 0xb70   :  { %18529 = vmatpush3.bf16.msra.mxu0 %v20370_v2  ;;  %18547 = vmatpush3.bf16.msra.mxu1 %v20372_v5 }
 0xb71   :  { %18530 = vmatprep.subr.bf16.mxu0 %v19006_v3  ;;  %18548 = vmatprep.subr.bf16.mxu1 %v19006_v3 }
 0xb72   :  { %17442 = vmatprep.mubr.msk.f32.mxu0 %vm19007_vm0, %v19008_v11  ;;  %17475 = vmatprep.mubr.msk.f32.mxu1 %vm19007_vm0, %v19008_v11 }
 0xb74   :  { %18532 = vmatpush3.bf16.msra.mxu0 %v20395_v16  ;;  %18550 = vmatpush3.bf16.msra.mxu1 %v20397_v22 }
 0xb75   :  { %18539 = vmatprep.subr.bf16.mxu0 %v19006_v3  ;;  %18557 = vmatprep.subr.bf16.mxu1 %v19006_v3 }
 0xb77   :  { %17443 = vmatmul.mubr.msk.f32.vlgmr.msra.gmra.mrb[102].mxu0 %vm193_vm1, %v20378_v7  ;;  %17476 = vmatmul.mubr.msk.f32.vlgmr.msra.gmra.mrb[98].mxu1 %vm193_vm1, %v20378_v7 }
 0xb78   :  { %18541 = vmatpush3.bf16.msra.mxu0 %v20419_v26  ;;  %18559 = vmatpush3.bf16.msra.mxu1 %v20421_v19 }
 0xb79   :  { %18542 = vmatprep.subr.bf16.mxu0 %v19006_v3  ;;  %18560 = vmatprep.subr.bf16.mxu1 %v19006_v3 }
 0xb7a   :  { %17464 = vmatprep.mubr.msk.f32.mxu0 %vm19007_vm0, %v19008_v11  ;;  %17497 = vmatprep.mubr.msk.f32.mxu1 %vm19007_vm0, %v19008_v11 }
 0xb7c   :  { %18544 = vmatpush3.bf16.msra.mxu0 %v20443_v21  ;;  %18562 = vmatpush3.bf16.msra.mxu1 %v20445_v10 }
 0xb7d   :  { %18551 = vmatprep.subr.bf16.mxu0 %v19006_v3  ;;  %18569 = vmatprep.subr.bf16.mxu1 %v19006_v3 }
 0xb7f   :  { %17465 = vmatmul.mubr.msk.f32.vlgmr.msra.gmra.mrb[104].mxu0 %vm193_vm1, %v20378_v7  ;;  %17498 = vmatmul.mubr.msk.f32.vlgmr.msra.gmra.mrb[100].mxu1 %vm193_vm1, %v20378_v7 }
 0xb80   :  { %18553 = vmatpush3.bf16.msra.mxu0 %v20467_v17  ;;  %18571 = vmatpush3.bf16.msra.mxu1 %v20469_v37 }
 0xb81   :  { %18554 = vmatprep.subr.bf16.mxu0 %v19006_v3  ;;  %18572 = vmatprep.subr.bf16.mxu1 %v19006_v3 }
 0xb82   :  { %17486 = vmatprep.mubr.msk.f32.mxu0 %vm19007_vm0, %v19008_v11  ;;  %17519 = vmatprep.mubr.msk.f32.mxu1 %vm19007_vm0, %v19008_v11 }
 0xb84   :  { %18556 = vmatpush3.bf16.msra.mxu0 %v20491_v41  ;;  %18574 = vmatpush3.bf16.msra.mxu1 %v20493_v34 }
 0xb85   :  { %18563 = vmatprep.subr.bf16.mxu0 %v19006_v3  ;;  %18581 = vmatprep.subr.bf16.mxu1 %v19006_v3 }
 0xb87   :  { %17487 = vmatmul.mubr.msk.f32.vlgmr.msra.gmra.mrb[106].mxu0 %vm193_vm1, %v20378_v7  ;;  %17520 = vmatmul.mubr.msk.f32.vlgmr.msra.gmra.mrb[102].mxu1 %vm193_vm1, %v20378_v7 }
 0xb88   :  { %18565 = vmatpush3.bf16.msra.mxu0 %v20515_v36  ;;  %18583 = vmatpush3.bf16.msra.mxu1 %v20517_v42 }
 0xb89   :  { %18566 = vmatprep.subr.bf16.mxu0 %v19006_v3  ;;  %18584 = vmatprep.subr.bf16.mxu1 %v19006_v3 }
 0xb8a   :  { %17508 = vmatprep.mubr.msk.f32.mxu0 %vm19007_vm0, %v19008_v11  ;;  %17541 = vmatprep.mubr.msk.f32.mxu1 %vm19007_vm0, %v19008_v11 }
 0xb8c   :  { %18568 = vmatpush3.bf16.msra.mxu0 %v20539_v47  ;;  %18586 = vmatpush3.bf16.msra.mxu1 %v20541_v48 }
 0xb8d   :  { %18575 = vmatprep.subr.bf16.mxu0 %v19006_v3  ;;  %18593 = vmatprep.subr.bf16.mxu1 %v19006_v3 }
 0xb8f   :  { %17509 = vmatmul.mubr.msk.f32.vlgmr.msra.gmra.mrb[108].mxu0 %vm193_vm1, %v20378_v7  ;;  %17542 = vmatmul.mubr.msk.f32.vlgmr.msra.gmra.mrb[104].mxu1 %vm193_vm1, %v20378_v7 }
 0xb90   :  { %18577 = vmatpush3.bf16.msra.mxu0 %v20557_v54  ;;  %18595 = vmatpush3.bf16.msra.mxu1 %v20310_v39  ;;  %v20589_v39 = vpack.c.bf16 %v15694_v61, %v15693_v60 }
 0xb91   :  { %18578 = vmatprep.subr.bf16.mxu0 %v19006_v3  ;;  %18596 = vmatprep.subr.bf16.mxu1 %v19006_v3 }
 0xb92   :  { %17530 = vmatprep.mubr.msk.f32.mxu0 %vm19007_vm0, %v19008_v11  ;;  %17563 = vmatprep.mubr.msk.f32.mxu1 %vm19007_vm0, %v19008_v11 }
 0xb94   :  { %18580 = vmatpush3.bf16.msra.mxu0 %v20573_v59  ;;  %18598 = vmatpush3.bf16.msra.mxu1 %v20340_v56  ;;  %v20609_v56 = vpack.c.bf16 %v15696_v6, %v15695_v1 }
 0xb95   :  { %18587 = vmatprep.subr.bf16.mxu0 %v19006_v3  ;;  %18605 = vmatprep.subr.bf16.mxu1 %v19006_v3 }
 0xb97   :  { %17531 = vmatmul.mubr.msk.f32.vlgmr.msra.gmra.mrb[110].mxu0 %vm193_vm1, %v20378_v7  ;;  %17564 = vmatmul.mubr.msk.f32.vlgmr.msra.gmra.mrb[106].mxu1 %vm193_vm1, %v20593_v62 }
 0xb98   :  { %18589 = vmatpush3.bf16.msra.mxu0 %v20589_v39  ;;  %18607 = vmatpush3.bf16.msra.mxu1 %v20323_v49 }
 0xb99   :  { %18590 = vmatprep.subr.bf16.mxu0 %v19006_v3  ;;  %18608 = vmatprep.subr.bf16.mxu1 %v19006_v3 }
 0xb9a   :  { %17552 = vmatprep.mubr.msk.f32.mxu0 %vm19007_vm0, %v19008_v11  ;;  %17585 = vmatprep.mubr.msk.f32.mxu1 %vm19007_vm0, %v19008_v11 }
 0xb9c   :  { %18592 = vmatpush3.bf16.msra.mxu0 %v20609_v56  ;;  %18610 = vmatpush3.bf16.msra.mxu1 %v20345_v58 }
 0xb9d   :  { %18599 = vmatprep.subr.bf16.mxu0 %v19006_v3  ;;  %18617 = vmatprep.subr.bf16.mxu1 %v19006_v3 }
 0xb9f   :  { %17553 = vmatmul.mubr.msk.f32.vlgmr.msra.gmra.mrb[112].mxu0 %vm193_vm1, %v20378_v7  ;;  %17586 = vmatmul.mubr.msk.f32.vlgmr.msra.gmra.mrb[108].mxu1 %vm193_vm1, %v20593_v62 }
 0xba0   :  { %18601 = vmatpush3.bf16.msra.mxu0 %v20370_v2  ;;  %18619 = vmatpush3.bf16.msra.mxu1 %v20372_v5  ;;  %v15817_v2 = vld [vmem:[%s21562_s5 + $0x1c] ss:$0 sm:$0xff] }
 0xba1   :  { %18602 = vmatprep.subr.bf16.mxu0 %v19006_v3  ;;  %18620 = vmatprep.subr.bf16.mxu1 %v19006_v3 }
 0xba2   :  { %17574 = vmatprep.mubr.msk.f32.mxu0 %vm19007_vm0, %v19008_v11  ;;  %17607 = vmatprep.mubr.msk.f32.mxu1 %vm19007_vm0, %v19008_v11 }
 0xba4   :  { %18604 = vmatpush3.bf16.msra.mxu0 %v20395_v16  ;;  %18622 = vmatpush3.bf16.msra.mxu1 %v20397_v22 }
 0xba5   :  { %18611 = vmatprep.subr.bf16.mxu0 %v19006_v3  ;;  %18629 = vmatprep.subr.bf16.mxu1 %v19006_v3 }
 0xba7   :  { %17575 = vmatmul.mubr.msk.f32.vlgmr.msra.gmra.mrb[114].mxu0 %vm193_vm1, %v20593_v62  ;;  %17608 = vmatmul.mubr.msk.f32.vlgmr.msra.gmra.mrb[110].mxu1 %vm193_vm1, %v20593_v62 }
 0xba8   :  { %18613 = vmatpush3.bf16.msra.mxu0 %v20419_v26  ;;  %18631 = vmatpush3.bf16.msra.mxu1 %v20421_v19  ;;  %v15815_v26 = vld [vmem:[%s21562_s5 + $0x1a] ss:$0 sm:$0xff] }
 0xba9   :  { %18614 = vmatprep.subr.bf16.mxu0 %v19006_v3  ;;  %18632 = vmatprep.subr.bf16.mxu1 %v19006_v3 }
 0xbaa   :  { %17596 = vmatprep.mubr.msk.f32.mxu0 %vm19007_vm0, %v19008_v11  ;;  %17629 = vmatprep.mubr.msk.f32.mxu1 %vm19007_vm0, %v19008_v11 }
 0xbac   :  { %18616 = vmatpush3.bf16.msra.mxu0 %v20443_v21  ;;  %18634 = vmatpush3.bf16.msra.mxu1 %v20445_v10 }
 0xbad   :  { %18623 = vmatprep.subr.bf16.mxu0 %v19006_v3  ;;  %18641 = vmatprep.subr.bf16.mxu1 %v19006_v3 }
 0xbaf   :  { %17597 = vmatmul.mubr.msk.f32.vlgmr.msra.gmra.mrb[116].mxu0 %vm193_vm1, %v20593_v62  ;;  %17630 = vmatmul.mubr.msk.f32.vlgmr.msra.gmra.mrb[112].mxu1 %vm193_vm1, %v20593_v62 }
 0xbb0   :  { %18625 = vmatpush3.bf16.msra.mxu0 %v20467_v17  ;;  %18643 = vmatpush3.bf16.msra.mxu1 %v20469_v37  ;;  %v15820_v37 = vld [vmem:[%s21562_s5 + $0x1f] ss:$0 sm:$0xff] }
 0xbb1   :  { %18626 = vmatprep.subr.bf16.mxu0 %v19006_v3  ;;  %18644 = vmatprep.subr.bf16.mxu1 %v19006_v3 }
 0xbb2   :  { %17618 = vmatprep.mubr.msk.f32.mxu0 %vm19007_vm0, %v19008_v11  ;;  %17651 = vmatprep.mubr.msk.f32.mxu1 %vm19007_vm0, %v19008_v11 }
 0xbb4   :  { %18628 = vmatpush3.bf16.msra.mxu0 %v20491_v41  ;;  %18646 = vmatpush3.bf16.msra.mxu1 %v20493_v34 }
 0xbb5   :  { %18635 = vmatprep.subr.bf16.mxu0 %v19006_v3  ;;  %18653 = vmatprep.subr.bf16.mxu1 %v19006_v3 }
 0xbb7   :  { %17619 = vmatmul.mubr.msk.f32.vlgmr.msra.gmra.mrb[118].mxu0 %vm193_vm1, %v20593_v62  ;;  %17652 = vmatmul.mubr.msk.f32.vlgmr.msra.gmra.mrb[114].mxu1 %vm193_vm1, %v20593_v62 }
 0xbb8   :  { %18637 = vmatpush3.bf16.msra.mxu0 %v20515_v36  ;;  %18655 = vmatpush3.bf16.msra.mxu1 %v20517_v42 }
 0xbb9   :  { %18638 = vmatprep.subr.bf16.mxu0 %v19006_v3  ;;  %18656 = vmatprep.subr.bf16.mxu1 %v19006_v3 }
 0xbba   :  { %17640 = vmatprep.mubr.msk.f32.mxu0 %vm19007_vm0, %v19008_v11  ;;  %17673 = vmatprep.mubr.msk.f32.mxu1 %vm19007_vm0, %v19008_v11 }
 0xbbc   :  { %18640 = vmatpush3.bf16.msra.mxu0 %v20539_v47  ;;  %18658 = vmatpush3.bf16.msra.mxu1 %v20541_v48 }
 0xbbd   :  { %18647 = vmatprep.subr.bf16.mxu0 %v19006_v3  ;;  %17687 = vmatprep.subr.mxu1 %v19008_v11 }
 0xbbf   :  { %17641 = vmatmul.mubr.msk.f32.vlgmr.msra.gmra.mrb[120].mxu0 %vm193_vm1, %v20593_v62  ;;  %17674 = vmatmul.mubr.msk.f32.vlgmr.msra.gmra.mrb[116].mxu1 %vm193_vm1, %v20593_v62 }
 0xbc0   :  { %18649 = vmatpush3.bf16.msra.mxu0 %v20557_v54  ;;  %17662 = vmatprep.mubr.msk.f32.mxu0 %vm19007_vm0, %v19008_v11 }
 0xbc1   :  { %18650 = vmatprep.subr.bf16.mxu0 %v19006_v3  ;;  %17689 = vmatprep.mubr.msk.f32.mxu1 %vm19007_vm0, %v19008_v11 }
 0xbc4   :  { %18652 = vmatpush3.bf16.msra.mxu0 %v20573_v59 }
 0xbc5   :  { %18659 = vmatprep.subr.bf16.mxu0 %v19006_v3 }
 0xbc7   :  { %17663 = vmatmul.mubr.msk.f32.vlgmr.msra.gmra.mrb[122].mxu0 %vm193_vm1, %v20593_v62 }
 0xbc8   :  { %18661 = vmatpush3.bf16.msra.mxu0 %v20589_v39  ;;  %17684 = vmatprep.mubr.msk.f32.mxu0 %vm19007_vm0, %v19008_v11  ;;  %v15821_v39 = vld [vmem:[%s21562_s5 + $0x20] ss:$0 sm:$0xff] }
 0xbc9   :  { %18662 = vmatprep.subr.bf16.mxu0 %v19006_v3 }
 0xbcc   :  { %18664 = vmatpush3.bf16.msra.mxu0 %v20609_v56 }
 0xbcd   :  { %17697 = vmatprep.subr.mxu0 %v19008_v11 }
 0xbcf   :  { %17685 = vmatmul.mubr.msk.f32.vlgmr.msra.gmra.mrb[124].mxu0 %vm193_vm1, %v20593_v62 }
 0xbd0   :  { %17699 = vmatprep.mubr.msk.f32.mxu0 %vm19007_vm0, %v19008_v11 }
 0xc42   :  { %v8024_v49 = vpop.f32.mrb[100].mxu0  ;;  %v8164_v58 = vpop.f32.mrb[96].mxu1 }
 0xc43   :  { %v17433_v63 = vpop.f32.mrb[101].mxu0  ;;  %v17455_v0 = vpop.f32.mrb[97].mxu1  ;;  %v9713_v4 = vadd.f32 %v15813_v9, %v8024_v49  ;;  %v9715_v14 = vadd.f32 %v15815_v26, %v8164_v58 }
 0xc4a   :  { %v8094_v5 = vpop.f32.mrb[102].mxu0  ;;  %v8304_v50 = vpop.f32.mrb[98].mxu1 }
 0xc4b   :  { %v9717_v15 = vadd.f32 %v15817_v2, %v8304_v50  ;;  %v17444_v16 = vpop.f32.mrb[103].mxu0  ;;  %v17477_v22 = vpop.f32.mrb[99].mxu1  ;;  %v9714_v17 = vadd.f32 %v15814_v23, %v8094_v5 }
 0xc4d   :  { %17688 = vmatpush3.xpose.msk.msra.mxu1 %vm2024_vm2, %v9717_v15 }
 0xc4e   :  { %17692 = vmatprep.subr.mxu1 %v19008_v11 }
 0xc50   :  { %17690 = vmatmul.mubr.msk.f32.vlgmr.msra.gmra.mrb[118].mxu1 %vm2024_vm2, %v9713_v4  ;;  %v15822_v4 = vld [vmem:[%s21562_s5 + $0x21] ss:$0 sm:$0xff] }
 0xc51   :  { %17694 = vmatprep.mubr.msk.f32.mxu1 %vm19007_vm0, %v19008_v11 }
 0xc52   :  { %v8234_v13 = vpop.f32.mrb[104].mxu0  ;;  %v8444_v12 = vpop.f32.mrb[100].mxu1 }
 0xc53   :  { %v9719_v19 = vadd.f32 %v15819_v8, %v8444_v12  ;;  %v17466_v24 = vpop.f32.mrb[105].mxu0  ;;  %v17499_v20 = vpop.f32.mrb[101].mxu1  ;;  %v9716_v40 = vadd.f32 %v15816_v32, %v8234_v13 }
 0xc55   :  { %17698 = vmatpush3.xpose.msk.msra.mxu0 %vm2024_vm2, %v9719_v19 }
 0xc56   :  { %17707 = vmatprep.subr.mxu0 %v19008_v11 }
 0xc58   :  { %17700 = vmatmul.mubr.msk.f32.vlgmr.msra.gmra.mrb[126].mxu0 %vm2024_vm2, %v9715_v14 }
 0xc59   :  { %17709 = vmatprep.mubr.msk.f32.mxu0 %vm19007_vm0, %v19008_v11 }
 0xc5a   :  { %v8374_v21 = vpop.f32.mrb[106].mxu0  ;;  %v8584_v10 = vpop.f32.mrb[102].mxu1 }
 0xc5b   :  { %v9718_v25 = vadd.f32 %v15818_v28, %v8374_v21  ;;  %v17488_v27 = vpop.f32.mrb[107].mxu0  ;;  %v17521_v29 = vpop.f32.mrb[103].mxu1  ;;  %v9721_v6 = vadd.f32 %v15821_v39, %v8584_v10 }
 0xc5c   :  { %v18965_v27 = vld [vmem:[%s21559_s2 + $0x2] ss:$0 sm:$0xff] }
 0xc5d   :  { %17693 = vmatpush3.xpose.msk.msra.mxu1 %vm2024_vm2, %v9718_v25 }
 0xc5e   :  { %17702 = vmatprep.subr.mxu1 %v19008_v11 }
 0xc60   :  { %17695 = vmatmul.mubr.msk.f32.vlgmr.msra.gmra.mrb[120].mxu1 %vm2024_vm2, %v9714_v17 }
 0xc61   :  { %17704 = vmatprep.mubr.msk.f32.mxu1 %vm19007_vm0, %v19008_v11 }
 0xc62   :  { %v8514_v30 = vpop.f32.mrb[108].mxu0  ;;  %v20745_v31 = vpop.f32.mrb[104].mxu1 }
 0xc63   :  { %v9720_v33 = vadd.f32 %v15820_v37, %v8514_v30  ;;  %v17510_v41 = vpop.f32.mrb[109].mxu0  ;;  %v17543_v34 = vpop.f32.mrb[105].mxu1 }
 0xc65   :  { %17703 = vmatpush3.xpose.msk.msra.mxu1 %vm2024_vm2, %v9720_v33 }
 0xc66   :  { %17712 = vmatprep.subr.mxu1 %v19008_v11 }
 0xc68   :  { %17705 = vmatmul.mubr.msk.f32.vlgmr.msra.gmra.mrb[122].mxu1 %vm2024_vm2, %v9716_v40 }
 0xc69   :  { %17714 = vmatprep.mubr.msk.f32.mxu1 %vm19007_vm0, %v19008_v11 }
 0xc6a   :  { %v8654_v35 = vpop.f32.mrb[110].mxu0  ;;  %v8867_v18 = vpop.f32.mrb[106].mxu1 }
 0xc6b   :  { %v17532_v38 = vpop.f32.mrb[111].mxu0  ;;  %v17565_v36 = vpop.f32.mrb[107].mxu1  ;;  %v9725_v54 = vadd.f32 %v15813_v9, %v8867_v18  ;;  %v9722_v13 = vadd.f32 %v15822_v4, %v8654_v35  ;;  %v18967_v35 = vld [vmem:[%s21559_s2 + $0x3] ss:$0 sm:$0xff] }
 0xc72   :  { %v20755_v42 = vpop.f32.mrb[112].mxu0  ;;  %v9007_v43 = vpop.f32.mrb[108].mxu1 }
 0xc73   :  { %v17554_v44 = vpop.f32.mrb[113].mxu0  ;;  %v17587_v45 = vpop.f32.mrb[109].mxu1  ;;  %v9727_v1 = vadd.f32 %v15815_v26, %v9007_v43 }
 0xc74   :  { %v18968_v44 = vld [vmem:[%s21559_s2 + $0x4] ss:$0 sm:$0xff] }
 0xc7a   :  { %v8937_v46 = vpop.f32.mrb[114].mxu0  ;;  %v9147_v47 = vpop.f32.mrb[110].mxu1 }
 0xc7b   :  { %v9729_v48 = vadd.f32 %v15817_v2, %v9147_v47  ;;  %v17576_v51 = vpop.f32.mrb[115].mxu0  ;;  %v17609_v53 = vpop.f32.mrb[111].mxu1  ;;  %v9726_v5 = vadd.f32 %v15814_v23, %v8937_v46 }
 0xc7c   :  { %v18969_v51 = vld [vmem:[%s21559_s2 + $0x6] ss:$0 sm:$0xff] }
 0xc7d   :  { %17708 = vmatpush3.xpose.msk.msra.mxu0 %vm2024_vm2, %v9729_v48 }
 0xc7e   :  { %17717 = vmatprep.subr.mxu0 %v19008_v11 }
 0xc80   :  { %17710 = vmatmul.mubr.msk.f32.vlgmr.msra.gmra.mrb[128].mxu0 %vm2024_vm2, %v9725_v54 }
 0xc81   :  { %17719 = vmatprep.mubr.msk.f32.mxu0 %vm19007_vm0, %v19008_v11 }
 0xc82   :  { %v9077_v55 = vpop.f32.mrb[116].mxu0  ;;  %v9287_v57 = vpop.f32.mrb[112].mxu1 }
 0xc83   :  { %v9731_v59 = vadd.f32 %v15819_v8, %v9287_v57  ;;  %v17598_v60 = vpop.f32.mrb[117].mxu0  ;;  %v17631_v61 = vpop.f32.mrb[113].mxu1  ;;  %v9728_v8 = vadd.f32 %v15816_v32, %v9077_v55  ;;  %v18966_v32 = vld [vmem:[%s21559_s2 + $0x1] ss:$0 sm:$0xff] }
 0xc85   :  { %17718 = vmatpush3.xpose.msk.msra.mxu0 %vm2024_vm2, %v9731_v59  ;;  %v18970_v59 = vld [vmem:[%s21559_s2 + $0x5] ss:$0 sm:$0xff] }
 0xc86   :  { %17727 = vmatprep.subr.mxu0 %v19008_v11 }
 0xc88   :  { %17720 = vmatmul.mubr.msk.f32.vlgmr.msra.gmra.mrb[130].mxu0 %vm2024_vm2, %v9727_v1 }
 0xc89   :  { %17728 = vmatpush3.msra.mxu0 %v9721_v6  ;;  %17729 = vmatprep.mubr.msk.f32.mxu0 %vm19007_vm0, %v19008_v11  ;;  %v18971_v6 = vld [vmem:[%s21559_s2 + $0x7] ss:$0 sm:$0xff] }
 0xc8a   :  { %v9217_v56 = vpop.f32.mrb[118].mxu0  ;;  %v9427_v49 = vpop.f32.mrb[114].mxu1  ;;  %17737 = vmatprep.subr.mxu0 %v19008_v11 }
 0xc8b   :  { %v9730_v58 = vadd.f32 %v15818_v28, %v9217_v56  ;;  %v20771_v63 = vadd.f32 %v15821_v39, %v9427_v49  ;;  %v17620_v0 = vpop.f32.mrb[119].mxu0  ;;  %v17653_v2 = vpop.f32.mrb[115].mxu1  ;;  %v18964_v28 = vld [vmem:[%s21559_s2] ss:$0 sm:$0xff] }
 0xc8d   :  { %17713 = vmatpush3.xpose.msk.msra.mxu1 %vm2024_vm2, %v9730_v58 }
 0xc8e   :  { %17722 = vmatprep.subr.mxu1 %v19008_v11 }
 0xc90   :  { %17715 = vmatmul.mubr.msk.f32.vlgmr.msra.gmra.mrb[124].mxu1 %vm2024_vm2, %v9726_v5 }
 0xc91   :  { %17724 = vmatprep.mubr.msk.f32.mxu1 %vm19007_vm0, %v19008_v11 }
 0xc92   :  { %v9357_v50 = vpop.f32.mrb[120].mxu0  ;;  %v20778_v9 = vpop.f32.mrb[116].mxu1 }
 0xc93   :  { %v9732_v15 = vadd.f32 %v15820_v37, %v9357_v50  ;;  %v17642_v16 = vpop.f32.mrb[121].mxu0  ;;  %v17675_v22 = vpop.f32.mrb[117].mxu1 }
 0xc95   :  { %17723 = vmatpush3.xpose.msk.msra.mxu1 %vm2024_vm2, %v9732_v15 }
 0xc96   :  { %17732 = vmatprep.subr.mxu1 %v19008_v11 }
 0xc98   :  { %17725 = vmatmul.mubr.msk.f32.vlgmr.msra.gmra.mrb[126].mxu1 %vm2024_vm2, %v9728_v8 }
 0xc99   :  { %17733 = vmatpush3.msra.mxu1 %v9722_v13  ;;  %17734 = vmatprep.mubr.msk.f32.mxu1 %vm19007_vm0, %v19008_v11 }
 0xc9a   :  { %v9497_v12 = vpop.f32.mrb[122].mxu0  ;;  %17742 = vmatprep.subr.mxu1 %v19008_v11 }
 0xc9b   :  { %v20789_v26 = vadd.f32 %v15822_v4, %v9497_v12  ;;  %v17664_v19 = vpop.f32.mrb[123].mxu0 }
 0xca2   :  { %v20791_v24 = vpop.f32.mrb[124].mxu0 }
 0xca3   :  { %v17686_v20 = vpop.f32.mrb[125].mxu0 }
 0xd23   :  { %v9809_v14 = vpop.f32.mrb[118].mxu1 }
 0xd24   :  { %v9810_v21 = vadd.f32 %v18964_v28, %v9809_v14  ;;  %v17691_v10 = vpop.f32.mrb[119].mxu1 }
 0xd26   :  { %v10345_v23 = vsel %vm2024_vm2, %v9810_v21, -inf }
 0xd27   :  { %10346 = vmax.xlane.f32.xlu0 %v10345_v23 }
 0xd2b   :  { %v9961_v25 = vpop.f32.mrb[126].mxu0 }
 0xd2c   :  { %v9962_v29 = vadd.f32 %v18965_v27, %v9961_v25  ;;  %v17701_v17 = vpop.f32.mrb[127].mxu0 }
 0xd2e   :  { %v10351_v37 = vsel %vm2024_vm2, %v9962_v29, -inf }
 0xd2f   :  { %10352 = vmax.xlane.f32.xlu0 %v10351_v37 }
 0xd33   :  { %v9885_v30 = vpop.f32.mrb[120].mxu1 }
 0xd34   :  { %v9886_v33 = vadd.f32 %v18966_v32, %v9885_v30  ;;  %v17696_v41 = vpop.f32.mrb[121].mxu1 }
 0xd36   :  { %v10348_v34 = vsel %vm2024_vm2, %v9886_v33, -inf }
 0xd37   :  { %10349 = vmax.xlane.f32.xlu1 %v10348_v34 }
 0xd3b   :  { %v10037_v40 = vpop.f32.mrb[122].mxu1 }
 0xd3c   :  { %v10038_v18 = vadd.f32 %v18967_v35, %v10037_v40  ;;  %v17706_v38 = vpop.f32.mrb[123].mxu1 }
 0xd3e   :  { %v10354_v36 = vsel %vm2024_vm2, %v10038_v18, -inf }
 0xd3f   :  { %10355 = vmax.xlane.f32.xlu1 %v10354_v36 }
 0xd53   :  { %v10113_v43 = vpop.f32.mrb[128].mxu0 }
 0xd54   :  { %v10114_v45 = vadd.f32 %v18968_v44, %v10113_v43  ;;  %v17711_v46 = vpop.f32.mrb[129].mxu0 }
 0xd56   :  { %v10357_v47 = vsel %vm2024_vm2, %v10114_v45, -inf }
 0xd57   :  { %10358 = vmax.xlane.f32.xlu0 %v10357_v47 }
 0xd5b   :  { %v10265_v48 = vpop.f32.mrb[130].mxu0 }
 0xd5c   :  { %v10266_v53 = vadd.f32 %v18969_v51, %v10265_v48  ;;  %v17721_v54 = vpop.f32.mrb[131].mxu0 }
 0xd5e   :  { %v10363_v55 = vsel %vm2024_vm2, %v10266_v53, -inf }
 0xd5f   :  { %10364 = vmax.xlane.f32.xlu0 %v10363_v55  ;;  %v15823_v55 = vld [vmem:[%s21562_s5 + $0x22] ss:$0 sm:$0xff] }
 0xd63   :  { %v10189_v57 = vpop.f32.mrb[124].mxu1 }
 0xd64   :  { %v10190_v60 = vadd.f32 %v18970_v59, %v10189_v57  ;;  %v17716_v61 = vpop.f32.mrb[125].mxu1 }
 0xd66   :  { %v10360_v39 = vsel %vm2024_vm2, %v10190_v60, -inf }
 0xd67   :  { %10361 = vmax.xlane.f32.xlu1 %v10360_v39 }
 0xd6b   :  { %v10341_v1 = vpop.f32.mrb[126].mxu1 }
 0xd6c   :  { %v10342_v56 = vadd.f32 %v18971_v6, %v10341_v1  ;;  %v17726_v49 = vpop.f32.mrb[127].mxu1  ;;  %v15824_v6 = vld [vmem:[%s21562_s5 + $0x23] ss:$0 sm:$0xff] }
 0xd6e   :  { %v10366_v58 = vsel %vm2024_vm2, %v10342_v56, -inf }
 0xd6f   :  { %10367 = vmax.xlane.f32.xlu1 %v10366_v58  ;;  %v9724_v58 = vadd.f32 %v15824_v6, %v20755_v42 }
 0xdb4   :  { %v10347_v0 = vpop.xlane.xlu0 %10346 }
 0xdb5   :  { %v10369_v2 = vsub.f32 %v9810_v21, %v10347_v0 }
 0xdb7   :  { %v10377_v5 = vmul.f32 1.442695, %v10369_v2 }
 0xdb9   :  { %18899 = vpow2.f32 %v10377_v5 }
 0xdbc   :  { %v10353_v50 = vpop.xlane.xlu0 %10352 }
 0xdbd   :  { %v10371_v15 = vsub.f32 %v9962_v29, %v10353_v50 }
 0xdbf   :  { %v10381_v16 = vmul.f32 1.442695, %v10371_v15  ;;  %v9735_v15 = vadd.f32 %v15823_v55, %v20778_v9 }
 0xdc1   :  { %18901 = vpow2.f32 %v10381_v16 }
 0xdc3   :  { %v18900_v22 = vpop.eup %18899 }
 0xdc4   :  { %v10350_v4 = vpop.xlane.xlu1 %10349  ;;  %v10393_v8 = vsel %vm2024_vm2, %v18900_v22, 0.0 }
 0xdc5   :  { %v10370_v13 = vsub.f32 %v9886_v33, %v10350_v4  ;;  %10394 = vadd.xlane.f32.xlu0 %v10393_v8 }
 0xdc7   :  { %v10379_v12 = vmul.f32 1.442695, %v10370_v13  ;;  %v9736_v13 = vadd.f32 %v15824_v6, %v20791_v24  ;;  %v15769_v24 = vld [vmem:[%s21563_s6 + $0x40] sm:$0xff] }
 0xdc9   :  { %18903 = vpow2.f32 %v10379_v12 }
 0xdcb   :  { %v18902_v19 = vpop.eup %18901 }
 0xdcc   :  { %v10356_v20 = vpop.xlane.xlu1 %10355  ;;  %v10399_v14 = vsel %vm2024_vm2, %v18902_v19, 0.0 }
 0xdcd   :  { %v10372_v28 = vsub.f32 %v10038_v18, %v10356_v20  ;;  %10400 = vadd.xlane.f32.xlu0 %v10399_v14  ;;  %v15770_v20 = vld [vmem:[%s21563_s6 + $0x48] sm:$0xff]  ;;  %v15771_v14 = vld [vmem:[%s21563_s6 + $0x50] sm:$0xff] }
 0xdcf   :  { %v10383_v21 = vmul.f32 1.442695, %v10372_v28 }
 0xdd1   :  { %18905 = vpow2.f32 %v10383_v21 }
 0xdd3   :  { %v18904_v10 = vpop.eup %18903 }
 0xdd4   :  { %v10396_v23 = vsel %vm2024_vm2, %v18904_v10, 0.0 }
 0xdd5   :  { %10397 = vadd.xlane.f32.xlu1 %v10396_v23 }
 0xddb   :  { %v18906_v25 = vpop.eup %18905 }
 0xddc   :  { %v10402_v27 = vsel %vm2024_vm2, %v18906_v25, 0.0 }
 0xddd   :  { %10403 = vadd.xlane.f32.xlu1 %v10402_v27 }
 0xde4   :  { %v10359_v29 = vpop.xlane.xlu0 %10358 }
 0xde5   :  { %v10373_v17 = vsub.f32 %v10114_v45, %v10359_v29 }
 0xde7   :  { %v10385_v37 = vmul.f32 1.442695, %v10373_v17 }
 0xde9   :  { %18907 = vpow2.f32 %v10385_v37 }
 0xdec   :  { %v10365_v30 = vpop.xlane.xlu0 %10364 }
 0xded   :  { %v10375_v32 = vsub.f32 %v10266_v53, %v10365_v30 }
 0xdef   :  { %v10389_v33 = vmul.f32 1.442695, %v10375_v32 }
 0xdf1   :  { %18909 = vpow2.f32 %v10389_v33 }
 0xdf3   :  { %v18908_v41 = vpop.eup %18907 }
 0xdf4   :  { %v10362_v34 = vpop.xlane.xlu1 %10361  ;;  %v10405_v40 = vsel %vm2024_vm2, %v18908_v41, 0.0 }
 0xdf5   :  { %v10374_v35 = vsub.f32 %v10190_v60, %v10362_v34  ;;  %10406 = vadd.xlane.f32.xlu0 %v10405_v40  ;;  %v9723_v60 = vadd.f32 %v15823_v55, %v20745_v31 }
 0xdf7   :  { %v10387_v18 = vmul.f32 1.442695, %v10374_v35 }
 0xdf9   :  { %18911 = vpow2.f32 %v10387_v18 }
 0xdfb   :  { %v20830_v38 = vpop.eup %18909 }
 0xdfc   :  { %v10368_v36 = vpop.xlane.xlu1 %10367  ;;  %v10411_v43 = vsel %vm2024_vm2, %v20830_v38, 0.0 }
 0xdfd   :  { %v10376_v44 = vsub.f32 %v10342_v56, %v10368_v36  ;;  %10412 = vadd.xlane.f32.xlu0 %v10411_v43  ;;  %v15698_v36 = vld [vmem:[%s21561_s4 + $0x488] sm:$0xff]  ;;  %v15701_v43 = vld [vmem:[%s21561_s4 + $0x4a0] sm:$0xff] }
 0xdff   :  { %v10391_v45 = vmul.f32 1.442695, %v10376_v44 }
 0xe01   :  { %18913 = vpow2.f32 %v10391_v45  ;;  %v15702_v45 = vld [vmem:[%s21561_s4 + $0x4a8] sm:$0xff] }
 0xe03   :  { %v18912_v46 = vpop.eup %18911 }
 0xe04   :  { %v10408_v47 = vsel %vm2024_vm2, %v18912_v46, 0.0 }
 0xe05   :  { %10409 = vadd.xlane.f32.xlu1 %v10408_v47  ;;  %v15699_v47 = vld [vmem:[%s21561_s4 + $0x490] sm:$0xff] }
 0xe0b   :  { %v20835_v48 = vpop.eup %18913 }
 0xe0c   :  { %v10414_v51 = vsel %vm2024_vm2, %v20835_v48, 0.0 }
 0xe0d   :  { %10415 = vadd.xlane.f32.xlu1 %v10414_v51  ;;  %v15703_v51 = vld [vmem:[%s21561_s4 + $0x4b0] sm:$0xff] }
 0xe52   :  { %v10395_v53 = vpop.xlane.xlu0 %10394 }
 0xe53   :  { %18915 = vrcp.f32 %v10395_v53 }
 0xe5a   :  { %v10401_v54 = vpop.xlane.xlu0 %10400 }
 0xe5b   :  { %18917 = vrcp.f32 %v10401_v54  ;;  %v15704_v54 = vld [vmem:[%s21561_s4 + $0x4b8] sm:$0xff] }
 0xe5c   :  { %v18675_v55 = vpack.c.bf16 %v15704_v54, %v15703_v51  ;;  %v15723_v51 = vld [vmem:[%s21561_s4 + $0x550] sm:$0xff] }
 0xe5d   :  { %v18916_v57 = vpop.eup %18915  ;;  %v15727_v54 = vld [vmem:[%s21561_s4 + $0x570] sm:$0xff] }
 0xe5e   :  { %v10425_v59 = vmul.f32 %v18916_v57, %v18900_v22 }
 0xe60   :  { %17730 = vmatmul.mubr.msk.f32.vlgmr.msra.gmra.mrb[132].mxu0 %vm2024_vm2, %v10425_v59 }
 0xe61   :  { %17738 = vmatpush3.msra.mxu0 %v9723_v60  ;;  %17739 = vmatprep.mubr.msk.f32.mxu0 %vm19007_vm0, %v19008_v11 }
 0xe62   :  { %v10398_v61 = vpop.xlane.xlu1 %10397  ;;  %17747 = vmatprep.subr.mxu0 %v19008_v11 }
 0xe63   :  { %18919 = vrcp.f32 %v10398_v61 }
 0xe65   :  { %v18918_v39 = vpop.eup %18917 }
 0xe66   :  { %v10427_v1 = vmul.f32 %v18918_v39, %v18902_v19 }
 0xe68   :  { %17740 = vmatmul.mubr.msk.f32.vlgmr.msra.gmra.mrb[134].mxu0 %vm2024_vm2, %v10427_v1 }
 0xe69   :  { %17748 = vmatpush3.msra.mxu0 %v20771_v63  ;;  %17749 = vmatprep.mubr.msk.f32.mxu0 %vm19007_vm0, %v19008_v11 }
 0xe6a   :  { %v10404_v31 = vpop.xlane.xlu1 %10403  ;;  %17757 = vmatprep.subr.mxu0 %v19008_v11 }
 0xe6b   :  { %18921 = vrcp.f32 %v10404_v31 }
 0xe6d   :  { %v18920_v56 = vpop.eup %18919 }
 0xe6e   :  { %v10426_v49 = vmul.f32 %v18920_v56, %v18904_v10  ;;  %v15857_v56 = vld [vmem:[%s21565_s8 + $0x4] ss:$0 sm:$0xff] }
 0xe70   :  { %17735 = vmatmul.mubr.msk.f32.vlgmr.msra.gmra.mrb[128].mxu1 %vm2024_vm2, %v10426_v49 }
 0xe71   :  { %17743 = vmatpush3.msra.mxu1 %v9724_v58  ;;  %17744 = vmatprep.mubr.msk.f32.mxu1 %vm19007_vm0, %v19008_v11  ;;  %v15705_v58 = vld [vmem:[%s21561_s4 + $0x4c0] sm:$0xff] }
 0xe72   :  { %17752 = vmatprep.subr.mxu1 %v19008_v11 }
 0xe75   :  { %v18922_v63 = vpop.eup %18921 }
 0xe76   :  { %v10428_v0 = vmul.f32 %v18922_v63, %v18906_v25  ;;  %v15772_v25 = vld [vmem:[%s21563_s6 + $0x58] sm:$0xff] }
 0xe78   :  { %17745 = vmatmul.mubr.msk.f32.vlgmr.msra.gmra.mrb[130].mxu1 %vm2024_vm2, %v10428_v0 }
 0xe79   :  { %17753 = vmatpush3.msra.mxu1 %v20789_v26  ;;  %17754 = vmatprep.mubr.msk.f32.mxu1 %vm19007_vm0, %v19008_v11 }
 0xe7a   :  { %17762 = vmatprep.subr.mxu1 %v19008_v11 }
 0xe82   :  { %v10407_v42 = vpop.xlane.xlu0 %10406 }
 0xe83   :  { %18923 = vrcp.f32 %v10407_v42  ;;  %v15706_v42 = vld [vmem:[%s21561_s4 + $0x4c8] sm:$0xff] }
 0xe8a   :  { %v10413_v2 = vpop.xlane.xlu0 %10412 }
 0xe8b   :  { %18925 = vrcp.f32 %v10413_v2  ;;  %v15709_v2 = vld [vmem:[%s21561_s4 + $0x4e0] sm:$0xff] }
 0xe8d   :  { %v18924_v5 = vpop.eup %18923 }
 0xe8e   :  { %v10429_v50 = vmul.f32 %v18924_v5, %v18908_v41  ;;  %v15710_v5 = vld [vmem:[%s21561_s4 + $0x4e8] sm:$0xff] }
 0xe90   :  { %17750 = vmatmul.mubr.msk.f32.vlgmr.msra.gmra.mrb[136].mxu0 %vm2024_vm2, %v10429_v50 }
 0xe91   :  { %17758 = vmatpush3.msra.mxu0 %v9735_v15  ;;  %17759 = vmatprep.mubr.msk.f32.mxu0 %vm19007_vm0, %v19008_v11  ;;  %v18678_v15 = vpack.c.bf16 %v15706_v42, %v15705_v58  ;;  %v15732_v58 = vld [vmem:[%s21561_s4 + $0x598] sm:$0xff] }
 0xe92   :  { %v10410_v26 = vpop.xlane.xlu1 %10409  ;;  %17767 = vmatprep.subr.mxu0 %v19008_v11 }
 0xe93   :  { %18927 = vrcp.f32 %v10410_v26  ;;  %v18684_v26 = vpack.c.bf16 %v15710_v5, %v15709_v2  ;;  %v15737_v5 = vld [vmem:[%s21561_s4 + $0x5c0] sm:$0xff] }
 0xe95   :  { %v18926_v16 = vpop.eup %18925 }
 0xe96   :  { %v10431_v22 = vmul.f32 %v18926_v16, %v20830_v38  ;;  %v15697_v38 = vld [vmem:[%s21561_s4 + $0x480] sm:$0xff]  ;;  %v15707_v16 = vld [vmem:[%s21561_s4 + $0x4d0] sm:$0xff] }
 0xe97   :  { %v18666_v44 = vpack.c.bf16 %v15698_v36, %v15697_v38 }
 0xe98   :  { %17760 = vmatmul.mubr.msk.f32.vlgmr.msra.gmra.mrb[138].mxu0 %vm2024_vm2, %v10431_v22 }
 0xe99   :  { %17769 = vmatprep.mubr.msk.f32.mxu0 %vm19007_vm0, %v19008_v11  ;;  %17768 = vmatpush3.msra.mxu0 %v15769_v24 }
 0xe9a   :  { %v10416_v4 = vpop.xlane.xlu1 %10415  ;;  %17777 = vmatprep.subr.mxu0 %v19008_v11 }
 0xe9b   :  { %18929 = vrcp.f32 %v10416_v4  ;;  %v15708_v4 = vld [vmem:[%s21561_s4 + $0x4d8] sm:$0xff] }
 0xe9d   :  { %v18928_v9 = vpop.eup %18927 }
 0xe9e   :  { %v10430_v8 = vmul.f32 %v18928_v9, %v18912_v46  ;;  %v18672_v46 = vpack.c.bf16 %v15702_v45, %v15701_v43  ;;  %v15711_v9 = vld [vmem:[%s21561_s4 + $0x4f0] sm:$0xff]  ;;  %v15721_v43 = vld [vmem:[%s21561_s4 + $0x540] sm:$0xff] }
 0xe9f   :  { %v15725_v45 = vld [vmem:[%s21561_s4 + $0x560] sm:$0xff] }
 0xea0   :  { %17755 = vmatmul.mubr.msk.f32.vlgmr.msra.gmra.mrb[132].mxu1 %vm2024_vm2, %v10430_v8  ;;  %v15712_v8 = vld [vmem:[%s21561_s4 + $0x4f8] sm:$0xff] }
 0xea1   :  { %17763 = vmatpush3.msra.mxu1 %v9736_v13  ;;  %17764 = vmatprep.mubr.msk.f32.mxu1 %vm19007_vm0, %v19008_v11  ;;  %v18687_v13 = vpack.c.bf16 %v15712_v8, %v15711_v9  ;;  %v15739_v9 = vld [vmem:[%s21561_s4 + $0x5d0] sm:$0xff]  ;;  %v15740_v8 = vld [vmem:[%s21561_s4 + $0x5d8] sm:$0xff] }
 0xea2   :  { %17772 = vmatprep.subr.mxu1 %v19008_v11 }
 0xea5   :  { %v18930_v12 = vpop.eup %18929 }
 0xea6   :  { %v10432_v19 = vmul.f32 %v18930_v12, %v20835_v48  ;;  %v15700_v48 = vld [vmem:[%s21561_s4 + $0x498] sm:$0xff] }
 0xea7   :  { %v18669_v53 = vpack.c.bf16 %v15700_v48, %v15699_v47 }
 0xea8   :  { %17765 = vmatmul.mubr.msk.f32.vlgmr.msra.gmra.mrb[134].mxu1 %vm2024_vm2, %v10432_v19 }
 0xea9   :  { %17774 = vmatprep.mubr.msk.f32.mxu1 %vm19007_vm0, %v19008_v11  ;;  %17773 = vmatpush3.msra.mxu1 %v15770_v20 }
 0xeaa   :  { %17782 = vmatprep.subr.mxu1 %v19008_v11 }
 0xf33   :  { %v10502_v28 = vpop.f32.mrb[132].mxu0 }
 0xf34   :  { %v17731_v21 = vpop.f32.mrb[133].mxu0  ;;  %17770 = vmatmul.mubr.msk.f32.vlgmr.msra.gmra.mrb[140].mxu0 %vm2024_vm2, %v10502_v28 }
 0xf35   :  { %17778 = vmatpush3.msra.mxu0 %v15771_v14  ;;  %17779 = vmatprep.mubr.msk.f32.mxu0 %vm19007_vm0, %v19008_v11 }
 0xf36   :  { %17787 = vmatprep.subr.mxu0 %v19008_v11 }
 0xf3b   :  { %v10648_v10 = vpop.f32.mrb[134].mxu0 }
 0xf3c   :  { %v17741_v23 = vpop.f32.mrb[135].mxu0  ;;  %17780 = vmatmul.mubr.msk.f32.vlgmr.msra.gmra.mrb[142].mxu0 %vm2024_vm2, %v10648_v10 }
 0xf3d   :  { %17788 = vmatpush3.msra.mxu0 %v15769_v24  ;;  %17789 = vmatprep.mubr.msk.f32.mxu0 %vm19007_vm0, %v19008_v11 }
 0xf3e   :  { %17797 = vmatprep.subr.mxu0 %v19008_v11 }
 0xf43   :  { %v10575_v27 = vpop.f32.mrb[128].mxu1 }
 0xf44   :  { %v17736_v29 = vpop.f32.mrb[129].mxu1  ;;  %17775 = vmatmul.mubr.msk.f32.vlgmr.msra.gmra.mrb[136].mxu1 %vm2024_vm2, %v10575_v27 }
 0xf45   :  { %17783 = vmatpush3.msra.mxu1 %v15772_v25  ;;  %17784 = vmatprep.mubr.msk.f32.mxu1 %vm19007_vm0, %v19008_v11 }
 0xf46   :  { %17792 = vmatprep.subr.mxu1 %v19008_v11 }
 0xf4b   :  { %v10721_v17 = vpop.f32.mrb[130].mxu1 }
 0xf4c   :  { %v17746_v37 = vpop.f32.mrb[131].mxu1  ;;  %17785 = vmatmul.mubr.msk.f32.vlgmr.msra.gmra.mrb[138].mxu1 %vm2024_vm2, %v10721_v17 }
 0xf4d   :  { %17793 = vmatpush3.msra.mxu1 %v15770_v20  ;;  %17794 = vmatprep.mubr.msk.f32.mxu1 %vm19007_vm0, %v19008_v11  ;;  %v15713_v37 = vld [vmem:[%s21561_s4 + $0x500] sm:$0xff] }
 0xf4e   :  { %17802 = vmatprep.subr.mxu1 %v19008_v11 }
 0xf63   :  { %v10794_v30 = vpop.f32.mrb[136].mxu0 }
 0xf64   :  { %v17751_v32 = vpop.f32.mrb[137].mxu0  ;;  %17790 = vmatmul.mubr.msk.f32.vlgmr.msra.gmra.mrb[144].mxu0 %vm2024_vm2, %v10794_v30  ;;  %v15717_v30 = vld [vmem:[%s21561_s4 + $0x520] sm:$0xff] }
 0xf65   :  { %17798 = vmatpush3.msra.mxu0 %v15771_v14  ;;  %17799 = vmatprep.mubr.msk.f32.mxu0 %vm19007_vm0, %v19008_v11  ;;  %v15718_v32 = vld [vmem:[%s21561_s4 + $0x528] sm:$0xff] }
 0xf66   :  { %18665 = vmatprep.subr.bf16.mxu0 %v19006_v3 }
 0xf6b   :  { %v10940_v33 = vpop.f32.mrb[138].mxu0 }
 0xf6c   :  { %v17761_v41 = vpop.f32.mrb[139].mxu0  ;;  %17800 = vmatmul.mubr.msk.f32.vlgmr.msra.gmra.mrb[146].mxu0 %vm2024_vm2, %v10940_v33 }
 0xf6d   :  { %17815 = vmatprep.mubr.msk.f32.mxu0 %vm19007_vm0, %v19008_v11  ;;  %18667 = vmatpush3.bf16.msra.mxu0 %v18666_v44  ;;  %v21036_v41 = vpack.c.bf16 %v15718_v32, %v15717_v30 }
 0xf6e   :  { %18668 = vmatprep.subr.bf16.mxu0 %v19006_v3 }
 0xf71   :  { %18670 = vmatpush3.bf16.msra.mxu0 %v18669_v53 }
 0xf72   :  { %18677 = vmatprep.subr.bf16.mxu0 %v19006_v3 }
 0xf73   :  { %v10867_v34 = vpop.f32.mrb[132].mxu1 }
 0xf74   :  { %v17756_v40 = vpop.f32.mrb[133].mxu1  ;;  %17795 = vmatmul.mubr.msk.f32.vlgmr.msra.gmra.mrb[140].mxu1 %vm2024_vm2, %v10867_v34  ;;  %v15715_v34 = vld [vmem:[%s21561_s4 + $0x510] sm:$0xff] }
 0xf75   :  { %17803 = vmatpush3.msra.mxu1 %v15772_v25  ;;  %17804 = vmatprep.mubr.msk.f32.mxu1 %vm19007_vm0, %v19008_v11  ;;  %v15716_v40 = vld [vmem:[%s21561_s4 + $0x518] sm:$0xff] }
 0xf76   :  { %18671 = vmatprep.subr.bf16.mxu1 %v19006_v3  ;;  %v21058_v38 = vpack.c.bf16 %v15716_v40, %v15715_v34  ;;  %v15886_v34 = vld [vmem:[%s21562_s5 + $0x28] ss:$0 sm:$0xff]  ;;  %v15887_v40 = vld [vmem:[%s21562_s5 + $0x29] ss:$0 sm:$0xff] }
 0xf7b   :  { %v11013_v35 = vpop.f32.mrb[134].mxu1 }
 0xf7c   :  { %v17766_v18 = vpop.f32.mrb[135].mxu1  ;;  %17805 = vmatmul.mubr.msk.f32.vlgmr.msra.gmra.mrb[142].mxu1 %vm2024_vm2, %v11013_v35  ;;  %v15719_v35 = vld [vmem:[%s21561_s4 + $0x530] sm:$0xff] }
 0xf7d   :  { %17826 = vmatprep.mubr.msk.f32.mxu1 %vm19007_vm0, %v19008_v11  ;;  %18673 = vmatpush3.bf16.msra.mxu1 %v18672_v46  ;;  %v15720_v18 = vld [vmem:[%s21561_s4 + $0x538] sm:$0xff] }
 0xf7e   :  { %18674 = vmatprep.subr.bf16.mxu1 %v19006_v3  ;;  %v21060_v36 = vpack.c.bf16 %v15720_v18, %v15719_v35 }
 0xf81   :  { %18676 = vmatpush3.bf16.msra.mxu1 %v18675_v55 }
 0xf82   :  { %18683 = vmatprep.subr.bf16.mxu1 %v19006_v3 }
0x1007   :  { %v11086_v57 = vpop.f32.mrb[140].mxu0 }
0x1008   :  { %v17771_v59 = vpop.f32.mrb[141].mxu0 }
0x100f   :  { %v11232_v60 = vpop.f32.mrb[142].mxu0 }
0x1010   :  { %v17781_v61 = vpop.f32.mrb[143].mxu0 }
0x1011   :  { %v15729_v61 = vld [vmem:[%s21561_s4 + $0x580] sm:$0xff] }
0x1017   :  { %v11159_v39 = vpop.f32.mrb[136].mxu1 }
0x1018   :  { %v11601_v1 = vadd.f32 %v11159_v39, %v11086_v57  ;;  %v17776_v31 = vpop.f32.mrb[137].mxu1  ;;  %v21103_v57 = vld [vmem:[%s21558_s1] sm:$0xff]  ;;  %v15730_v39 = vld [vmem:[%s21561_s4 + $0x588] sm:$0xff] }
0x1019   :  { %v15734_v31 = vld [vmem:[%s21561_s4 + $0x5a8] sm:$0xff] }
0x101a   :  { %v11603_v6 = vadd.f32 %v11601_v1, %v11232_v60  ;;  %v15733_v1 = vld [vmem:[%s21561_s4 + $0x5a0] sm:$0xff] }
0x101f   :  { %v11305_v49 = vpop.f32.mrb[138].mxu1 }
0x1020   :  { %v11605_v63 = vadd.f32 %v11603_v6, %v11305_v49  ;;  %v17786_v0 = vpop.f32.mrb[139].mxu1  ;;  %v21135_v6 = vpack.c.bf16 %v15730_v39, %v15729_v61  ;;  %v15731_v49 = vld [vmem:[%s21561_s4 + $0x590] sm:$0xff] }
0x1021   :  { %v15736_v0 = vld [vmem:[%s21561_s4 + $0x5b8] sm:$0xff]  ;;  %v21159_v42 = vpack.c.bf16 %v15732_v58, %v15731_v49 }
0x1022   :  { %v11613_v50 = vadd.f32 %v15857_v56, %v11605_v63  ;;  %v15735_v63 = vld [vmem:[%s21561_s4 + $0x5b0] sm:$0xff] }
0x1023   :  { %v21161_v2 = vpack.c.bf16 %v15736_v0, %v15735_v63 }
0x1024   :  { %v20974_v22 = vadd.f32 %v11613_v50, %v20378_v7  ;;  %v18681_v7 = vpack.c.bf16 %v15708_v4, %v15707_v16  ;;  %v15738_v50 = vld [vmem:[%s21561_s4 + $0x5c8] sm:$0xff] }
0x1025   :  { %v18750_v16 = vpack.c.bf16 %v15738_v50, %v15737_v5 }
0x1026   :  { %17816 = vmatmul.mubr.msk.f32.vlgmr.msra.gmra.mrb[148].mxu0 %vm193_vm1, %v20974_v22  ;;  %17827 = vmatmul.mubr.msk.f32.vlgmr.msra.gmra.mrb[144].mxu1 %vm193_vm1, %v20974_v22 }
0x1027   :  { %18679 = vmatpush3.bf16.msra.mxu0 %v18678_v15  ;;  %18685 = vmatpush3.bf16.msra.mxu1 %v18684_v26 }
0x1028   :  { %18680 = vmatprep.subr.bf16.mxu0 %v19006_v3  ;;  %18686 = vmatprep.subr.bf16.mxu1 %v19006_v3 }
0x1029   :  { %17837 = vmatprep.mubr.msk.f32.mxu0 %vm19007_vm0, %v19008_v11  ;;  %17848 = vmatprep.mubr.msk.f32.mxu1 %vm19007_vm0, %v19008_v11 }
0x102b   :  { %18682 = vmatpush3.bf16.msra.mxu0 %v18681_v7  ;;  %18688 = vmatpush3.bf16.msra.mxu1 %v18687_v13 }
0x102c   :  { %18689 = vmatprep.subr.bf16.mxu0 %v19006_v3  ;;  %18695 = vmatprep.subr.bf16.mxu1 %v19006_v3 }
0x102e   :  { %17838 = vmatmul.mubr.msk.f32.vlgmr.msra.gmra.mrb[150].mxu0 %vm193_vm1, %v20974_v22  ;;  %17849 = vmatmul.mubr.msk.f32.vlgmr.msra.gmra.mrb[146].mxu1 %vm193_vm1, %v20974_v22 }
0x102f   :  { %18691 = vmatpush3.bf16.msra.mxu0 %v18666_v44  ;;  %18697 = vmatpush3.bf16.msra.mxu1 %v18672_v46  ;;  %v15722_v44 = vld [vmem:[%s21561_s4 + $0x548] sm:$0xff] }
0x1030   :  { %18692 = vmatprep.subr.bf16.mxu0 %v19006_v3  ;;  %18698 = vmatprep.subr.bf16.mxu1 %v19006_v3  ;;  %v15726_v46 = vld [vmem:[%s21561_s4 + $0x568] sm:$0xff]  ;;  %v21082_v47 = vpack.c.bf16 %v15722_v44, %v15721_v43 }
0x1031   :  { %17859 = vmatprep.mubr.msk.f32.mxu0 %vm19007_vm0, %v19008_v11  ;;  %17870 = vmatprep.mubr.msk.f32.mxu1 %vm19007_vm0, %v19008_v11  ;;  %v21084_v48 = vpack.c.bf16 %v15726_v46, %v15725_v45 }
0x1033   :  { %18694 = vmatpush3.bf16.msra.mxu0 %v18669_v53  ;;  %18700 = vmatpush3.bf16.msra.mxu1 %v18675_v55  ;;  %v15724_v53 = vld [vmem:[%s21561_s4 + $0x558] sm:$0xff] }
0x1034   :  { %18701 = vmatprep.subr.bf16.mxu0 %v19006_v3  ;;  %18707 = vmatprep.subr.bf16.mxu1 %v19006_v3  ;;  %v15728_v55 = vld [vmem:[%s21561_s4 + $0x578] sm:$0xff]  ;;  %v21111_v59 = vpack.c.bf16 %v15724_v53, %v15723_v51  ;;  %v15888_v51 = vld [vmem:[%s21562_s5 + $0x2a] ss:$0 sm:$0xff]  ;;  %v15889_v53 = vld [vmem:[%s21562_s5 + $0x2b] ss:$0 sm:$0xff] }
0x1035   :  { %v21113_v60 = vpack.c.bf16 %v15728_v55, %v15727_v54 }
0x1037   :  { %v11378_v12 = vpop.f32.mrb[144].mxu0 }
0x1038   :  { %v17791_v19 = vpop.f32.mrb[145].mxu0 }
0x103f   :  { %v11524_v24 = vpop.f32.mrb[146].mxu0 }
0x1040   :  { %v17801_v20 = vpop.f32.mrb[147].mxu0 }
0x1047   :  { %v11451_v14 = vpop.f32.mrb[140].mxu1 }
0x1048   :  { %v11602_v28 = vadd.f32 %v11451_v14, %v11378_v12  ;;  %v17796_v21 = vpop.f32.mrb[141].mxu1  ;;  %v18753_v12 = vpack.c.bf16 %v15740_v8, %v15739_v9 }
0x104a   :  { %v11604_v10 = vadd.f32 %v11602_v28, %v11524_v24  ;;  %v18973_v24 = vld [vmem:[%s21558_s1 + $0x8] sm:$0xff] }
0x104f   :  { %v11597_v23 = vpop.f32.mrb[142].mxu1 }
0x1050   :  { %v11606_v25 = vadd.f32 %v11604_v10, %v11597_v23  ;;  %v17806_v27 = vpop.f32.mrb[143].mxu1 }
0x1052   :  { %v11614_v29 = vadd.f32 %v15857_v56, %v11606_v25  ;;  %v21137_v56 = vpack.c.bf16 %v15734_v31, %v15733_v1 }
0x1054   :  { %v21010_v17 = vadd.f32 %v11614_v29, %v20593_v62  ;;  %v15714_v62 = vld [vmem:[%s21561_s4 + $0x508] sm:$0xff] }
0x1055   :  { %v21034_v33 = vpack.c.bf16 %v15714_v62, %v15713_v37 }
0x1056   :  { %17860 = vmatmul.mubr.msk.f32.vlgmr.msra.gmra.mrb[152].mxu0 %vm193_vm1, %v21010_v17  ;;  %17871 = vmatmul.mubr.msk.f32.vlgmr.msra.gmra.mrb[148].mxu1 %vm193_vm1, %v21010_v17 }
0x1057   :  { %18703 = vmatpush3.bf16.msra.mxu0 %v18678_v15  ;;  %18709 = vmatpush3.bf16.msra.mxu1 %v18684_v26  ;;  %v15741_v15 = vld [vmem:[%s21561_s4 + $0x5e0] sm:$0xff]  ;;  %v15742_v26 = vld [vmem:[%s21561_s4 + $0x5e8] sm:$0xff] }
0x1058   :  { %18704 = vmatprep.subr.bf16.mxu0 %v19006_v3  ;;  %18710 = vmatprep.subr.bf16.mxu1 %v19006_v3  ;;  %v18756_v4 = vpack.c.bf16 %v15742_v26, %v15741_v15 }
0x1059   :  { %17881 = vmatprep.mubr.msk.f32.mxu0 %vm19007_vm0, %v19008_v11  ;;  %17892 = vmatprep.mubr.msk.f32.mxu1 %vm19007_vm0, %v19008_v11 }
0x105b   :  { %18706 = vmatpush3.bf16.msra.mxu0 %v18681_v7  ;;  %18712 = vmatpush3.bf16.msra.mxu1 %v18687_v13  ;;  %v15743_v7 = vld [vmem:[%s21561_s4 + $0x5f0] sm:$0xff]  ;;  %v15744_v13 = vld [vmem:[%s21561_s4 + $0x5f8] sm:$0xff] }
0x105c   :  { %18713 = vmatprep.subr.bf16.mxu0 %v19006_v3  ;;  %18719 = vmatprep.subr.bf16.mxu1 %v19006_v3  ;;  %v18759_v19 = vpack.c.bf16 %v15744_v13, %v15743_v7 }
0x105e   :  { %17882 = vmatmul.mubr.msk.f32.vlgmr.msra.gmra.mrb[154].mxu0 %vm193_vm1, %v21010_v17  ;;  %17893 = vmatmul.mubr.msk.f32.vlgmr.msra.gmra.mrb[150].mxu1 %vm193_vm1, %v21010_v17 }
0x105f   :  { %18715 = vmatpush3.bf16.msra.mxu0 %v21034_v33  ;;  %18721 = vmatpush3.bf16.msra.mxu1 %v21036_v41 }
0x1060   :  { %18716 = vmatprep.subr.bf16.mxu0 %v19006_v3  ;;  %18722 = vmatprep.subr.bf16.mxu1 %v19006_v3 }
0x1061   :  { %17903 = vmatprep.mubr.msk.f32.mxu0 %vm19007_vm0, %v19008_v11  ;;  %17914 = vmatprep.mubr.msk.f32.mxu1 %vm19007_vm0, %v19008_v11 }
0x1063   :  { %18718 = vmatpush3.bf16.msra.mxu0 %v21058_v38  ;;  %18724 = vmatpush3.bf16.msra.mxu1 %v21060_v36 }
0x1064   :  { %18725 = vmatprep.subr.bf16.mxu0 %v19006_v3  ;;  %18731 = vmatprep.subr.bf16.mxu1 %v19006_v3 }
0x1066   :  { %17904 = vmatmul.mubr.msk.f32.vlgmr.msra.gmra.mrb[156].mxu0 %vm193_vm1, %v21103_v57  ;;  %17915 = vmatmul.mubr.msk.f32.vlgmr.msra.gmra.mrb[152].mxu1 %vm193_vm1, %v21103_v57 }
0x1067   :  { %18727 = vmatpush3.bf16.msra.mxu0 %v21082_v47  ;;  %18733 = vmatpush3.bf16.msra.mxu1 %v21084_v48 }
0x1068   :  { %18728 = vmatprep.subr.bf16.mxu0 %v19006_v3  ;;  %18734 = vmatprep.subr.bf16.mxu1 %v19006_v3 }
0x1069   :  { %17925 = vmatprep.mubr.msk.f32.mxu0 %vm19007_vm0, %v19008_v11  ;;  %17936 = vmatprep.mubr.msk.f32.mxu1 %vm19007_vm0, %v19008_v11 }
0x106b   :  { %18730 = vmatpush3.bf16.msra.mxu0 %v21111_v59  ;;  %18736 = vmatpush3.bf16.msra.mxu1 %v21113_v60 }
0x106c   :  { %18737 = vmatprep.subr.bf16.mxu0 %v19006_v3  ;;  %18743 = vmatprep.subr.bf16.mxu1 %v19006_v3 }
0x106e   :  { %17926 = vmatmul.mubr.msk.f32.vlgmr.msra.gmra.mrb[158].mxu0 %vm193_vm1, %v21103_v57  ;;  %17937 = vmatmul.mubr.msk.f32.vlgmr.msra.gmra.mrb[154].mxu1 %vm193_vm1, %v21103_v57 }
0x106f   :  { %18739 = vmatpush3.bf16.msra.mxu0 %v21135_v6  ;;  %18745 = vmatpush3.bf16.msra.mxu1 %v21137_v56 }
0x1070   :  { %18740 = vmatprep.subr.bf16.mxu0 %v19006_v3  ;;  %18746 = vmatprep.subr.bf16.mxu1 %v19006_v3 }
0x1071   :  { %17947 = vmatprep.mubr.msk.f32.mxu0 %vm19007_vm0, %v19008_v11  ;;  %17958 = vmatprep.mubr.msk.f32.mxu1 %vm19007_vm0, %v19008_v11 }
0x1073   :  { %18742 = vmatpush3.bf16.msra.mxu0 %v21159_v42  ;;  %18748 = vmatpush3.bf16.msra.mxu1 %v21161_v2 }
0x1074   :  { %18749 = vmatprep.subr.bf16.mxu0 %v19006_v3  ;;  %18755 = vmatprep.subr.bf16.mxu1 %v19006_v3 }
0x1076   :  { %17948 = vmatmul.mubr.msk.f32.vlgmr.msra.gmra.mrb[160].mxu0 %vm193_vm1, %v21103_v57  ;;  %17959 = vmatmul.mubr.msk.f32.vlgmr.msra.gmra.mrb[156].mxu1 %vm193_vm1, %v21103_v57 }
0x1077   :  { %18751 = vmatpush3.bf16.msra.mxu0 %v18750_v16  ;;  %18757 = vmatpush3.bf16.msra.mxu1 %v18756_v4 }
0x1078   :  { %18752 = vmatprep.subr.bf16.mxu0 %v19006_v3  ;;  %18758 = vmatprep.subr.bf16.mxu1 %v19006_v3 }
0x1079   :  { %17969 = vmatprep.mubr.msk.f32.mxu0 %vm19007_vm0, %v19008_v11  ;;  %17980 = vmatprep.mubr.msk.f32.mxu1 %vm19007_vm0, %v19008_v11 }
0x107b   :  { %18754 = vmatpush3.bf16.msra.mxu0 %v18753_v12  ;;  %18760 = vmatpush3.bf16.msra.mxu1 %v18759_v19 }
0x107c   :  { %18761 = vmatprep.subr.bf16.mxu0 %v19006_v3  ;;  %18767 = vmatprep.subr.bf16.mxu1 %v19006_v3 }
0x107e   :  { %17970 = vmatmul.mubr.msk.f32.vlgmr.msra.gmra.mrb[162].mxu0 %vm193_vm1, %v21103_v57  ;;  %17981 = vmatmul.mubr.msk.f32.vlgmr.msra.gmra.mrb[158].mxu1 %vm193_vm1, %v21103_v57  ;;  %v15868_v57 = vld [vmem:[%s21562_s5 + $0x26] ss:$0 sm:$0xff] }
0x107f   :  { %18763 = vmatpush3.bf16.msra.mxu0 %v21034_v33  ;;  %18769 = vmatpush3.bf16.msra.mxu1 %v21036_v41 }
0x1080   :  { %18764 = vmatprep.subr.bf16.mxu0 %v19006_v3  ;;  %18770 = vmatprep.subr.bf16.mxu1 %v19006_v3 }
0x1081   :  { %17991 = vmatprep.mubr.msk.f32.mxu0 %vm19007_vm0, %v19008_v11  ;;  %18002 = vmatprep.mubr.msk.f32.mxu1 %vm19007_vm0, %v19008_v11 }
0x1083   :  { %18766 = vmatpush3.bf16.msra.mxu0 %v21058_v38  ;;  %18772 = vmatpush3.bf16.msra.mxu1 %v21060_v36  ;;  %v15866_v38 = vld [vmem:[%s21562_s5 + $0x24] ss:$0 sm:$0xff]  ;;  %v15867_v36 = vld [vmem:[%s21562_s5 + $0x25] ss:$0 sm:$0xff] }
0x1084   :  { %18773 = vmatprep.subr.bf16.mxu0 %v19006_v3  ;;  %18779 = vmatprep.subr.bf16.mxu1 %v19006_v3 }
0x1086   :  { %17992 = vmatmul.mubr.msk.f32.vlgmr.msra.gmra.mrb[164].mxu0 %vm193_vm1, %v18973_v24  ;;  %18003 = vmatmul.mubr.msk.f32.vlgmr.msra.gmra.mrb[160].mxu1 %vm193_vm1, %v18973_v24 }
0x1087   :  { %18775 = vmatpush3.bf16.msra.mxu0 %v21082_v47  ;;  %18781 = vmatpush3.bf16.msra.mxu1 %v21084_v48 }
0x1088   :  { %18776 = vmatprep.subr.bf16.mxu0 %v19006_v3  ;;  %18782 = vmatprep.subr.bf16.mxu1 %v19006_v3 }
0x1089   :  { %18013 = vmatprep.mubr.msk.f32.mxu0 %vm19007_vm0, %v19008_v11  ;;  %18024 = vmatprep.mubr.msk.f32.mxu1 %vm19007_vm0, %v19008_v11 }
0x108b   :  { %18778 = vmatpush3.bf16.msra.mxu0 %v21111_v59  ;;  %18784 = vmatpush3.bf16.msra.mxu1 %v21113_v60  ;;  %v15869_v59 = vld [vmem:[%s21562_s5 + $0x27] ss:$0 sm:$0xff] }
0x108c   :  { %18785 = vmatprep.subr.bf16.mxu0 %v19006_v3  ;;  %18791 = vmatprep.subr.bf16.mxu1 %v19006_v3 }
0x108e   :  { %18014 = vmatmul.mubr.msk.f32.vlgmr.msra.gmra.mrb[166].mxu0 %vm193_vm1, %v18973_v24  ;;  %18025 = vmatmul.mubr.msk.f32.vlgmr.msra.gmra.mrb[162].mxu1 %vm193_vm1, %v18973_v24 }
0x108f   :  { %18787 = vmatpush3.bf16.msra.mxu0 %v21135_v6  ;;  %18793 = vmatpush3.bf16.msra.mxu1 %v21137_v56 }
0x1090   :  { %18788 = vmatprep.subr.bf16.mxu0 %v19006_v3  ;;  %18794 = vmatprep.subr.bf16.mxu1 %v19006_v3 }
0x1091   :  { %18035 = vmatprep.mubr.msk.f32.mxu0 %vm19007_vm0, %v19008_v11  ;;  %18046 = vmatprep.mubr.msk.f32.mxu1 %vm19007_vm0, %v19008_v11 }
0x1093   :  { %18790 = vmatpush3.bf16.msra.mxu0 %v21159_v42  ;;  %18796 = vmatpush3.bf16.msra.mxu1 %v21161_v2 }
0x1094   :  { %18797 = vmatprep.subr.bf16.mxu0 %v19006_v3  ;;  %18803 = vmatprep.subr.bf16.mxu1 %v19006_v3 }
0x1096   :  { %18036 = vmatmul.mubr.msk.f32.vlgmr.msra.gmra.mrb[168].mxu0 %vm193_vm1, %v18973_v24  ;;  %18047 = vmatmul.mubr.msk.f32.vlgmr.msra.gmra.mrb[164].mxu1 %vm193_vm1, %v18973_v24 }
0x1097   :  { %18799 = vmatpush3.bf16.msra.mxu0 %v18750_v16  ;;  %18805 = vmatpush3.bf16.msra.mxu1 %v18756_v4 }
0x1098   :  { %18800 = vmatprep.subr.bf16.mxu0 %v19006_v3  ;;  %18806 = vmatprep.subr.bf16.mxu1 %v19006_v3 }
0x1099   :  { %18057 = vmatprep.mubr.msk.f32.mxu0 %vm19007_vm0, %v19008_v11  ;;  %18068 = vmatprep.mubr.msk.f32.mxu1 %vm19007_vm0, %v19008_v11 }
0x109b   :  { %18802 = vmatpush3.bf16.msra.mxu0 %v18753_v12  ;;  %18808 = vmatpush3.bf16.msra.mxu1 %v18759_v19 }
0x109c   :  { %18071 = vmatprep.subr.mxu0 %v19008_v11  ;;  %18076 = vmatprep.subr.mxu1 %v19008_v11 }
0x109e   :  { %18058 = vmatmul.mubr.msk.f32.vlgmr.msra.gmra.mrb[170].mxu0 %vm193_vm1, %v18973_v24  ;;  %18069 = vmatmul.mubr.msk.f32.vlgmr.msra.gmra.mrb[166].mxu1 %vm193_vm1, %v18973_v24 }
0x109f   :  { %18073 = vmatprep.mubr.msk.f32.mxu0 %vm19007_vm0, %v19008_v11  ;;  %18078 = vmatprep.mubr.msk.f32.mxu1 %vm19007_vm0, %v19008_v11 }
0x10f9   :  { %v11686_v3 = vpop.f32.mrb[148].mxu0  ;;  %v11756_v20 = vpop.f32.mrb[144].mxu1 }
0x10fa   :  { %v17817_v14 = vpop.f32.mrb[149].mxu0  ;;  %v17828_v28 = vpop.f32.mrb[145].mxu1  ;;  %v12207_v47 = vadd.f32 %v15866_v38, %v11686_v3  ;;  %v12208_v48 = vadd.f32 %v15867_v36, %v11756_v20 }
0x10fb   :  { %v15890_v14 = vld [vmem:[%s21562_s5 + $0x2c] ss:$0 sm:$0xff]  ;;  %v15891_v28 = vld [vmem:[%s21562_s5 + $0x2d] ss:$0 sm:$0xff] }
0x1101   :  { %v11826_v21 = vpop.f32.mrb[150].mxu0  ;;  %v11896_v10 = vpop.f32.mrb[146].mxu1 }
0x1102   :  { %v17839_v23 = vpop.f32.mrb[151].mxu0  ;;  %v17850_v25 = vpop.f32.mrb[147].mxu1  ;;  %v12209_v31 = vadd.f32 %v15868_v57, %v11826_v21  ;;  %v12210_v6 = vadd.f32 %v15869_v59, %v11896_v10 }
0x1129   :  { %v21272_v27 = vpop.f32.mrb[152].mxu0  ;;  %v21274_v29 = vpop.f32.mrb[148].mxu1 }
0x112a   :  { %v17861_v37 = vpop.f32.mrb[153].mxu0  ;;  %v17872_v62 = vpop.f32.mrb[149].mxu1  ;;  %v12211_v8 = vadd.f32 %v15866_v38, %v21272_v27  ;;  %v12212_v7 = vadd.f32 %v15867_v36, %v21274_v29  ;;  %v18974_v38 = vld [vmem:[%s21560_s3] ss:$0 sm:$0xff] }
0x1131   :  { %v21276_v30 = vpop.f32.mrb[154].mxu0  ;;  %v21278_v32 = vpop.f32.mrb[150].mxu1 }
0x1132   :  { %v17883_v33 = vpop.f32.mrb[155].mxu0  ;;  %v17894_v41 = vpop.f32.mrb[151].mxu1  ;;  %v12213_v21 = vadd.f32 %v15868_v57, %v21276_v30  ;;  %v12214_v10 = vadd.f32 %v15869_v59, %v21278_v32  ;;  %v18977_v57 = vld [vmem:[%s21560_s3 + $0x3] ss:$0 sm:$0xff] }
0x1139   :  { %v12281_v35 = vpop.f32.mrb[156].mxu0  ;;  %v12351_v18 = vpop.f32.mrb[152].mxu1 }
0x113a   :  { %v13383_v43 = vadd.f32 %v15886_v34, %v12281_v35  ;;  %v13384_v44 = vadd.f32 %v15887_v40, %v12351_v18  ;;  %v17905_v45 = vpop.f32.mrb[157].mxu0  ;;  %v17916_v46 = vpop.f32.mrb[153].mxu1 }
0x113c   :  { %18072 = vmatpush3.xpose.msk.msra.mxu0 %vm2024_vm2, %v13383_v43  ;;  %18077 = vmatpush3.xpose.msk.msra.mxu1 %vm2024_vm2, %v13384_v44  ;;  %v18975_v43 = vld [vmem:[%s21560_s3 + $0x1] ss:$0 sm:$0xff] }
0x113d   :  { %18081 = vmatprep.subr.mxu0 %v19008_v11  ;;  %18086 = vmatprep.subr.mxu1 %v19008_v11 }
0x113f   :  { %18074 = vmatmul.mubr.msk.f32.vlgmr.msra.gmra.mrb[172].mxu0 %vm2024_vm2, %v12207_v47  ;;  %18079 = vmatmul.mubr.msk.f32.vlgmr.msra.gmra.mrb[168].mxu1 %vm2024_vm2, %v12208_v48 }
0x1140   :  { %18083 = vmatprep.mubr.msk.f32.mxu0 %vm19007_vm0, %v19008_v11  ;;  %18088 = vmatprep.mubr.msk.f32.mxu1 %vm19007_vm0, %v19008_v11 }
0x1141   :  { %v12421_v54 = vpop.f32.mrb[158].mxu0  ;;  %v12491_v55 = vpop.f32.mrb[154].mxu1 }
0x1142   :  { %v13385_v60 = vadd.f32 %v15888_v51, %v12421_v54  ;;  %v13386_v61 = vadd.f32 %v15889_v53, %v12491_v55  ;;  %v17927_v39 = vpop.f32.mrb[159].mxu0  ;;  %v17938_v1 = vpop.f32.mrb[155].mxu1  ;;  %v18976_v54 = vld [vmem:[%s21560_s3 + $0x2] ss:$0 sm:$0xff] }
0x1144   :  { %18082 = vmatpush3.xpose.msk.msra.mxu0 %vm2024_vm2, %v13385_v60  ;;  %18087 = vmatpush3.xpose.msk.msra.mxu1 %vm2024_vm2, %v13386_v61 }
0x1145   :  { %18091 = vmatprep.subr.mxu0 %v19008_v11  ;;  %18096 = vmatprep.subr.mxu1 %v19008_v11 }
0x1147   :  { %18084 = vmatmul.mubr.msk.f32.vlgmr.msra.gmra.mrb[174].mxu0 %vm2024_vm2, %v12209_v31  ;;  %18089 = vmatmul.mubr.msk.f32.vlgmr.msra.gmra.mrb[170].mxu1 %vm2024_vm2, %v12210_v6 }
0x1148   :  { %18093 = vmatprep.mubr.msk.f32.mxu0 %vm19007_vm0, %v19008_v11  ;;  %18098 = vmatprep.mubr.msk.f32.mxu1 %vm19007_vm0, %v19008_v11 }
0x1149   :  { %v12561_v56 = vpop.f32.mrb[160].mxu0  ;;  %v12631_v49 = vpop.f32.mrb[156].mxu1 }
0x114a   :  { %v17949_v58 = vpop.f32.mrb[161].mxu0  ;;  %v17960_v63 = vpop.f32.mrb[157].mxu1  ;;  %v13387_v23 = vadd.f32 %v15890_v14, %v12561_v56  ;;  %v13388_v25 = vadd.f32 %v15891_v28, %v12631_v49  ;;  %v18978_v56 = vld [vmem:[%s21560_s3 + $0x4] ss:$0 sm:$0xff] }
0x114b   :  { %v18979_v58 = vld [vmem:[%s21560_s3 + $0x5] ss:$0 sm:$0xff] }
0x1151   :  { %v21324_v0 = vpop.f32.mrb[162].mxu0  ;;  %v21326_v42 = vpop.f32.mrb[158].mxu1 }
0x1152   :  { %v17971_v2 = vpop.f32.mrb[163].mxu0  ;;  %v17982_v5 = vpop.f32.mrb[159].mxu1 }
0x1159   :  { %v12841_v50 = vpop.f32.mrb[164].mxu0  ;;  %v12911_v15 = vpop.f32.mrb[160].mxu1 }
0x115a   :  { %v13391_v26 = vadd.f32 %v15886_v34, %v12841_v50  ;;  %v13392_v16 = vadd.f32 %v15887_v40, %v12911_v15  ;;  %v17993_v4 = vpop.f32.mrb[165].mxu0  ;;  %v18004_v9 = vpop.f32.mrb[161].mxu1 }
0x115b   :  { %v18980_v4 = vld [vmem:[%s21560_s3 + $0x6] ss:$0 sm:$0xff] }
0x115c   :  { %18092 = vmatpush3.xpose.msk.msra.mxu0 %vm2024_vm2, %v13391_v26  ;;  %18097 = vmatpush3.xpose.msk.msra.mxu1 %vm2024_vm2, %v13392_v16 }
0x115d   :  { %18101 = vmatprep.subr.mxu0 %v19008_v11  ;;  %18106 = vmatprep.subr.mxu1 %v19008_v11 }
0x115f   :  { %18094 = vmatmul.mubr.msk.f32.vlgmr.msra.gmra.mrb[176].mxu0 %vm2024_vm2, %v12211_v8  ;;  %18099 = vmatmul.mubr.msk.f32.vlgmr.msra.gmra.mrb[172].mxu1 %vm2024_vm2, %v12212_v7  ;;  %v18981_v8 = vld [vmem:[%s21560_s3 + $0x7] ss:$0 sm:$0xff] }
0x1160   :  { %18103 = vmatprep.mubr.msk.f32.mxu0 %vm19007_vm0, %v19008_v11  ;;  %18108 = vmatprep.mubr.msk.f32.mxu1 %vm19007_vm0, %v19008_v11 }
0x1161   :  { %v12981_v13 = vpop.f32.mrb[166].mxu0  ;;  %v13051_v12 = vpop.f32.mrb[162].mxu1 }
0x1162   :  { %v13393_v19 = vadd.f32 %v15888_v51, %v12981_v13  ;;  %v13394_v24 = vadd.f32 %v15889_v53, %v13051_v12  ;;  %v18015_v3 = vpop.f32.mrb[167].mxu0  ;;  %v18026_v20 = vpop.f32.mrb[163].mxu1 }
0x1164   :  { %18102 = vmatpush3.xpose.msk.msra.mxu0 %vm2024_vm2, %v13393_v19  ;;  %18107 = vmatpush3.xpose.msk.msra.mxu1 %vm2024_vm2, %v13394_v24 }
0x1165   :  { %18111 = vmatprep.subr.mxu0 %v19008_v11  ;;  %18116 = vmatprep.subr.mxu1 %v19008_v11 }
0x1167   :  { %18104 = vmatmul.mubr.msk.f32.vlgmr.msra.gmra.mrb[178].mxu0 %vm2024_vm2, %v12213_v21  ;;  %18109 = vmatmul.mubr.msk.f32.vlgmr.msra.gmra.mrb[174].mxu1 %vm2024_vm2, %v12214_v10 }
0x1168   :  { %18112 = vmatpush3.msra.mxu0 %v13387_v23  ;;  %18117 = vmatpush3.msra.mxu1 %v13388_v25 }
0x1169   :  { %v13121_v27 = vpop.f32.mrb[168].mxu0  ;;  %v13191_v29 = vpop.f32.mrb[164].mxu1  ;;  %18113 = vmatprep.mubr.msk.f32.mxu0 %vm19007_vm0, %v19008_v11  ;;  %18118 = vmatprep.mubr.msk.f32.mxu1 %vm19007_vm0, %v19008_v11 }
0x116a   :  { %v21358_v37 = vadd.f32 %v15890_v14, %v13121_v27  ;;  %v21360_v62 = vadd.f32 %v15891_v28, %v13191_v29  ;;  %v18037_v30 = vpop.f32.mrb[169].mxu0  ;;  %v18048_v32 = vpop.f32.mrb[165].mxu1  ;;  %18121 = vmatprep.subr.mxu0 %v19008_v11  ;;  %18126 = vmatprep.subr.mxu1 %v19008_v11 }
0x1171   :  { %v21364_v33 = vpop.f32.mrb[170].mxu0  ;;  %v21366_v41 = vpop.f32.mrb[166].mxu1 }
0x1172   :  { %v18059_v34 = vpop.f32.mrb[171].mxu0  ;;  %v18070_v40 = vpop.f32.mrb[167].mxu1 }
0x1212   :  { %v13471_v35 = vpop.f32.mrb[172].mxu0  ;;  %v13547_v18 = vpop.f32.mrb[168].mxu1 }
0x1213   :  { %v13472_v36 = vadd.f32 %v18974_v38, %v13471_v35  ;;  %v13548_v44 = vadd.f32 %v18975_v43, %v13547_v18  ;;  %v18075_v45 = vpop.f32.mrb[173].mxu0  ;;  %v18080_v46 = vpop.f32.mrb[169].mxu1 }
0x1215   :  { %v14010_v47 = vsel %vm2024_vm2, %v13548_v44, -inf  ;;  %v14007_v48 = vsel %vm2024_vm2, %v13472_v36, -inf }
0x1216   :  { %14011 = vmax.xlane.f32.xlu1 %v14010_v47  ;;  %14008 = vmax.xlane.f32.xlu0 %v14007_v48 }
0x121a   :  { %v13623_v51 = vpop.f32.mrb[174].mxu0  ;;  %v13699_v53 = vpop.f32.mrb[170].mxu1 }
0x121b   :  { %v13624_v55 = vadd.f32 %v18976_v54, %v13623_v51  ;;  %v13700_v59 = vadd.f32 %v18977_v57, %v13699_v53  ;;  %v18085_v60 = vpop.f32.mrb[175].mxu0  ;;  %v18090_v61 = vpop.f32.mrb[171].mxu1 }
0x121d   :  { %v14016_v39 = vsel %vm2024_vm2, %v13700_v59, -inf  ;;  %v14013_v1 = vsel %vm2024_vm2, %v13624_v55, -inf }
0x121e   :  { %14017 = vmax.xlane.f32.xlu1 %v14016_v39  ;;  %14014 = vmax.xlane.f32.xlu0 %v14013_v1 }
0x1232   :  { %v13775_v31 = vpop.f32.mrb[176].mxu0  ;;  %v13851_v6 = vpop.f32.mrb[172].mxu1 }
0x1233   :  { %v13776_v49 = vadd.f32 %v18978_v56, %v13775_v31  ;;  %v13852_v63 = vadd.f32 %v18979_v58, %v13851_v6  ;;  %v18095_v2 = vpop.f32.mrb[177].mxu0  ;;  %v18100_v5 = vpop.f32.mrb[173].mxu1 }
0x1235   :  { %v14022_v50 = vsel %vm2024_vm2, %v13852_v63, -inf  ;;  %v14019_v15 = vsel %vm2024_vm2, %v13776_v49, -inf }
0x1236   :  { %14023 = vmax.xlane.f32.xlu1 %v14022_v50  ;;  %14020 = vmax.xlane.f32.xlu0 %v14019_v15 }
0x123a   :  { %v13927_v26 = vpop.f32.mrb[178].mxu0  ;;  %v14003_v16 = vpop.f32.mrb[174].mxu1 }
0x123b   :  { %v13928_v9 = vadd.f32 %v18980_v4, %v13927_v26  ;;  %v14004_v7 = vadd.f32 %v18981_v8, %v14003_v16  ;;  %v18105_v13 = vpop.f32.mrb[179].mxu0  ;;  %v18110_v12 = vpop.f32.mrb[175].mxu1  ;;  %v15893_v26 = vld [vmem:[%s21562_s5 + $0x2f] ss:$0 sm:$0xff]  ;;  %v15892_v4 = vld [vmem:[%s21562_s5 + $0x2e] ss:$0 sm:$0xff] }
0x123c   :  { %v13389_v12 = vadd.f32 %v15892_v4, %v21324_v0 }
0x123d   :  { %v14028_v19 = vsel %vm2024_vm2, %v14004_v7, -inf  ;;  %v14025_v24 = vsel %vm2024_vm2, %v13928_v9, -inf }
0x123e   :  { %14029 = vmax.xlane.f32.xlu1 %v14028_v19  ;;  %14026 = vmax.xlane.f32.xlu0 %v14025_v24 }
0x12a3   :  { %v14012_v3 = vpop.xlane.xlu1 %14011  ;;  %v14009_v20 = vpop.xlane.xlu0 %14008 }
0x12a4   :  { %v14032_v14 = vsub.f32 %v13548_v44, %v14012_v3  ;;  %v14031_v28 = vsub.f32 %v13472_v36, %v14009_v20 }
0x12a6   :  { %v14041_v21 = vmul.f32 1.442695, %v14032_v14  ;;  %v14039_v10 = vmul.f32 1.442695, %v14031_v28 }
0x12a8   :  { %18931 = vpow2.f32 %v14041_v21 }
0x12a9   :  { %18933 = vpow2.f32 %v14039_v10  ;;  %v13398_v10 = vadd.f32 %v15893_v26, %v21366_v41 }
0x12ab   :  { %v14018_v23 = vpop.xlane.xlu1 %14017  ;;  %v14015_v25 = vpop.xlane.xlu0 %14014 }
0x12ac   :  { %v14034_v27 = vsub.f32 %v13700_v59, %v14018_v23  ;;  %v14033_v29 = vsub.f32 %v13624_v55, %v14015_v25  ;;  %v13397_v25 = vadd.f32 %v15892_v4, %v21364_v33 }
0x12ae   :  { %v14045_v30 = vmul.f32 1.442695, %v14034_v27  ;;  %v14043_v32 = vmul.f32 1.442695, %v14033_v29 }
0x12b0   :  { %18935 = vpow2.f32 %v14045_v30  ;;  %v15773_v30 = vld [vmem:[%s21563_s6 + $0x60] sm:$0xff] }
0x12b1   :  { %18937 = vpow2.f32 %v14043_v32  ;;  %v15774_v32 = vld [vmem:[%s21563_s6 + $0x68] sm:$0xff] }
0x12b2   :  { %v18932_v34 = vpop.eup %18931 }
0x12b3   :  { %v18934_v40 = vpop.eup %18933  ;;  %v14058_v35 = vsel %vm2024_vm2, %v18932_v34, 0.0 }
0x12b4   :  { %14059 = vadd.xlane.f32.xlu1 %v14058_v35  ;;  %v14055_v18 = vsel %vm2024_vm2, %v18934_v40, 0.0  ;;  %v15775_v35 = vld [vmem:[%s21563_s6 + $0x70] sm:$0xff] }
0x12b5   :  { %14056 = vadd.xlane.f32.xlu0 %v14055_v18 }
0x12ba   :  { %v18936_v38 = vpop.eup %18935 }
0x12bb   :  { %v18938_v36 = vpop.eup %18937  ;;  %v14064_v43 = vsel %vm2024_vm2, %v18936_v38, 0.0 }
0x12bc   :  { %14065 = vadd.xlane.f32.xlu1 %v14064_v43  ;;  %v14061_v44 = vsel %vm2024_vm2, %v18938_v36, 0.0 }
0x12bd   :  { %14062 = vadd.xlane.f32.xlu0 %v14061_v44 }
0x12c3   :  { %v14024_v45 = vpop.xlane.xlu1 %14023  ;;  %v14021_v46 = vpop.xlane.xlu0 %14020 }
0x12c4   :  { %v14036_v47 = vsub.f32 %v13852_v63, %v14024_v45  ;;  %v14035_v48 = vsub.f32 %v13776_v49, %v14021_v46 }
0x12c6   :  { %v14049_v51 = vmul.f32 1.442695, %v14036_v47  ;;  %v14047_v53 = vmul.f32 1.442695, %v14035_v48 }
0x12c8   :  { %18939 = vpow2.f32 %v14049_v51 }
0x12c9   :  { %18941 = vpow2.f32 %v14047_v53 }
0x12cb   :  { %v14030_v54 = vpop.xlane.xlu1 %14029  ;;  %v14027_v55 = vpop.xlane.xlu0 %14026 }
0x12cc   :  { %v14038_v57 = vsub.f32 %v14004_v7, %v14030_v54  ;;  %v14037_v59 = vsub.f32 %v13928_v9, %v14027_v55  ;;  %v13390_v7 = vadd.f32 %v15893_v26, %v21326_v42 }
0x12ce   :  { %v14053_v60 = vmul.f32 1.442695, %v14038_v57  ;;  %v14051_v61 = vmul.f32 1.442695, %v14037_v59 }
0x12d0   :  { %18943 = vpow2.f32 %v14053_v60  ;;  %v15777_v60 = vld [vmem:[%s21564_s7 + $0x40] sm:$0xff] }
0x12d1   :  { %18945 = vpow2.f32 %v14051_v61  ;;  %v15778_v61 = vld [vmem:[%s21564_s7 + $0x48] sm:$0xff] }
0x12d2   :  { %v18940_v39 = vpop.eup %18939 }
0x12d3   :  { %v18942_v1 = vpop.eup %18941  ;;  %v14070_v31 = vsel %vm2024_vm2, %v18940_v39, 0.0 }
0x12d4   :  { %14071 = vadd.xlane.f32.xlu1 %v14070_v31  ;;  %v14067_v6 = vsel %vm2024_vm2, %v18942_v1, 0.0 }
0x12d5   :  { %14068 = vadd.xlane.f32.xlu0 %v14067_v6  ;;  %v15781_v6 = vld [vmem:[%s21564_s7 + $0x60] sm:$0xff] }
0x12da   :  { %v21406_v56 = vpop.eup %18943 }
0x12db   :  { %v21408_v49 = vpop.eup %18945  ;;  %v14076_v58 = vsel %vm2024_vm2, %v21406_v56, 0.0 }
0x12dc   :  { %14077 = vadd.xlane.f32.xlu1 %v14076_v58  ;;  %v14073_v63 = vsel %vm2024_vm2, %v21408_v49, 0.0 }
0x12dd   :  { %14074 = vadd.xlane.f32.xlu0 %v14073_v63  ;;  %v15784_v63 = vld [vmem:[%s21564_s7 + $0x78] sm:$0xff] }
0x1341   :  { %v14060_v2 = vpop.xlane.xlu1 %14059 }
0x1342   :  { %18947 = vrcp.f32 %v14060_v2  ;;  %v14057_v5 = vpop.xlane.xlu0 %14056 }
0x1343   :  { %18949 = vrcp.f32 %v14057_v5 }
0x1349   :  { %v14066_v50 = vpop.xlane.xlu1 %14065 }
0x134a   :  { %18951 = vrcp.f32 %v14066_v50  ;;  %v14063_v15 = vpop.xlane.xlu0 %14062 }
0x134b   :  { %18953 = vrcp.f32 %v14063_v15 }
0x134c   :  { %v18948_v16 = vpop.eup %18947 }
0x134d   :  { %v18950_v9 = vpop.eup %18949  ;;  %v14088_v8 = vmul.f32 %v18948_v16, %v18932_v34  ;;  %v15776_v34 = vld [vmem:[%s21563_s6 + $0x78] sm:$0xff] }
0x134e   :  { %v14087_v13 = vmul.f32 %v18950_v9, %v18934_v40 }
0x134f   :  { %18119 = vmatmul.mubr.msk.f32.vlgmr.msra.gmra.mrb[176].mxu1 %vm2024_vm2, %v14088_v8 }
0x1350   :  { %18114 = vmatmul.mubr.msk.f32.vlgmr.msra.gmra.mrb[180].mxu0 %vm2024_vm2, %v14087_v13  ;;  %18127 = vmatpush3.msra.mxu1 %v13390_v7 }
0x1351   :  { %18122 = vmatpush3.msra.mxu0 %v13389_v12  ;;  %18123 = vmatprep.mubr.msk.f32.mxu0 %vm19007_vm0, %v19008_v11  ;;  %v15926_v12 = vld [vmem:[%s21565_s8 + $0x5] ss:$0 sm:$0xff] }
0x1352   :  { %18128 = vmatprep.mubr.msk.f32.mxu1 %vm19007_vm0, %v19008_v11  ;;  %18131 = vmatprep.subr.mxu0 %v19008_v11 }
0x1353   :  { %18136 = vmatprep.subr.mxu1 %v19008_v11 }
0x1354   :  { %v18952_v42 = vpop.eup %18951 }
0x1355   :  { %v18954_v19 = vpop.eup %18953  ;;  %v14090_v24 = vmul.f32 %v18952_v42, %v18936_v38 }
0x1356   :  { %v14089_v0 = vmul.f32 %v18954_v19, %v18938_v36 }
0x1357   :  { %18129 = vmatmul.mubr.msk.f32.vlgmr.msra.gmra.mrb[178].mxu1 %vm2024_vm2, %v14090_v24 }
0x1358   :  { %18124 = vmatmul.mubr.msk.f32.vlgmr.msra.gmra.mrb[182].mxu0 %vm2024_vm2, %v14089_v0  ;;  %18137 = vmatpush3.msra.mxu1 %v21360_v62 }
0x1359   :  { %18132 = vmatpush3.msra.mxu0 %v21358_v37  ;;  %18133 = vmatprep.mubr.msk.f32.mxu0 %vm19007_vm0, %v19008_v11 }
0x135a   :  { %18138 = vmatprep.mubr.msk.f32.mxu1 %vm19007_vm0, %v19008_v11  ;;  %18141 = vmatprep.subr.mxu0 %v19008_v11 }
0x135b   :  { %18146 = vmatprep.subr.mxu1 %v19008_v11 }
0x1361   :  { %v14072_v3 = vpop.xlane.xlu1 %14071 }
0x1362   :  { %18955 = vrcp.f32 %v14072_v3  ;;  %v14069_v20 = vpop.xlane.xlu0 %14068 }
0x1363   :  { %18957 = vrcp.f32 %v14069_v20 }
0x1369   :  { %v14078_v14 = vpop.xlane.xlu1 %14077 }
0x136a   :  { %18959 = vrcp.f32 %v14078_v14  ;;  %v14075_v28 = vpop.xlane.xlu0 %14074 }
0x136b   :  { %18961 = vrcp.f32 %v14075_v28 }
0x136c   :  { %v18956_v62 = vpop.eup %18955 }
0x136d   :  { %v18958_v37 = vpop.eup %18957  ;;  %v14092_v21 = vmul.f32 %v18956_v62, %v18940_v39  ;;  %v18809_v39 = vpack.c.bf16 %v15778_v61, %v15777_v60 }
0x136e   :  { %v14091_v23 = vmul.f32 %v18958_v37, %v18942_v1  ;;  %v15780_v1 = vld [vmem:[%s21564_s7 + $0x58] sm:$0xff] }
0x136f   :  { %18139 = vmatmul.mubr.msk.f32.vlgmr.msra.gmra.mrb[180].mxu1 %vm2024_vm2, %v14092_v21 }
0x1370   :  { %18134 = vmatmul.mubr.msk.f32.vlgmr.msra.gmra.mrb[184].mxu0 %vm2024_vm2, %v14091_v23  ;;  %18147 = vmatpush3.msra.mxu1 %v13398_v10 }
0x1371   :  { %18142 = vmatpush3.msra.mxu0 %v13397_v25  ;;  %18143 = vmatprep.mubr.msk.f32.mxu0 %vm19007_vm0, %v19008_v11 }
0x1372   :  { %18148 = vmatprep.mubr.msk.f32.mxu1 %vm19007_vm0, %v19008_v11  ;;  %18151 = vmatprep.subr.mxu0 %v19008_v11 }
0x1373   :  { %18156 = vmatprep.subr.mxu1 %v19008_v11 }
0x1374   :  { %v18960_v41 = vpop.eup %18959 }
0x1375   :  { %v18962_v27 = vpop.eup %18961  ;;  %v14094_v33 = vmul.f32 %v18960_v41, %v21406_v56  ;;  %v15782_v56 = vld [vmem:[%s21564_s7 + $0x68] sm:$0xff] }
0x1376   :  { %v14093_v29 = vmul.f32 %v18962_v27, %v21408_v49  ;;  %v15783_v49 = vld [vmem:[%s21564_s7 + $0x70] sm:$0xff]  ;;  %v18817_v58 = vpack.c.bf16 %v15782_v56, %v15781_v6 }
0x1377   :  { %18149 = vmatmul.mubr.msk.f32.vlgmr.msra.gmra.mrb[182].mxu1 %vm2024_vm2, %v14094_v33  ;;  %v18823_v2 = vpack.c.bf16 %v15784_v63, %v15783_v49 }
0x1378   :  { %18144 = vmatmul.mubr.msk.f32.vlgmr.msra.gmra.mrb[186].mxu0 %vm2024_vm2, %v14093_v29  ;;  %18158 = vmatprep.mubr.msk.f32.mxu1 %vm19007_vm0, %v19008_v11 }
0x1379   :  { %18153 = vmatprep.mubr.msk.f32.mxu0 %vm19007_vm0, %v19008_v11  ;;  %18152 = vmatpush3.msra.mxu0 %v15773_v30 }
0x137a   :  { %18157 = vmatpush3.msra.mxu1 %v15774_v32  ;;  %18161 = vmatprep.subr.mxu0 %v19008_v11 }
0x137b   :  { %18166 = vmatprep.subr.mxu1 %v19008_v11 }
0x1422   :  { %v14237_v40 = vpop.f32.mrb[176].mxu1 }
0x1423   :  { %v14164_v18 = vpop.f32.mrb[180].mxu0  ;;  %v18120_v38 = vpop.f32.mrb[177].mxu1  ;;  %18159 = vmatmul.mubr.msk.f32.vlgmr.msra.gmra.mrb[184].mxu1 %vm2024_vm2, %v14237_v40 }
0x1424   :  { %v18115_v36 = vpop.f32.mrb[181].mxu0  ;;  %18154 = vmatmul.mubr.msk.f32.vlgmr.msra.gmra.mrb[188].mxu0 %vm2024_vm2, %v14164_v18  ;;  %18167 = vmatpush3.msra.mxu1 %v15776_v34 }
0x1425   :  { %18162 = vmatpush3.msra.mxu0 %v15775_v35  ;;  %18163 = vmatprep.mubr.msk.f32.mxu0 %vm19007_vm0, %v19008_v11 }
0x1426   :  { %18168 = vmatprep.mubr.msk.f32.mxu1 %vm19007_vm0, %v19008_v11  ;;  %18171 = vmatprep.subr.mxu0 %v19008_v11 }
0x1427   :  { %18176 = vmatprep.subr.mxu1 %v19008_v11 }
0x142a   :  { %v14383_v43 = vpop.f32.mrb[178].mxu1 }
0x142b   :  { %v14310_v44 = vpop.f32.mrb[182].mxu0  ;;  %v18130_v45 = vpop.f32.mrb[179].mxu1  ;;  %18169 = vmatmul.mubr.msk.f32.vlgmr.msra.gmra.mrb[186].mxu1 %vm2024_vm2, %v14383_v43 }
0x142c   :  { %v18125_v46 = vpop.f32.mrb[183].mxu0  ;;  %18164 = vmatmul.mubr.msk.f32.vlgmr.msra.gmra.mrb[190].mxu0 %vm2024_vm2, %v14310_v44  ;;  %18177 = vmatpush3.msra.mxu1 %v15774_v32 }
0x142d   :  { %18172 = vmatpush3.msra.mxu0 %v15773_v30  ;;  %18173 = vmatprep.mubr.msk.f32.mxu0 %vm19007_vm0, %v19008_v11 }
0x142e   :  { %18178 = vmatprep.mubr.msk.f32.mxu1 %vm19007_vm0, %v19008_v11  ;;  %18181 = vmatprep.subr.mxu0 %v19008_v11 }
0x142f   :  { %18186 = vmatprep.subr.mxu1 %v19008_v11 }
0x1442   :  { %v14529_v47 = vpop.f32.mrb[180].mxu1 }
0x1443   :  { %v14456_v48 = vpop.f32.mrb[184].mxu0  ;;  %v18140_v51 = vpop.f32.mrb[181].mxu1  ;;  %18179 = vmatmul.mubr.msk.f32.vlgmr.msra.gmra.mrb[188].mxu1 %vm2024_vm2, %v14529_v47 }
0x1444   :  { %v18135_v53 = vpop.f32.mrb[185].mxu0  ;;  %18174 = vmatmul.mubr.msk.f32.vlgmr.msra.gmra.mrb[192].mxu0 %vm2024_vm2, %v14456_v48  ;;  %18187 = vmatpush3.msra.mxu1 %v15776_v34 }
0x1445   :  { %18182 = vmatpush3.msra.mxu0 %v15775_v35  ;;  %18183 = vmatprep.mubr.msk.f32.mxu0 %vm19007_vm0, %v19008_v11 }
0x1446   :  { %18188 = vmatprep.mubr.msk.f32.mxu1 %vm19007_vm0, %v19008_v11  ;;  %18810 = vmatprep.subr.bf16.mxu0 %v18809_v39  ;;  %v15779_v11 = vld [vmem:[%s21564_s7 + $0x50] sm:$0xff] }
0x1447   :  { %v18813_v31 = vpack.c.bf16 %v15780_v1, %v15779_v11  ;;  %18819 = vmatprep.subr.msk.bf16.mxu1 %vm20279_vm4, %v18817_v58 }
0x144a   :  { %v14675_v54 = vpop.f32.mrb[182].mxu1 }
0x144b   :  { %v14602_v55 = vpop.f32.mrb[186].mxu0  ;;  %v18150_v57 = vpop.f32.mrb[183].mxu1  ;;  %18189 = vmatmul.mubr.msk.f32.vlgmr.msra.gmra.mrb[190].mxu1 %vm2024_vm2, %v14675_v54 }
0x144c   :  { %v18145_v59 = vpop.f32.mrb[187].mxu0  ;;  %18184 = vmatmul.mubr.msk.f32.vlgmr.msra.gmra.mrb[194].mxu0 %vm2024_vm2, %v14602_v55  ;;  %18822 = vmatpush3.bf16.xpose.msk.msra.mxu1 %vm20279_vm4, %v18817_v58 }
0x144d   :  { %18812 = vmatpush3.bf16.msra.mxu0 %v18809_v39  ;;  %18825 = vmatprep.subr.msk.bf16.mxu1 %vm20279_vm4, %v18823_v2 }
0x144e   :  { %18814 = vmatprep.subr.bf16.mxu0 %v18813_v31 }
0x1451   :  { %18816 = vmatpush3.bf16.msra.mxu0 %v18813_v31 }
0x1454   :  { %18828 = vmatpush3.bf16.xpose.msk.msra.mxu1 %vm20279_vm4, %v18823_v2 }
0x14f6   :  { %v14821_v5 = vpop.f32.mrb[184].mxu1 }
0x14f7   :  { %v14748_v50 = vpop.f32.mrb[188].mxu0  ;;  %v18160_v15 = vpop.f32.mrb[185].mxu1 }
0x14f8   :  { %v15263_v26 = vadd.f32 %v14821_v5, %v14748_v50  ;;  %v18155_v16 = vpop.f32.mrb[189].mxu0 }
0x14fe   :  { %v14967_v4 = vpop.f32.mrb[186].mxu1 }
0x14ff   :  { %v14894_v9 = vpop.f32.mrb[190].mxu0  ;;  %v18170_v8 = vpop.f32.mrb[187].mxu1 }
0x1500   :  { %v15265_v7 = vadd.f32 %v15263_v26, %v14894_v9  ;;  %v18165_v13 = vpop.f32.mrb[191].mxu0 }
0x1502   :  { %v15267_v42 = vadd.f32 %v15265_v7, %v14967_v4 }
0x1504   :  { %v15275_v19 = vadd.f32 %v15926_v12, %v15267_v42 }
0x1506   :  { %v15277_v24 = vadd.f32 %v15275_v19, %v20974_v22  ;;  %v15927_v22 = vld [vmem:[%s21565_s8 + $0x7] ss:$0 sm:$0xff] }
0x1508   :  { %18199 = vmatprep.mubr.msk.f32.mxu0 %vm193_vm1, %v15277_v24 }
0x1516   :  { %v15113_v52 = vpop.f32.mrb[188].mxu1 }
0x1517   :  { %v15040_v0 = vpop.f32.mrb[192].mxu0  ;;  %v18180_v3 = vpop.f32.mrb[189].mxu1 }
0x1518   :  { %v15264_v20 = vadd.f32 %v15113_v52, %v15040_v0  ;;  %v18175_v14 = vpop.f32.mrb[193].mxu0 }
0x151e   :  { %v15259_v28 = vpop.f32.mrb[190].mxu1 }
0x151f   :  { %v15186_v62 = vpop.f32.mrb[194].mxu0  ;;  %v18190_v37 = vpop.f32.mrb[191].mxu1 }
0x1520   :  { %v15266_v21 = vadd.f32 %v15264_v20, %v15186_v62  ;;  %v18185_v10 = vpop.f32.mrb[195].mxu0 }
0x1522   :  { %v15268_v23 = vadd.f32 %v15266_v21, %v15259_v28 }
0x1524   :  { %v15276_v25 = vadd.f32 %v15926_v12, %v15268_v23 }
0x1526   :  { %v15278_v41 = vadd.f32 %v15276_v25, %v21010_v17  ;;  %v15930_v17 = vld [vmem:[%s21565_s8 + $0x6] ss:$0 sm:$0xff] }
0x1528   :  { %18200 = vmatmul.mubr.msk.f32.vlgmr.msra.gmra.mrb[196].mxu0 %vm193_vm1, %v15278_v41 }
0x15fb   :  { %v18201_v27 = vpop.f32.mrb[196].mxu0 }
0x15fc   :  { %v15363_v33 = vadd.f32 %v18201_v27, %v15927_v22  ;;  %v15357_v29 = vpop.f32.mrb[197].mxu0 }
0x15fd   :  { %v15358_v30 = vadd.f32 %v15927_v22, %v15357_v29 }
0x15fe   :  { %v15367_v34 = vmax.f32 %v15363_v33, 0.0 }
0x15ff   :  { %v15366_v32 = vmax.f32 %v15358_v30, 0.0 }
0x1601   :  { %18210 = vmatprep.mubr.msk.f32.mxu1 %vm7716_vm3, %v15366_v32 }
0x1602   :  { %18211 = vmatmul.mubr.msk.f32.vlgmr.msra.gmra.mrb[192].mxu1 %vm7716_vm3, %v15367_v34 }
0x16d5   :  { %v18212_v40 = vpop.f32.mrb[192].mxu1 }
0x16d6   :  { %v15464_v35 = vadd.f32 %v18212_v40, %v15930_v17  ;;  %v15458_v18 = vpop.f32.mrb[193].mxu1 }
0x16d7   :  { %v15459_v38 = vadd.f32 %v15930_v17, %v15458_v18 }
0x16d8   :  { %15468 = vst.msk [vmem:[#allocation2 + $0x8] sm:$0xff] %vm193_vm1, %v15464_v35 }
0x16d9   :  { %15467 = vst.msk [vmem:[#allocation2] sm:$0xff] %vm193_vm1, %v15459_v38 }
0x16da   :  { %18993 = shalt.err (!%p18990_p4)
}
0x16db   :  { %s18994_s23 = scalar_lea.hbm %s21566_s9, 256 }
0x16dc   :  { %p18995_p5 = scmp.ne.s32.totalorder %s21566_s9, %s18994_s23  ;;  %p18998_p6 = scmp.lt.u32.totalorder %s18994_s23, %s21566_s9 }
0x16de   :  { %p19000_p7 = pnand %p18998_p6, %p18995_p5 }
0x16e0   :  { %19003 = shalt.err (!%p19000_p7)
}
0x16e1   :  { %s19010_s26 = smov 128   ;;  %s19011_s4 = smov 8  }
0x16e2   :  { %15480 = dma.vmem_to_hbm [thread:$0]  %s15475_s20, 256, %s21566_s9, [#allocation3], %s19010_s26, %s19010_s26, %s19011_s4  }
0x16e3   :  { %19004 = dma.done.wait [#allocation3], 256  }
0x16e4   :  { %19005 = vsyncadd [#allocation3], 4294967040 }
0x16e5   :  { %15484 = vsyncpa [#allocation3], 1 }

</bundles_post_ra>
